<compile_context>
chip_gen: v5e
topology: v5e:2x2
jax: 0.10.0
libtpu: 0.0.40
codegen_flags: <defaults>
</compile_context>

<pallas_src>
import functools
import math

import jax
import jax.numpy as jnp
from jax.experimental import pallas as pl
from jax.experimental.pallas import tpu as pltpu


# --------------------------------------------------------------------------
# Fast sine: sin(2*pi*z) for z given in "turns" (w0/(2*pi) folded into W, b).
# Wrap to [-0.5, 0.5) with one floor, fold to [-0.25, 0.25] (quarter period),
# degree-11 odd Taylor polynomial -> max abs error ~6e-8.
# --------------------------------------------------------------------------
_TWO_PI = 2.0 * math.pi
_SIN_TURNS_COEFFS = tuple(
    ((-1.0) ** k) * (_TWO_PI ** (2 * k + 1)) / math.factorial(2 * k + 1)
    for k in range(6)   # degrees 1, 3, 5, 7, 9, 11
)


def _sin_turns(z):
    r = z - jnp.floor(z + 0.5)                         # wrap to [-0.5, 0.5)
    half = jnp.where(r >= 0.0, 0.5, -0.5)
    t = jnp.where(jnp.abs(r) > 0.25, half - r, r)      # fold to [-0.25, 0.25]
    t2 = t * t
    p = jnp.float32(_SIN_TURNS_COEFFS[-1])
    for c in _SIN_TURNS_COEFFS[-2::-1]:
        p = p * t2 + jnp.float32(c)
    return p * t


# --------------------------------------------------------------------------
# Kernel
# --------------------------------------------------------------------------
def fused_siren_kernel(*refs, apply_sine, vpu_k_max=8):
    """refs = (x_ref, w_0, b_0, w_1, b_1, ..., w_{L-1}, b_{L-1}, o_ref).

    x_ref : (dim_in, tn)      feature-major input tile
    w_l   : (dout_l, din_l)   full weight (w0/(2*pi) folded in for sine layers)
    b_l   : (dout_l, 1)       full bias   (w0/(2*pi) folded in for sine layers)
    o_ref : (dim_out, tn)     feature-major output tile (lane-dense)
    """
    x_ref = refs[0]
    o_ref = refs[-1]
    n_layers = len(apply_sine)

    h = x_ref[...].astype(jnp.float32)                 # (din_0, tn)
    for li in range(n_layers):
        w = refs[1 + 2 * li][...]                      # (dout, din)
        b = refs[2 + 2 * li][...]                      # (dout, 1)
        k = w.shape[1]
        if k <= vpu_k_max:
            # K is tiny: VPU broadcast-FMAs beat padding the MXU contraction
            # axis from K to 128 (fill/drain waste, esp. on v5e).
            y = b + w[:, 0:1] * h[0:1, :]
            for kk in range(1, k):
                y = y + w[:, kk:kk + 1] * h[kk:kk + 1, :]
        else:
            y = jnp.dot(w, h, preferred_element_type=jnp.float32) + b
        if apply_sine[li]:
            y = _sin_turns(y)                          # = sin(w0 * linear(x))
        h = y
    o_ref[...] = h.astype(o_ref.dtype)


# --------------------------------------------------------------------------
# Wrapper (feature-major API — no transpose / pad / slice HBM round trips)
# --------------------------------------------------------------------------
def _choose_tile(n, tn_max, min_steps):
    # Largest lane-aligned tile <= tn_max that still leaves >= min_steps grid
    # steps (>= 2 per v7x TensorCore); floor 128.
    tn = min(tn_max, -(-n // min_steps))
    tn = max(128, (tn // 128) * 128)
    return tn


def siren_net_forward(x_fm, kparams, *, tn_max=2048, min_steps=4, vpu_k_max=8):
    """Fused SIREN forward on feature-major data.

    x_fm    : (dim_in, N) feature-major coordinates.
    kparams : list of (w, b_col, apply_sine) from prepare_kernel_params().
    returns : (dim_out, N) feature-major output.
    """
    dim_in, n = x_fm.shape
    dim_out = kparams[-1][0].shape[0]
    tn = _choose_tile(n, tn_max, min_steps)
    grid = (pl.cdiv(n, tn),)                           # partial last block OK

    flat_params = []
    in_specs = [pl.BlockSpec((dim_in, tn), lambda i: (0, i))]   # x tile
    apply_sine = []
    for (w, b, s) in kparams:
        flat_params += [w, b]
        in_specs += [
            pl.BlockSpec(w.shape, lambda i: (0, 0)),   # full weight, resident
            pl.BlockSpec(b.shape, lambda i: (0, 0)),   # full bias, resident
        ]
        apply_sine.append(s)

    kernel = functools.partial(fused_siren_kernel,
                               apply_sine=tuple(apply_sine),
                               vpu_k_max=vpu_k_max)

    return pl.pallas_call(
        kernel,
        out_shape=jax.ShapeDtypeStruct((dim_out, n), x_fm.dtype),
        grid_spec=pltpu.PrefetchScalarGridSpec(
            num_scalar_prefetch=0,
            grid=grid,
            in_specs=in_specs,
            out_specs=pl.BlockSpec((dim_out, tn), lambda i: (0, i)),
        ),
        compiler_params=pltpu.CompilerParams(
            dimension_semantics=("parallel",)),
    )(x_fm, *flat_params)


def siren_net_forward_rowmajor(x, kparams, **kw):
    """Compatibility path for PyTorch's (N, dim) layout.  Costs two extra HBM
    passes (transposes); prefer the feature-major entry point."""
    return siren_net_forward(x.T, kparams, **kw).T


# --------------------------------------------------------------------------
# Parameters
# --------------------------------------------------------------------------
def init_siren_params(key, dim_in, dim_hidden, dim_out, num_layers,
                      w0=30.0, w0_initial=30.0, c=6.0):
    """Deterministic parameter init matching SirenLayer.init_ (raw params)."""
    params = []
    for ind in range(num_layers):
        is_first = ind == 0
        layer_w0 = w0_initial if is_first else w0
        layer_dim_in = dim_in if is_first else dim_hidden
        w_std = (1.0 / layer_dim_in) if is_first else (
            (c / layer_dim_in) ** 0.5 / layer_w0)
        key, kw, kb = jax.random.split(key, 3)
        w = jax.random.uniform(kw, (dim_hidden, layer_dim_in),
                               minval=-w_std, maxval=w_std, dtype=jnp.float32)
        b = jax.random.uniform(kb, (1, dim_hidden),
                               minval=-w_std, maxval=w_std, dtype=jnp.float32)
        params.append((w, b, layer_w0, True))            # True -> Sine(w0)
    # last layer: Identity activation
    w_std = (c / dim_hidden) ** 0.5 / w0
    key, kw, kb = jax.random.split(key, 3)
    w = jax.random.uniform(kw, (dim_out, dim_hidden),
                           minval=-w_std, maxval=w_std, dtype=jnp.float32)
    b = jax.random.uniform(kb, (1, dim_out),
                           minval=-w_std, maxval=w_std, dtype=jnp.float32)
    params.append((w, b, w0, False))                     # False -> identity
    return params


def prepare_kernel_params(params):
    """One-time prep (NOT per forward call): for sine layers fold w0/(2*pi)
    into (W, b) so the kernel argument is in 'turns' for the fast sine, and
    reshape biases to feature-major (dim_out, 1) columns."""
    kparams = []
    for (w, b, layer_w0, apply_sine) in params:
        w = w.astype(jnp.float32)
        b_col = jnp.reshape(b, (-1, 1)).astype(jnp.float32)
        if apply_sine:
            scale = jnp.float32(layer_w0 / _TWO_PI)
            w = w * scale
            b_col = b_col * scale
        kparams.append((w, b_col, bool(apply_sine)))
    return kparams


def siren_net_reference(x, params):
    """Pure-JAX reference on the raw (unfolded) parameters, row-major (N, d)."""
    for (w, b, layer_w0, apply_sine) in params:
        y = x @ w.T + b
        x = jnp.sin(layer_w0 * y) if apply_sine else y
    return x


# --------------------------------------------------------------------------
if __name__ == "__main__":
    dim_in, dim_hidden, dim_out, num_layers = 2, 32, 3, 3
    n_points = 4096                       # tn=1024 -> grid of 4 (2 per v7x TC)

    key = jax.random.PRNGKey(0)
    key, kx = jax.random.split(key)
    # Coordinates generated feature-major (dim_in, N): no wrapper transposes.
    xt = jax.random.uniform(kx, (dim_in, n_points), minval=-1.0, maxval=1.0,
                            dtype=jnp.float32)

    params = init_siren_params(key, dim_in, dim_hidden, dim_out, num_layers)
    kparams = prepare_kernel_params(params)

    # full SIREN network (3 sine SirenLayers + identity SirenLayer)
    out = jax.block_until_ready(siren_net_forward(xt, kparams))
    ref = siren_net_reference(xt.T, params).T
    assert out.shape == (dim_out, n_points)
    assert jnp.allclose(out, ref, atol=1e-4, rtol=1e-4), \
        float(jnp.max(jnp.abs(out - ref)))

    # single SirenLayer (sin(w0 * linear(x))), ragged N -> partial last block
    n2 = 1000
    key, kx2 = jax.random.split(key)
    xt2 = jax.random.uniform(kx2, (dim_in, n2), minval=-1.0, maxval=1.0,
                             dtype=jnp.float32)
    single = params[:1]
    out1 = jax.block_until_ready(
        siren_net_forward(xt2, prepare_kernel_params(single)))
    ref1 = siren_net_reference(xt2.T, single).T
    assert out1.shape == (dim_hidden, n2)
    assert jnp.allclose(out1, ref1, atol=1e-4, rtol=1e-4)

    # row-major compatibility wrapper (PyTorch (N, dim) convention)
    out_rm = jax.block_until_ready(siren_net_forward_rowmajor(xt.T, kparams))
    assert out_rm.shape == (n_points, dim_out)
    assert jnp.allclose(out_rm, ref.T, atol=1e-4, rtol=1e-4)

    print("KERNEL_OK")
</pallas_src>

<mosaic_0001>
module attributes {stable_mosaic.version = 11 : i64} {
  func.func @fused_siren_kernel(%arg0: i32, %arg1: memref<2x1024xf32, #tpu.memory_space<vmem>>, %arg2: memref<32x2xf32, #tpu.memory_space<vmem>>, %arg3: memref<32x1xf32, #tpu.memory_space<vmem>>, %arg4: memref<32x32xf32, #tpu.memory_space<vmem>>, %arg5: memref<32x1xf32, #tpu.memory_space<vmem>>, %arg6: memref<32x32xf32, #tpu.memory_space<vmem>>, %arg7: memref<32x1xf32, #tpu.memory_space<vmem>>, %arg8: memref<3x32xf32, #tpu.memory_space<vmem>>, %arg9: memref<3x1xf32, #tpu.memory_space<vmem>>, %arg10: memref<3x1024xf32, #tpu.memory_space<vmem>>) attributes {dimension_semantics = [#tpu.dimension_semantics<parallel>], iteration_bounds = array<i64: 4>, scalar_prefetch = 0 : i64, scratch_operands = 0 : i64, tpu.core_type = #tpu.core_type<tc>, window_params = [{transform_indices = @transform_0, window_bounds = array<i64: 2, 1024>}, {pipeline_mode = #tpu.pipeline_mode<synchronous>, transform_indices = @transform_1, window_bounds = array<i64: 32, 2>}, {pipeline_mode = #tpu.pipeline_mode<synchronous>, transform_indices = @transform_2, window_bounds = array<i64: 32, 1>}, {pipeline_mode = #tpu.pipeline_mode<synchronous>, transform_indices = @transform_3, window_bounds = array<i64: 32, 32>}, {pipeline_mode = #tpu.pipeline_mode<synchronous>, transform_indices = @transform_4, window_bounds = array<i64: 32, 1>}, {pipeline_mode = #tpu.pipeline_mode<synchronous>, transform_indices = @transform_5, window_bounds = array<i64: 32, 32>}, {pipeline_mode = #tpu.pipeline_mode<synchronous>, transform_indices = @transform_6, window_bounds = array<i64: 32, 1>}, {pipeline_mode = #tpu.pipeline_mode<synchronous>, transform_indices = @transform_7, window_bounds = array<i64: 3, 32>}, {pipeline_mode = #tpu.pipeline_mode<synchronous>, transform_indices = @transform_8, window_bounds = array<i64: 3, 1>}, {transform_indices = @transform_9, window_bounds = array<i64: 3, 1024>}]} {
    %c0 = arith.constant 0 : index
    %c0_0 = arith.constant 0 : index
    %0 = vector.load %arg1[%c0, %c0_0] : memref<2x1024xf32, #tpu.memory_space<vmem>>, vector<2x1024xf32>
    %c0_1 = arith.constant 0 : index
    %c0_2 = arith.constant 0 : index
    %1 = vector.load %arg2[%c0_1, %c0_2] : memref<32x2xf32, #tpu.memory_space<vmem>>, vector<32x2xf32>
    %c0_3 = arith.constant 0 : index
    %c0_4 = arith.constant 0 : index
    %2 = vector.load %arg3[%c0_3, %c0_4] : memref<32x1xf32, #tpu.memory_space<vmem>>, vector<32x1xf32>
    %3 = vector.extract_strided_slice %1 {offsets = [0, 0], sizes = [32, 1], strides = [1, 1]} : vector<32x2xf32> to vector<32x1xf32>
    %4 = vector.extract_strided_slice %0 {offsets = [0, 0], sizes = [1, 1024], strides = [1, 1]} : vector<2x1024xf32> to vector<1x1024xf32>
    %5 = vector.broadcast %3 : vector<32x1xf32> to vector<32x1024xf32>
    %6 = vector.broadcast %4 : vector<1x1024xf32> to vector<32x1024xf32>
    %7 = arith.mulf %5, %6 : vector<32x1024xf32>
    %8 = vector.broadcast %2 : vector<32x1xf32> to vector<32x1024xf32>
    %9 = arith.addf %8, %7 : vector<32x1024xf32>
    %10 = vector.extract_strided_slice %1 {offsets = [0, 1], sizes = [32, 1], strides = [1, 1]} : vector<32x2xf32> to vector<32x1xf32>
    %11 = vector.extract_strided_slice %0 {offsets = [1, 0], sizes = [1, 1024], strides = [1, 1]} : vector<2x1024xf32> to vector<1x1024xf32>
    %12 = vector.broadcast %10 : vector<32x1xf32> to vector<32x1024xf32>
    %13 = vector.broadcast %11 : vector<1x1024xf32> to vector<32x1024xf32>
    %14 = arith.mulf %12, %13 : vector<32x1024xf32>
    %15 = arith.addf %9, %14 : vector<32x1024xf32>
    %cst = arith.constant 5.000000e-01 : f32
    %16 = vector.broadcast %cst : f32 to vector<32x1024xf32>
    %17 = arith.addf %15, %16 : vector<32x1024xf32>
    %18 = math.floor %17 : vector<32x1024xf32>
    %19 = arith.subf %15, %18 : vector<32x1024xf32>
    %cst_5 = arith.constant 0.000000e+00 : f32
    %20 = vector.broadcast %cst_5 : f32 to vector<32x1024xf32>
    %21 = arith.cmpf oge, %19, %20 : vector<32x1024xf32>
    %cst_6 = arith.constant 5.000000e-01 : f32
    %cst_7 = arith.constant -5.000000e-01 : f32
    %22 = vector.broadcast %cst_6 : f32 to vector<32x1024xf32>
    %23 = vector.broadcast %cst_7 : f32 to vector<32x1024xf32>
    %24 = arith.select %21, %22, %23 : vector<32x1024xi1>, vector<32x1024xf32>
    %25 = math.absf %19 : vector<32x1024xf32>
    %cst_8 = arith.constant 2.500000e-01 : f32
    %26 = vector.broadcast %cst_8 : f32 to vector<32x1024xf32>
    %27 = arith.cmpf ogt, %25, %26 : vector<32x1024xf32>
    %28 = arith.subf %24, %19 : vector<32x1024xf32>
    %29 = arith.select %27, %28, %19 : vector<32x1024xi1>, vector<32x1024xf32>
    %30 = arith.mulf %29, %29 : vector<32x1024xf32>
    %cst_9 = arith.constant -15.0946426 : f32
    %31 = vector.broadcast %cst_9 : f32 to vector<32x1024xf32>
    %32 = arith.mulf %31, %30 : vector<32x1024xf32>
    %cst_10 = arith.constant 42.0586929 : f32
    %33 = vector.broadcast %cst_10 : f32 to vector<32x1024xf32>
    %34 = arith.addf %32, %33 : vector<32x1024xf32>
    %35 = arith.mulf %34, %30 : vector<32x1024xf32>
    %cst_11 = arith.constant -76.7058563 : f32
    %36 = vector.broadcast %cst_11 : f32 to vector<32x1024xf32>
    %37 = arith.addf %35, %36 : vector<32x1024xf32>
    %38 = arith.mulf %37, %30 : vector<32x1024xf32>
    %cst_12 = arith.constant 81.6052475 : f32
    %39 = vector.broadcast %cst_12 : f32 to vector<32x1024xf32>
    %40 = arith.addf %38, %39 : vector<32x1024xf32>
    %41 = arith.mulf %40, %30 : vector<32x1024xf32>
    %cst_13 = arith.constant -4.134170e+01 : f32
    %42 = vector.broadcast %cst_13 : f32 to vector<32x1024xf32>
    %43 = arith.addf %41, %42 : vector<32x1024xf32>
    %44 = arith.mulf %43, %30 : vector<32x1024xf32>
    %cst_14 = arith.constant 6.28318548 : f32
    %45 = vector.broadcast %cst_14 : f32 to vector<32x1024xf32>
    %46 = arith.addf %44, %45 : vector<32x1024xf32>
    %47 = arith.mulf %46, %29 : vector<32x1024xf32>
    %c0_15 = arith.constant 0 : index
    %c0_16 = arith.constant 0 : index
    %48 = vector.load %arg4[%c0_15, %c0_16] : memref<32x32xf32, #tpu.memory_space<vmem>>, vector<32x32xf32>
    %c0_17 = arith.constant 0 : index
    %c0_18 = arith.constant 0 : index
    %49 = vector.load %arg5[%c0_17, %c0_18] : memref<32x1xf32, #tpu.memory_space<vmem>>, vector<32x1xf32>
    %cst_19 = arith.constant dense<0.000000e+00> : vector<32x1024xf32>
    %50 = tpu.matmul %48, %47, %cst_19 {dimension_numbers = #tpu.dot_dimension_numbers<[1], [0], [0], [1], [0, 0, 1, 1], [], []>} : vector<32x32xf32>, vector<32x1024xf32>, vector<32x1024xf32> -> vector<32x1024xf32>
    %51 = vector.broadcast %49 : vector<32x1xf32> to vector<32x1024xf32>
    %52 = arith.addf %50, %51 : vector<32x1024xf32>
    %cst_20 = arith.constant 5.000000e-01 : f32
    %53 = vector.broadcast %cst_20 : f32 to vector<32x1024xf32>
    %54 = arith.addf %52, %53 : vector<32x1024xf32>
    %55 = math.floor %54 : vector<32x1024xf32>
    %56 = arith.subf %52, %55 : vector<32x1024xf32>
    %cst_21 = arith.constant 0.000000e+00 : f32
    %57 = vector.broadcast %cst_21 : f32 to vector<32x1024xf32>
    %58 = arith.cmpf oge, %56, %57 : vector<32x1024xf32>
    %cst_22 = arith.constant 5.000000e-01 : f32
    %cst_23 = arith.constant -5.000000e-01 : f32
    %59 = vector.broadcast %cst_22 : f32 to vector<32x1024xf32>
    %60 = vector.broadcast %cst_23 : f32 to vector<32x1024xf32>
    %61 = arith.select %58, %59, %60 : vector<32x1024xi1>, vector<32x1024xf32>
    %62 = math.absf %56 : vector<32x1024xf32>
    %cst_24 = arith.constant 2.500000e-01 : f32
    %63 = vector.broadcast %cst_24 : f32 to vector<32x1024xf32>
    %64 = arith.cmpf ogt, %62, %63 : vector<32x1024xf32>
    %65 = arith.subf %61, %56 : vector<32x1024xf32>
    %66 = arith.select %64, %65, %56 : vector<32x1024xi1>, vector<32x1024xf32>
    %67 = arith.mulf %66, %66 : vector<32x1024xf32>
    %cst_25 = arith.constant -15.0946426 : f32
    %68 = vector.broadcast %cst_25 : f32 to vector<32x1024xf32>
    %69 = arith.mulf %68, %67 : vector<32x1024xf32>
    %cst_26 = arith.constant 42.0586929 : f32
    %70 = vector.broadcast %cst_26 : f32 to vector<32x1024xf32>
    %71 = arith.addf %69, %70 : vector<32x1024xf32>
    %72 = arith.mulf %71, %67 : vector<32x1024xf32>
    %cst_27 = arith.constant -76.7058563 : f32
    %73 = vector.broadcast %cst_27 : f32 to vector<32x1024xf32>
    %74 = arith.addf %72, %73 : vector<32x1024xf32>
    %75 = arith.mulf %74, %67 : vector<32x1024xf32>
    %cst_28 = arith.constant 81.6052475 : f32
    %76 = vector.broadcast %cst_28 : f32 to vector<32x1024xf32>
    %77 = arith.addf %75, %76 : vector<32x1024xf32>
    %78 = arith.mulf %77, %67 : vector<32x1024xf32>
    %cst_29 = arith.constant -4.134170e+01 : f32
    %79 = vector.broadcast %cst_29 : f32 to vector<32x1024xf32>
    %80 = arith.addf %78, %79 : vector<32x1024xf32>
    %81 = arith.mulf %80, %67 : vector<32x1024xf32>
    %cst_30 = arith.constant 6.28318548 : f32
    %82 = vector.broadcast %cst_30 : f32 to vector<32x1024xf32>
    %83 = arith.addf %81, %82 : vector<32x1024xf32>
    %84 = arith.mulf %83, %66 : vector<32x1024xf32>
    %c0_31 = arith.constant 0 : index
    %c0_32 = arith.constant 0 : index
    %85 = vector.load %arg6[%c0_31, %c0_32] : memref<32x32xf32, #tpu.memory_space<vmem>>, vector<32x32xf32>
    %c0_33 = arith.constant 0 : index
    %c0_34 = arith.constant 0 : index
    %86 = vector.load %arg7[%c0_33, %c0_34] : memref<32x1xf32, #tpu.memory_space<vmem>>, vector<32x1xf32>
    %cst_35 = arith.constant dense<0.000000e+00> : vector<32x1024xf32>
    %87 = tpu.matmul %85, %84, %cst_35 {dimension_numbers = #tpu.dot_dimension_numbers<[1], [0], [0], [1], [0, 0, 1, 1], [], []>} : vector<32x32xf32>, vector<32x1024xf32>, vector<32x1024xf32> -> vector<32x1024xf32>
    %88 = vector.broadcast %86 : vector<32x1xf32> to vector<32x1024xf32>
    %89 = arith.addf %87, %88 : vector<32x1024xf32>
    %cst_36 = arith.constant 5.000000e-01 : f32
    %90 = vector.broadcast %cst_36 : f32 to vector<32x1024xf32>
    %91 = arith.addf %89, %90 : vector<32x1024xf32>
    %92 = math.floor %91 : vector<32x1024xf32>
    %93 = arith.subf %89, %92 : vector<32x1024xf32>
    %cst_37 = arith.constant 0.000000e+00 : f32
    %94 = vector.broadcast %cst_37 : f32 to vector<32x1024xf32>
    %95 = arith.cmpf oge, %93, %94 : vector<32x1024xf32>
    %cst_38 = arith.constant 5.000000e-01 : f32
    %cst_39 = arith.constant -5.000000e-01 : f32
    %96 = vector.broadcast %cst_38 : f32 to vector<32x1024xf32>
    %97 = vector.broadcast %cst_39 : f32 to vector<32x1024xf32>
    %98 = arith.select %95, %96, %97 : vector<32x1024xi1>, vector<32x1024xf32>
    %99 = math.absf %93 : vector<32x1024xf32>
    %cst_40 = arith.constant 2.500000e-01 : f32
    %100 = vector.broadcast %cst_40 : f32 to vector<32x1024xf32>
    %101 = arith.cmpf ogt, %99, %100 : vector<32x1024xf32>
    %102 = arith.subf %98, %93 : vector<32x1024xf32>
    %103 = arith.select %101, %102, %93 : vector<32x1024xi1>, vector<32x1024xf32>
    %104 = arith.mulf %103, %103 : vector<32x1024xf32>
    %cst_41 = arith.constant -15.0946426 : f32
    %105 = vector.broadcast %cst_41 : f32 to vector<32x1024xf32>
    %106 = arith.mulf %105, %104 : vector<32x1024xf32>
    %cst_42 = arith.constant 42.0586929 : f32
    %107 = vector.broadcast %cst_42 : f32 to vector<32x1024xf32>
    %108 = arith.addf %106, %107 : vector<32x1024xf32>
    %109 = arith.mulf %108, %104 : vector<32x1024xf32>
    %cst_43 = arith.constant -76.7058563 : f32
    %110 = vector.broadcast %cst_43 : f32 to vector<32x1024xf32>
    %111 = arith.addf %109, %110 : vector<32x1024xf32>
    %112 = arith.mulf %111, %104 : vector<32x1024xf32>
    %cst_44 = arith.constant 81.6052475 : f32
    %113 = vector.broadcast %cst_44 : f32 to vector<32x1024xf32>
    %114 = arith.addf %112, %113 : vector<32x1024xf32>
    %115 = arith.mulf %114, %104 : vector<32x1024xf32>
    %cst_45 = arith.constant -4.134170e+01 : f32
    %116 = vector.broadcast %cst_45 : f32 to vector<32x1024xf32>
    %117 = arith.addf %115, %116 : vector<32x1024xf32>
    %118 = arith.mulf %117, %104 : vector<32x1024xf32>
    %cst_46 = arith.constant 6.28318548 : f32
    %119 = vector.broadcast %cst_46 : f32 to vector<32x1024xf32>
    %120 = arith.addf %118, %119 : vector<32x1024xf32>
    %121 = arith.mulf %120, %103 : vector<32x1024xf32>
    %c0_47 = arith.constant 0 : index
    %c0_48 = arith.constant 0 : index
    %122 = vector.load %arg8[%c0_47, %c0_48] : memref<3x32xf32, #tpu.memory_space<vmem>>, vector<3x32xf32>
    %c0_49 = arith.constant 0 : index
    %c0_50 = arith.constant 0 : index
    %123 = vector.load %arg9[%c0_49, %c0_50] : memref<3x1xf32, #tpu.memory_space<vmem>>, vector<3x1xf32>
    %cst_51 = arith.constant dense<0.000000e+00> : vector<3x1024xf32>
    %124 = tpu.matmul %122, %121, %cst_51 {dimension_numbers = #tpu.dot_dimension_numbers<[1], [0], [0], [1], [0, 0, 1, 1], [], []>} : vector<3x32xf32>, vector<32x1024xf32>, vector<3x1024xf32> -> vector<3x1024xf32>
    %125 = vector.broadcast %123 : vector<3x1xf32> to vector<3x1024xf32>
    %126 = arith.addf %124, %125 : vector<3x1024xf32>
    %c0_52 = arith.constant 0 : index
    %c0_53 = arith.constant 0 : index
    %127 = vector.load %arg10[%c0_52, %c0_53] : memref<3x1024xf32, #tpu.memory_space<vmem>>, vector<3x1024xf32>
    tpu.vector_store %arg10[%c0_52, %c0_53], %126 {strides = array<i32>} : memref<3x1024xf32, #tpu.memory_space<vmem>>, vector<3x1024xf32>,
    return
  }
  func.func @transform_0(%arg0: i32) -> (i32, i32) {
    %c0_i32 = arith.constant 0 : i32
    %c0_i32_0 = arith.constant 0 : i32
    return %c0_i32, %arg0 : i32, i32
  }
  func.func @transform_1(%arg0: i32) -> (i32, i32) {
    %c0_i32 = arith.constant 0 : i32
    %c0_i32_0 = arith.constant 0 : i32
    %c0_i32_1 = arith.constant 0 : i32
    return %c0_i32, %c0_i32_0 : i32, i32
  }
  func.func @transform_2(%arg0: i32) -> (i32, i32) {
    %c0_i32 = arith.constant 0 : i32
    %c0_i32_0 = arith.constant 0 : i32
    %c0_i32_1 = arith.constant 0 : i32
    return %c0_i32, %c0_i32_0 : i32, i32
  }
  func.func @transform_3(%arg0: i32) -> (i32, i32) {
    %c0_i32 = arith.constant 0 : i32
    %c0_i32_0 = arith.constant 0 : i32
    %c0_i32_1 = arith.constant 0 : i32
    return %c0_i32, %c0_i32_0 : i32, i32
  }
  func.func @transform_4(%arg0: i32) -> (i32, i32) {
    %c0_i32 = arith.constant 0 : i32
    %c0_i32_0 = arith.constant 0 : i32
    %c0_i32_1 = arith.constant 0 : i32
    return %c0_i32, %c0_i32_0 : i32, i32
  }
  func.func @transform_5(%arg0: i32) -> (i32, i32) {
    %c0_i32 = arith.constant 0 : i32
    %c0_i32_0 = arith.constant 0 : i32
    %c0_i32_1 = arith.constant 0 : i32
    return %c0_i32, %c0_i32_0 : i32, i32
  }
  func.func @transform_6(%arg0: i32) -> (i32, i32) {
    %c0_i32 = arith.constant 0 : i32
    %c0_i32_0 = arith.constant 0 : i32
    %c0_i32_1 = arith.constant 0 : i32
    return %c0_i32, %c0_i32_0 : i32, i32
  }
  func.func @transform_7(%arg0: i32) -> (i32, i32) {
    %c0_i32 = arith.constant 0 : i32
    %c0_i32_0 = arith.constant 0 : i32
    %c0_i32_1 = arith.constant 0 : i32
    return %c0_i32, %c0_i32_0 : i32, i32
  }
  func.func @transform_8(%arg0: i32) -> (i32, i32) {
    %c0_i32 = arith.constant 0 : i32
    %c0_i32_0 = arith.constant 0 : i32
    %c0_i32_1 = arith.constant 0 : i32
    return %c0_i32, %c0_i32_0 : i32, i32
  }
  func.func @transform_9(%arg0: i32) -> (i32, i32) {
    %c0_i32 = arith.constant 0 : i32
    %c0_i32_0 = arith.constant 0 : i32
    return %c0_i32, %arg0 : i32, i32
  }
}

</mosaic_0001>

<bundles_post_ra>
// kernel: tpu_custom_call.1
= control target key start
LH: loop header
LB: loop body
LE: loop exit
PB: predicated region body
PF: predicated region fallthrough
CT: control target
= control target key end

     0   :  { %14 = vsyncpa [#allocation3], 0  ;;  %s6145_s0 = inlined_call_operand.vmem [shape: f32[2,4096], index: 0, kind: input, shape index: {}]   ;;  %s6146_s1 = inlined_call_operand.vmem [shape: f32[32,2], index: 1, kind: input, shape index: {}]   ;;  %s6147_s2 = inlined_call_operand.vmem [shape: f32[32,1], index: 2, kind: input, shape index: {}]   ;;  %s6148_s3 = inlined_call_operand.vmem [shape: f32[32,32], index: 3, kind: input, shape index: {}]   ;;  %s6149_s4 = inlined_call_operand.vmem [shape: f32[32,1], index: 4, kind: input, shape index: {}]   ;;  %s6150_s5 = inlined_call_operand.vmem [shape: f32[32,32], index: 5, kind: input, shape index: {}]   ;;  %s6151_s6 = inlined_call_operand.vmem [shape: f32[32,1], index: 6, kind: input, shape index: {}]   ;;  %s6152_s7 = inlined_call_operand.vmem [shape: f32[3,32], index: 7, kind: input, shape index: {}]   ;;  %s6153_s8 = inlined_call_operand.vmem [shape: f32[3,1], index: 8, kind: input, shape index: {}]   ;;  %s6154_s9 = inlined_call_operand.hbm [shape: f32[3,4096], index: 9, kind: output, shape index: {}]  }
   0x1   :  { %16 = vsyncpa [#allocation3 + $0x1], 0  ;;  %s3663_s30 = smov 0   ;;  %s3665_s10 = smov 0  }
   0x2   :  { %s3667_s11 = smov 0   ;;  %s3669_s12 = smov 0  }
   0x3 LB: > { %s3684_s13 = sadd.s32 4294967295, %s3608_s12   ;;  %s3410_s14 = sadd.s32 4294967294, %s3608_s12   ;;  %s3608_s12 = sphi %s3669_s12, %s6196_s12   ;;  %s3604_s11 = sphi %s3667_s11, %s6195_s11   ;;  %s3600_s10 = sphi %s3665_s10, %s6194_s10   ;;  %s3596_s30 = sphi %s3663_s30, %s6193_s30  }
   0x4   : > { %s3688_s15 = sadd.s32 1, %s3608_s12   ;;  %s223_s16 = sadd.s32 1, %s3604_s11 }
   0x5   : > { %s220_s17 = ssub.s32 %s3608_s12, %s3688_s15  ;;  %p233_p0 = scmp.ne.s32.totalorder %s3604_s11, %s3600_s10 }
   0x6   : > { %p221_p1 = scmp.eq.s32.totalorder %s220_s17, 0  ;;  %p234_p2 = scmp.eq.s32.totalorder %s3684_s13, 3 }
   0x7   : > { %p239_p3 = scmp.ne.s32.totalorder %s3600_s10, %s3596_s30  ;;  %p240_p4 = scmp.eq.s32.totalorder %s3410_s14, 3 }
   0x8   : > { %s3699_s18 = scalar_select %p221_p1, %s3604_s11, %s223_s16  }
   0x9   : > { %p3701_p5 = por %p234_p2, %p233_p0  ;;  %p3705_p6 = por %p240_p4, %p239_p3 }
   0xa   : > { %p3413_p7 = scmp.ge.s32.totalorder %s3608_s12, 1  ;;  %p291_p8 = scmp.lt.s32.totalorder %s3608_s12, 5 }
   0xc   : > { %p292_p9 = pnand %p3413_p7, %p291_p8 }
   0xd   : > { %s3415_s16 = sshll.u32 (!%p292_p9), %s3684_s13, 3  ;;  %s324_s14 = sand.u32 (!%p292_p9), 1, %s3600_s10  }
   0xe   : > { %295 = sbr.rel (%p292_p9) target bundleno = 1070 (0x42e), region = 56  ;;  %p328_p10 = scmp.lt.s32.totalorder (!%p292_p9), %s3415_s16, 31 }
   0xf   : > { %s3494_s21 = sshll.u32 (!%p292_p9), %s3684_s13, 5  ;;  %s3335_s27 = scalar_lea.sflag (!%p292_p9), [#allocation3], %s324_s14 }
  0x10   : > { %s3346_s24 = scalar_lea.hbm (!%p292_p9), %s6154_s9, %s3494_s21  ;;  %s3566_s21 = scalar_lea.hbm (!%p292_p9), %s6154_s9, 128 }
  0x11   : > { %s3350_s26 = sshll.u32 (!%p292_p9), %s3346_s24, 4  ;;  %s3351_s26 = int_to_ptr.hbm [resolvable:$true] %s3350_s26 }
  0x12   : > { %s3560_s13 = sshra.s32 (!%p292_p9), %s3351_s26, 4  ;;  %s3561_s13 = int_to_ptr.hbm [resolvable:$true] %s3560_s13 }
  0x13   : > { %v343_v0 = vld [vmem:[%s6147_s2 + $0x18] sm:$0xff]  ;;  %v337_v2 = vld [vmem:[%s6146_s1 + $0x8] sm:$0xff]  ;;  %v3610_v3 = vmov 0   ;;  %v338_v4 = vld [vmem:[%s6146_s1 + $0x10] sm:$0xff]  ;;  %v3611_v6 = vmov 1   ;;  %s6198_s16 = smov (!%p328_p10, %s3415_s16), 31  ;;  %p3567_p0 = scmp.lt.s32.totalorder %s3561_s13, %s6154_s9 }
  0x14   : > { %v339_v1 = vld [vmem:[%s6146_s1 + $0x18] sm:$0xff]  ;;  %3540 = vset.pattern.permute.xlu2 %v3610_v3  ;;  %3538 = vset.pattern.permute.xlu1 %v3610_v3  ;;  %v342_v5 = vld [vmem:[%s6147_s2 + $0x10] sm:$0xff]  ;;  %v341_v7 = vld [vmem:[%s6147_s2 + $0x8] sm:$0xff]  ;;  %s3416_s17 = sshll.u32 %s6198_s16, 1  ;;  %s3414_s16 = sshll.u32 %s324_s14, 5 }
  0x15   : > { %3537 = vset.pattern.permute.xlu0 %v3610_v3  ;;  %439 = vperm.xlu1 %3538, %v343_v0   ;;  %v336_v8 = vld [vmem:[%s6146_s1] sm:$0xff]  ;;  %v1256_v10 = vld [vmem:[%s6149_s4 + $0x10] sm:$0xff]  ;;  %v2202_v11 = vld [vmem:[%s6151_s6 + $0x18] sm:$0xff]  ;;  %s3748_s23 = scalar_lea.vmem %s6145_s0, %s3416_s17  ;;  %s326_s17 = scalar_lea.vmem [#allocation2], %s3414_s16 }
  0x16   : > { %361 = vperm.xlu0 %3537, %v339_v1   ;;  %351 = vperm.xlu2 %3540, %v337_v2   ;;  %v340_v9 = vld [vmem:[%s6147_s2] sm:$0xff]  ;;  %v2200_v12 = vld [vmem:[%s6151_s6 + $0x8] sm:$0xff]  ;;  %s3348_s25 = sshll.u32 %s326_s17, 4  ;;  %s3562_s28 = scalar_lea.hbm %s3561_s13, 32  ;;  %s3349_s25 = int_to_ptr.vmem [resolvable:$true] %s3348_s25 }
  0x17   : > { %v334_v14 = vld [vmem:[%s3748_s23] sm:$0xff]  ;;  %p3563_p11 = scmp.ne.s32.totalorder %s3561_s13, %s3562_s28  ;;  %p3568_p1 = scmp.lt.s32.totalorder %s3566_s21, %s3562_s28 }
  0x18   : > { %v366_v15 = vperm.slane %v334_v14, 0  ;;  %v367_v16 = vperm.slane %v334_v14, 2  ;;  %v368_v17 = vperm.slane %v334_v14, 4  ;;  %v369_v18 = vperm.slane %v334_v14, 6 }
  0x19   : > { %v490_v25 = vperm.slane %v334_v14, 1  ;;  %v491_v26 = vperm.slane %v334_v14, 3  ;;  %v492_v27 = vperm.slane %v334_v14, 5  ;;  %v493_v28 = vperm.slane %v334_v14, 7  ;;  %p3564_p12 = pnand %p3563_p11, %p3701_p5  ;;  %p3569_p2 = por %p3568_p1, %p3567_p0 }
  0x1a   : > { %v3757_v21 = vperm.slane %v366_v15, 0  ;;  %v3759_v22 = vperm.slane %v367_v16, 0  ;;  %v3761_v23 = vperm.slane %v368_v17, 0  ;;  %v3763_v24 = vperm.slane %v369_v18, 0 }
  0x1b   : > { %v3775_v34 = vperm.slane %v490_v25, 1  ;;  %v3777_v35 = vperm.slane %v491_v26, 1  ;;  %v3779_v36 = vperm.slane %v492_v27, 1  ;;  %v3781_v37 = vperm.slane %v493_v28, 1  ;;  %p3565_p13 = pneg %p3564_p12 }
  0x1d   : > { %3539 = vset.pattern.permute.xlu1 %v3611_v6  ;;  %p3570_p3 = pnand %p3569_p2, %p3565_p13 }
  0x1e   : > { %356 = vperm.xlu0 %3537, %v338_v4   ;;  %434 = vperm.xlu2 %3540, %v342_v5  }
  0x1f   : > { %487 = vperm.xlu1 %3539, %v339_v1  }
  0x26   : > { %3541 = vset.pattern.permute.xlu0 %v3611_v6  ;;  %429 = vperm.xlu2 %3540, %v341_v7  }
  0x27   : > { %3542 = vset.pattern.permute.xlu1 %v3610_v3  ;;  %483 = vperm.xlu0 %3541, %v338_v4  }
  0x28   : > { %346 = vperm.xlu1 %3542, %v336_v8  }
  0x2e   : > { %424 = vperm.xlu2 %3540, %v340_v9  }
  0x2f   : > { %475 = vperm.xlu0 %3541, %v336_v8  }
  0x30   : > { %3543 = vset.pattern.permute.xlu1 %v3611_v6 }
  0x31   : > { %479 = vperm.xlu1 %3543, %v337_v2  }
  0x36   : > { %1270 = vperm.xlu2 %3540, %v1256_v10  }
  0x37   : > { %3545 = vset.pattern.permute.xlu0 %v3610_v3 }
  0x39   : > { %3544 = vset.pattern.permute.xlu1 %v3610_v3 }
  0x3e   : > { %2220 = vperm.xlu2 %3540, %v2202_v11  }
  0x46   : > { %2210 = vperm.xlu2 %3540, %v2200_v12  }
  0x70   : > { %v3750_v13 = vpop.permute.xlu2 %351 }
  0x71   : > { %v398_v48 = vmul.f32 %v3757_v21, %v3750_v13  ;;  %v399_v49 = vmul.f32 %v3759_v22, %v3750_v13  ;;  %v400_v50 = vmul.f32 %v3761_v23, %v3750_v13  ;;  %v401_v51 = vmul.f32 %v3763_v24, %v3750_v13 }
  0x78   : > { %v3765_v29 = vpop.permute.xlu2 %434 }
  0x80   : > { %v3815_v60 = vpop.permute.xlu2 %429 }
  0x81   : > { %v3818_v1 = vadd.f32 %v3815_v60, %v398_v48  ;;  %v3821_v2 = vadd.f32 %v3815_v60, %v399_v49  ;;  %v3824_v3 = vadd.f32 %v3815_v60, %v400_v50  ;;  %v3827_v4 = vadd.f32 %v3815_v60, %v401_v51 }
  0x87   : > { %v3753_v19 = vpop.permute.xlu1 %439 }
  0x88   : > { %v3755_v20 = vpop.permute.xlu0 %361 }
  0x89   : > { %v414_v30 = vmul.f32 %v3757_v21, %v3755_v20  ;;  %v415_v31 = vmul.f32 %v3759_v22, %v3755_v20  ;;  %v416_v32 = vmul.f32 %v3761_v23, %v3755_v20  ;;  %v417_v33 = vmul.f32 %v3763_v24, %v3755_v20 }
  0x8b   : > { %v466_v40 = vadd.f32 %v3753_v19, %v414_v30  ;;  %v467_v41 = vadd.f32 %v3753_v19, %v415_v31  ;;  %v468_v42 = vadd.f32 %v3753_v19, %v416_v32  ;;  %v469_v43 = vadd.f32 %v3753_v19, %v417_v33 }
  0x8c   : > { %v6155_v32 = vmov -0.5  }
  0x90   : > { %v3783_v38 = vpop.permute.xlu0 %356 }
  0x91   : > { %v3785_v39 = vpop.permute.xlu1 %487  ;;  %v406_v56 = vmul.f32 %v3757_v21, %v3783_v38  ;;  %v407_v57 = vmul.f32 %v3759_v22, %v3783_v38  ;;  %v408_v58 = vmul.f32 %v3761_v23, %v3783_v38  ;;  %v409_v59 = vmul.f32 %v3763_v24, %v3783_v38 }
  0x92   : > { %v538_v44 = vmul.f32 %v3775_v34, %v3785_v39  ;;  %v539_v45 = vmul.f32 %v3777_v35, %v3785_v39  ;;  %v540_v46 = vmul.f32 %v3779_v36, %v3785_v39  ;;  %v541_v47 = vmul.f32 %v3781_v37, %v3785_v39 }
  0x93   : > { %v458_v10 = vadd.f32 %v3765_v29, %v406_v56  ;;  %v459_v11 = vadd.f32 %v3765_v29, %v407_v57  ;;  %v460_v12 = vadd.f32 %v3765_v29, %v408_v58  ;;  %v461_v14 = vadd.f32 %v3765_v29, %v409_v59 }
  0x94   : > { %v570_v52 = vadd.f32 %v538_v44, %v466_v40  ;;  %v571_v53 = vadd.f32 %v539_v45, %v467_v41  ;;  %v572_v54 = vadd.f32 %v540_v46, %v468_v42  ;;  %v573_v55 = vadd.f32 %v541_v47, %v469_v43 }
  0x96   : > { %v602_v61 = vadd.f32 0.5, %v570_v52  ;;  %v603_v62 = vadd.f32 0.5, %v571_v53  ;;  %v604_v63 = vadd.f32 0.5, %v572_v54  ;;  %v605_v0 = vadd.f32 0.5, %v573_v55 }
  0x98   : > { %v634_v5 = vfloor.f32 %v602_v61  ;;  %v635_v6 = vfloor.f32 %v603_v62  ;;  %v636_v7 = vfloor.f32 %v604_v63  ;;  %v637_v8 = vfloor.f32 %v605_v0 }
  0x99   : > { %v3829_v9 = vpop.permute.xlu0 %483 }
  0x9a   : > { %v666_v15 = vsub.f32 %v570_v52, %v634_v5  ;;  %v667_v16 = vsub.f32 %v571_v53, %v635_v6  ;;  %v668_v17 = vsub.f32 %v572_v54, %v636_v7  ;;  %v669_v18 = vsub.f32 %v573_v55, %v637_v8 }
  0x9b   : > { %v530_v25 = vmul.f32 %v3775_v34, %v3829_v9  ;;  %v531_v26 = vmul.f32 %v3777_v35, %v3829_v9  ;;  %v532_v27 = vmul.f32 %v3779_v36, %v3829_v9  ;;  %v533_v28 = vmul.f32 %v3781_v37, %v3829_v9 }
  0x9c   : > { %vm698_vm0 = vcmp.ge.f32.partialorder %v666_v15, 0.0  ;;  %v762_v30 = vand.u32 2147483647, %v666_v15  ;;  %vm699_vm1 = vcmp.ge.f32.partialorder %v667_v16, 0.0  ;;  %v763_v31 = vand.u32 2147483647, %v667_v16 }
  0x9d   : > { %v730_v33 = vsel %vm698_vm0, 0.5, %v6155_v32  ;;  %v731_v40 = vsel %vm699_vm1, 0.5, %v6155_v32  ;;  %vm700_vm2 = vcmp.ge.f32.partialorder %v668_v17, 0.0  ;;  %v764_v41 = vand.u32 2147483647, %v668_v17 }
  0x9e   : > { %vm794_vm3 = vcmp.gt.f32.partialorder %v762_v30, 0.25  ;;  %v826_v42 = vsub.f32 %v730_v33, %v666_v15  ;;  %vm795_vm4 = vcmp.gt.f32.partialorder %v763_v31, 0.25  ;;  %v827_v43 = vsub.f32 %v731_v40, %v667_v16 }
  0x9f   : > { %v732_v44 = vsel %vm700_vm2, 0.5, %v6155_v32  ;;  %vm796_vm5 = vcmp.gt.f32.partialorder %v764_v41, 0.25  ;;  %vm701_vm6 = vcmp.ge.f32.partialorder %v669_v18, 0.0  ;;  %v765_v45 = vand.u32 2147483647, %v669_v18 }
  0xa0   : > { %v3846_v46 = vsel %vm794_vm3, %v826_v42, %v666_v15  ;;  %v3848_v47 = vsel %vm795_vm4, %v827_v43, %v667_v16  ;;  %v828_v48 = vsub.f32 %v732_v44, %v668_v17  ;;  %v733_v49 = vsel %vm701_vm6, 0.5, %v6155_v32  ;;  %v3879_v44 = vpop.permute.xlu1 %346 }
  0xa1   : > { %v3853_v50 = vmul.f32 %v3846_v46, %v3846_v46  ;;  %v3857_v51 = vmul.f32 %v3848_v47, %v3848_v47  ;;  %vm797_vm7 = vcmp.gt.f32.partialorder %v765_v45, 0.25  ;;  %v829_v52 = vsub.f32 %v733_v49, %v669_v18 }
  0xa2   : > { %v3859_v53 = vsel %vm796_vm5, %v828_v48, %v668_v17  ;;  %v562_v54 = vadd.f32 %v530_v25, %v458_v10  ;;  %v563_v55 = vadd.f32 %v531_v26, %v459_v11  ;;  %v564_v56 = vadd.f32 %v532_v27, %v460_v12 }
  0xa3   : > { %v922_v57 = vmul.f32 -15.094643, %v3853_v50  ;;  %v923_v58 = vmul.f32 -15.094643, %v3857_v51  ;;  %v3865_v59 = vmul.f32 %v3859_v53, %v3859_v53  ;;  %v3867_v61 = vsel %vm797_vm7, %v829_v52, %v669_v18 }
  0xa4   : > { %v3871_v62 = vmul.f32 %v3867_v61, %v3867_v61  ;;  %v594_v63 = vadd.f32 0.5, %v562_v54  ;;  %v595_v0 = vadd.f32 0.5, %v563_v55  ;;  %v596_v5 = vadd.f32 0.5, %v564_v56 }
  0xa5   : > { %v954_v6 = vadd.f32 42.058693, %v922_v57  ;;  %v955_v7 = vadd.f32 42.058693, %v923_v58  ;;  %v924_v8 = vmul.f32 -15.094643, %v3865_v59  ;;  %v565_v10 = vadd.f32 %v533_v28, %v461_v14 }
  0xa6   : > { %v925_v11 = vmul.f32 -15.094643, %v3871_v62  ;;  %v626_v12 = vfloor.f32 %v594_v63  ;;  %v627_v15 = vfloor.f32 %v595_v0  ;;  %v628_v16 = vfloor.f32 %v596_v5 }
  0xa7   : > { %v986_v17 = vmul.f32 %v954_v6, %v3853_v50  ;;  %v987_v18 = vmul.f32 %v955_v7, %v3857_v51  ;;  %v956_v25 = vadd.f32 42.058693, %v924_v8  ;;  %v597_v26 = vadd.f32 0.5, %v565_v10 }
  0xa8   : > { %v957_v27 = vadd.f32 42.058693, %v925_v11  ;;  %v658_v30 = vsub.f32 %v562_v54, %v626_v12  ;;  %v659_v31 = vsub.f32 %v563_v55, %v627_v15  ;;  %v660_v33 = vsub.f32 %v564_v56, %v628_v16 }
  0xa9   : > { %v1018_v40 = vadd.f32 -76.70586, %v986_v17  ;;  %v1019_v41 = vadd.f32 -76.70586, %v987_v18  ;;  %v988_v42 = vmul.f32 %v956_v25, %v3865_v59  ;;  %v629_v14 = vfloor.f32 %v597_v26 }
  0xaa   : > { %v989_v28 = vmul.f32 %v957_v27, %v3871_v62  ;;  %vm690_vm8 = vcmp.ge.f32.partialorder %v658_v30, 0.0  ;;  %v754_v43 = vand.u32 2147483647, %v658_v30  ;;  %vm691_vm9 = vcmp.ge.f32.partialorder %v659_v31, 0.0 }
  0xab   : > { %v1050_v45 = vmul.f32 %v1018_v40, %v3853_v50  ;;  %v1051_v48 = vmul.f32 %v1019_v41, %v3857_v51  ;;  %v1020_v49 = vadd.f32 -76.70586, %v988_v42  ;;  %v722_v52 = vsel %vm690_vm8, 0.5, %v6155_v32 }
  0xac   : > { %v1021_v54 = vadd.f32 -76.70586, %v989_v28  ;;  %vm786_vm10 = vcmp.gt.f32.partialorder %v754_v43, 0.25  ;;  %v818_v55 = vsub.f32 %v722_v52, %v658_v30  ;;  %v723_v56 = vsel %vm691_vm9, 0.5, %v6155_v32 }
  0xad   : > { %v1082_v57 = vadd.f32 81.60525, %v1050_v45  ;;  %v1083_v58 = vadd.f32 81.60525, %v1051_v48  ;;  %v1052_v63 = vmul.f32 %v1020_v49, %v3865_v59  ;;  %v755_v0 = vand.u32 2147483647, %v659_v31 }
  0xae   : > { %v1053_v5 = vmul.f32 %v1021_v54, %v3871_v62  ;;  %v3887_v6 = vsel %vm786_vm10, %v818_v55, %v658_v30  ;;  %v819_v7 = vsub.f32 %v723_v56, %v659_v31  ;;  %vm692_vm11 = vcmp.ge.f32.partialorder %v660_v33, 0.0  ;;  %v3909_v56 = vpop.permute.xlu1 %479 }
  0xaf   : > { %v1114_v8 = vmul.f32 %v1082_v57, %v3853_v50  ;;  %v1115_v11 = vmul.f32 %v1083_v58, %v3857_v51  ;;  %v1084_v12 = vadd.f32 81.60525, %v1052_v63  ;;  %v3893_v15 = vmul.f32 %v3887_v6, %v3887_v6 }
  0xb0   : > { %v1085_v16 = vadd.f32 81.60525, %v1053_v5  ;;  %vm787_vm12 = vcmp.gt.f32.partialorder %v755_v0, 0.25  ;;  %v724_v17 = vsel %vm692_vm11, 0.5, %v6155_v32  ;;  %v756_v18 = vand.u32 2147483647, %v660_v33 }
  0xb1   : > { %v1146_v25 = vadd.f32 -41.3417, %v1114_v8  ;;  %v1147_v26 = vadd.f32 -41.3417, %v1115_v11  ;;  %v1116_v27 = vmul.f32 %v1084_v12, %v3865_v59  ;;  %v914_v30 = vmul.f32 -15.094643, %v3893_v15 }
  0xb2   : > { %v1117_v40 = vmul.f32 %v1085_v16, %v3871_v62  ;;  %v3899_v41 = vsel %vm787_vm12, %v819_v7, %v659_v31  ;;  %vm788_vm13 = vcmp.gt.f32.partialorder %v756_v18, 0.25  ;;  %v820_v42 = vsub.f32 %v724_v17, %v660_v33 }
  0xb3   : > { %v1178_v28 = vmul.f32 %v1146_v25, %v3853_v50  ;;  %v1179_v43 = vmul.f32 %v1147_v26, %v3857_v51  ;;  %v1148_v45 = vadd.f32 -41.3417, %v1116_v27  ;;  %v946_v48 = vadd.f32 42.058693, %v914_v30 }
  0xb4   : > { %v1149_v49 = vadd.f32 -41.3417, %v1117_v40  ;;  %v3905_v52 = vmul.f32 %v3899_v41, %v3899_v41  ;;  %v3907_v54 = vsel %vm788_vm13, %v820_v42, %v660_v33  ;;  %v661_v55 = vsub.f32 %v565_v10, %v629_v14 }
  0xb5   : > { %v1210_v31 = vadd.f32 6.2831855, %v1178_v28  ;;  %v1211_v57 = vadd.f32 6.2831855, %v1179_v43  ;;  %v1180_v58 = vmul.f32 %v1148_v45, %v3865_v59  ;;  %v978_v50 = vmul.f32 %v946_v48, %v3893_v15 }
  0xb6   : > { %v1181_v51 = vmul.f32 %v1149_v49, %v3871_v62  ;;  %v915_v63 = vmul.f32 -15.094643, %v3905_v52  ;;  %v3917_v0 = vmul.f32 %v3907_v54, %v3907_v54  ;;  %vm693_vm14 = vcmp.ge.f32.partialorder %v661_v55, 0.0 }
  0xb7   : > { %v1242_v33 = vmul.f32 %v1210_v31, %v3846_v46  ;;  %v1243_v10 = vmul.f32 %v1211_v57, %v3848_v47  ;;  %v1212_v14 = vadd.f32 6.2831855, %v1180_v58  ;;  %v1010_v5 = vadd.f32 -76.70586, %v978_v50 }
  0xb8   : > { %v1213_v7 = vadd.f32 6.2831855, %v1181_v51  ;;  %v947_v8 = vadd.f32 42.058693, %v915_v63  ;;  %v916_v59 = vmul.f32 -15.094643, %v3917_v0  ;;  %v522_v62 = vmul.f32 %v3775_v34, %v3909_v56 }
  0xb9   : > { %1303 = vmatpush.msra.mxu0 %v1242_v33  ;;  %1332 = vmatpush.msra.mxu1 %v1243_v10  ;;  %v1244_v11 = vmul.f32 %v1212_v14, %v3859_v53  ;;  %v1042_v12 = vmul.f32 %v1010_v5, %v3893_v15  ;;  %v725_v16 = vsel %vm693_vm14, 0.5, %v6155_v32  ;;  %v757_v46 = vand.u32 2147483647, %v661_v55 }
  0xba   : > { %v1245_v47 = vmul.f32 %v1213_v7, %v3867_v61  ;;  %v979_v17 = vmul.f32 %v947_v8, %v3905_v52  ;;  %v948_v18 = vadd.f32 42.058693, %v916_v59  ;;  %v821_v25 = vsub.f32 %v725_v16, %v661_v55 }
  0xbb   : > { %1361 = vmatpush.msra.mxu2 %v1244_v11  ;;  %v1074_v26 = vadd.f32 81.60525, %v1042_v12  ;;  %vm789_vm15 = vcmp.gt.f32.partialorder %v757_v46, 0.25  ;;  %v554_v27 = vadd.f32 %v522_v62, %v3818_v1  ;;  %v523_v30 = vmul.f32 %v3777_v35, %v3909_v56 }
  0xbc   : > { %1390 = vmatpush.msra.mxu3 %v1245_v47  ;;  %v1011_v53 = vadd.f32 -76.70586, %v979_v17  ;;  %v980_v40 = vmul.f32 %v948_v18, %v3917_v0  ;;  %v3933_v42 = vsel %vm789_vm15, %v821_v25, %v661_v55  ;;  %v524_v61 = vmul.f32 %v3779_v36, %v3909_v56 }
  0xbd   : > { %v1106_v28 = vmul.f32 %v1074_v26, %v3893_v15  ;;  %v3940_v43 = vmul.f32 %v3933_v42, %v3933_v42  ;;  %v586_v45 = vadd.f32 0.5, %v554_v27  ;;  %v555_v1 = vadd.f32 %v523_v30, %v3821_v2 }
  0xbe   : > { %v1043_v48 = vmul.f32 %v1011_v53, %v3905_v52  ;;  %v1012_v49 = vadd.f32 -76.70586, %v980_v40  ;;  %v556_v31 = vadd.f32 %v524_v61, %v3824_v3  ;;  %v525_v55 = vmul.f32 %v3781_v37, %v3909_v56 }
  0xbf   : > { %v1138_v57 = vadd.f32 -41.3417, %v1106_v28  ;;  %v917_v58 = vmul.f32 -15.094643, %v3940_v43  ;;  %v618_v50 = vfloor.f32 %v586_v45  ;;  %v587_v51 = vadd.f32 0.5, %v555_v1 }
  0xc0   : > { %v1075_v63 = vadd.f32 81.60525, %v1043_v48  ;;  %v1044_v33 = vmul.f32 %v1012_v49, %v3917_v0  ;;  %v588_v10 = vadd.f32 0.5, %v556_v31  ;;  %v557_v14 = vadd.f32 %v525_v55, %v3827_v4 }
  0xc1   : > { %v1170_v2 = vmul.f32 %v1138_v57, %v3893_v15  ;;  %v949_v5 = vadd.f32 42.058693, %v917_v58  ;;  %v650_v7 = vsub.f32 %v554_v27, %v618_v50  ;;  %v619_v8 = vfloor.f32 %v587_v51  ;;  %v3966_v57 = vpop.permute.xlu0 %475 }
  0xc2   : > { %v1107_v3 = vmul.f32 %v1075_v63, %v3905_v52  ;;  %v1076_v59 = vadd.f32 81.60525, %v1044_v33  ;;  %v620_v62 = vfloor.f32 %v588_v10  ;;  %v589_v11 = vadd.f32 0.5, %v557_v14 }
  0xc3   : > { %v1202_v12 = vadd.f32 6.2831855, %v1170_v2  ;;  %v981_v16 = vmul.f32 %v949_v5, %v3940_v43  ;;  %vm682_vm0 = vcmp.ge.f32.partialorder %v650_v7, 0.0  ;;  %v746_v46 = vand.u32 2147483647, %v650_v7 }
  0xc4   : > { %v1139_v47 = vadd.f32 -41.3417, %v1107_v3  ;;  %v1108_v17 = vmul.f32 %v1076_v59, %v3917_v0  ;;  %v714_v4 = vsel %vm682_vm0, 0.5, %v6155_v32  ;;  %v651_v18 = vsub.f32 %v555_v1, %v619_v8 }
  0xc5   : > { %v1234_v15 = vmul.f32 %v1202_v12, %v3887_v6  ;;  %v1013_v25 = vadd.f32 -76.70586, %v981_v16  ;;  %vm778_vm1 = vcmp.gt.f32.partialorder %v746_v46, 0.25  ;;  %v810_v26 = vsub.f32 %v714_v4, %v650_v7 }
  0xc6   : > { %v1171_v27 = vmul.f32 %v1139_v47, %v3905_v52  ;;  %v1140_v30 = vadd.f32 -41.3417, %v1108_v17  ;;  %vm683_vm2 = vcmp.ge.f32.partialorder %v651_v18, 0.0  ;;  %v747_v53 = vand.u32 2147483647, %v651_v18 }
  0xc7   : > { %1304 = vmatpush.msra.mxu0 %v1234_v15  ;;  %v1045_v40 = vmul.f32 %v1013_v25, %v3940_v43  ;;  %v3958_v61 = vsel %vm778_vm1, %v810_v26, %v650_v7  ;;  %v715_v28 = vsel %vm683_vm2, 0.5, %v6155_v32  ;;  %v652_v45 = vsub.f32 %v556_v31, %v620_v62  ;;  %v3985_v62 = vpop.permute.xlu2 %424 }
  0xc8   : > { %v1203_v48 = vadd.f32 6.2831855, %v1171_v27  ;;  %v1172_v1 = vmul.f32 %v1140_v30, %v3917_v0  ;;  %v3964_v6 = vmul.f32 %v3958_v61, %v3958_v61  ;;  %vm779_vm3 = vcmp.gt.f32.partialorder %v747_v53, 0.25 }
  0xc9   : > { %v1077_v52 = vadd.f32 81.60525, %v1045_v40  ;;  %v811_v49 = vsub.f32 %v715_v28, %v651_v18  ;;  %vm684_vm4 = vcmp.ge.f32.partialorder %v652_v45, 0.0  ;;  %v748_v55 = vand.u32 2147483647, %v652_v45 }
  0xca   : > { %v1235_v58 = vmul.f32 %v1203_v48, %v3899_v41  ;;  %v1204_v50 = vadd.f32 6.2831855, %v1172_v1  ;;  %v906_v51 = vmul.f32 -15.094643, %v3964_v6  ;;  %v716_v31 = vsel %vm684_vm4, 0.5, %v6155_v32 }
  0xcb   : > { %v1109_v0 = vmul.f32 %v1077_v52, %v3940_v43  ;;  %v3972_v63 = vsel %vm779_vm3, %v811_v49, %v651_v18  ;;  %vm780_vm5 = vcmp.gt.f32.partialorder %v748_v55, 0.25  ;;  %v812_v33 = vsub.f32 %v716_v31, %v652_v45 }
  0xcc   : > { %1333 = vmatpush.msra.mxu1 %v1235_v58  ;;  %v1236_v10 = vmul.f32 %v1204_v50, %v3907_v54  ;;  %v938_v2 = vadd.f32 42.058693, %v906_v51  ;;  %v3977_v5 = vmul.f32 %v3972_v63, %v3972_v63  ;;  %v621_v41 = vfloor.f32 %v589_v11 }
  0xcd   : > { %v1141_v7 = vadd.f32 -41.3417, %v1109_v0  ;;  %v3979_v8 = vsel %vm780_vm5, %v812_v33, %v652_v45  ;;  %v390_v3 = vmul.f32 %v3757_v21, %v3879_v44  ;;  %v514_v59 = vmul.f32 %v3775_v34, %v3966_v57 }
  0xce   : > { %1362 = vmatpush.msra.mxu2 %v1236_v10  ;;  %v970_v54 = vmul.f32 %v938_v2, %v3964_v6  ;;  %v907_v12 = vmul.f32 -15.094643, %v3977_v5  ;;  %v3991_v16 = vmul.f32 %v3979_v8, %v3979_v8  ;;  %v653_v11 = vsub.f32 %v557_v14, %v621_v41 }
  0xcf   : > { %v1173_v46 = vmul.f32 %v1141_v7, %v3940_v43  ;;  %v442_v47 = vadd.f32 %v3985_v62, %v390_v3  ;;  %v391_v21 = vmul.f32 %v3759_v22, %v3879_v44  ;;  %v515_v34 = vmul.f32 %v3777_v35, %v3966_v57 }
  0xd0   : > { %v1002_v17 = vadd.f32 -76.70586, %v970_v54  ;;  %v939_v4 = vadd.f32 42.058693, %v907_v12  ;;  %v908_v18 = vmul.f32 -15.094643, %v3991_v16  ;;  %v392_v15 = vmul.f32 %v3761_v23, %v3879_v44 }
  0xd1   : > { %v1205_v25 = vadd.f32 6.2831855, %v1173_v46  ;;  %vm685_vm6 = vcmp.ge.f32.partialorder %v653_v11, 0.0  ;;  %v749_v14 = vand.u32 2147483647, %v653_v11  ;;  %v546_v26 = vadd.f32 %v514_v59, %v442_v47 }
  0xd2   : > { %v1034_v43 = vmul.f32 %v1002_v17, %v3964_v6  ;;  %v971_v27 = vmul.f32 %v939_v4, %v3977_v5  ;;  %v940_v30 = vadd.f32 42.058693, %v908_v18  ;;  %v717_v22 = vsel %vm685_vm6, 0.5, %v6155_v32 }
  0xd3   : > { %v1237_v35 = vmul.f32 %v1205_v25, %v3933_v42  ;;  %vm781_vm7 = vcmp.gt.f32.partialorder %v749_v14, 0.25  ;;  %v813_v53 = vsub.f32 %v717_v22, %v653_v11  ;;  %v578_v40 = vadd.f32 0.5, %v546_v26 }
  0xd4   : > { %v1066_v28 = vadd.f32 81.60525, %v1034_v43  ;;  %v1003_v45 = vadd.f32 -76.70586, %v971_v27  ;;  %v972_v23 = vmul.f32 %v940_v30, %v3991_v16  ;;  %v443_v48 = vadd.f32 %v3985_v62, %v391_v21 }
  0xd5   : > { %1391 = vmatpush.msra.mxu3 %v1237_v35  ;;  %v4008_v1 = vsel %vm781_vm7, %v813_v53, %v653_v11  ;;  %v610_v52 = vfloor.f32 %v578_v40  ;;  %v444_v49 = vadd.f32 %v3985_v62, %v392_v15  ;;  %v516_v55 = vmul.f32 %v3779_v36, %v3966_v57 }
  0xd6   : > { %v1098_v42 = vmul.f32 %v1066_v28, %v3964_v6  ;;  %v1035_v58 = vmul.f32 %v1003_v45, %v3977_v5  ;;  %v1004_v50 = vadd.f32 -76.70586, %v972_v23  ;;  %v4017_v51 = vmul.f32 %v4008_v1, %v4008_v1 }
  0xd7   : > { %v642_v31 = vsub.f32 %v546_v26, %v610_v52  ;;  %v547_v0 = vadd.f32 %v515_v34, %v443_v48  ;;  %v548_v33 = vadd.f32 %v516_v55, %v444_v49  ;;  %v393_v10 = vmul.f32 %v3763_v24, %v3879_v44  ;;  %v4046_v49 = vld [vmem:[%s3748_s23 + $0x8] sm:$0xff] }
  0xd8   : > { %v1130_v2 = vadd.f32 -41.3417, %v1098_v42  ;;  %v1067_v41 = vadd.f32 81.60525, %v1035_v58  ;;  %v1036_v7 = vmul.f32 %v1004_v50, %v3991_v16  ;;  %v909_v36 = vmul.f32 -15.094643, %v4017_v51 }
  0xd9   : > { %vm674_vm8 = vcmp.ge.f32.partialorder %v642_v31, 0.0  ;;  %v738_v3 = vand.u32 2147483647, %v642_v31  ;;  %v579_v59 = vadd.f32 0.5, %v547_v0  ;;  %v580_v54 = vadd.f32 0.5, %v548_v33 }
  0xda   : > { %v1162_v12 = vmul.f32 %v1130_v2, %v3964_v6  ;;  %v1099_v11 = vmul.f32 %v1067_v41, %v3977_v5  ;;  %v1068_v46 = vadd.f32 81.60525, %v1036_v7  ;;  %v941_v47 = vadd.f32 42.058693, %v909_v36 }
  0xdb   : > { %v706_v21 = vsel %vm674_vm8, 0.5, %v6155_v32  ;;  %vm770_vm9 = vcmp.gt.f32.partialorder %v738_v3, 0.25  ;;  %v611_v24 = vfloor.f32 %v579_v59  ;;  %v612_v34 = vfloor.f32 %v580_v54 }
  0xdc   : > { %v1194_v17 = vadd.f32 6.2831855, %v1162_v12  ;;  %v1131_v4 = vadd.f32 -41.3417, %v1099_v11  ;;  %v1100_v18 = vmul.f32 %v1068_v46, %v3991_v16  ;;  %v973_v15 = vmul.f32 %v941_v47, %v4017_v51 }
  0xdd   : > { %v802_v25 = vsub.f32 %v706_v21, %v642_v31  ;;  %v643_v14 = vsub.f32 %v547_v0, %v611_v24  ;;  %v644_v26 = vsub.f32 %v548_v33, %v612_v34  ;;  %v445_v6 = vadd.f32 %v3985_v62, %v393_v10 }
  0xde   : > { %v1226_v43 = vmul.f32 %v1194_v17, %v3958_v61  ;;  %v1163_v27 = vmul.f32 %v1131_v4, %v3977_v5  ;;  %v1132_v30 = vadd.f32 -41.3417, %v1100_v18  ;;  %v1005_v22 = vadd.f32 -76.70586, %v973_v15 }
  0xdf   : > { %v4031_v35 = vsel %vm770_vm9, %v802_v25, %v642_v31  ;;  %vm675_vm10 = vcmp.ge.f32.partialorder %v643_v14, 0.0  ;;  %v739_v53 = vand.u32 2147483647, %v643_v14  ;;  %vm676_vm11 = vcmp.ge.f32.partialorder %v644_v26, 0.0 }
  0xe0   : > { %1305 = vmatpush.msra.mxu0 %v1226_v43  ;;  %v1195_v40 = vadd.f32 6.2831855, %v1163_v27  ;;  %v1164_v28 = vmul.f32 %v1132_v30, %v3991_v16  ;;  %v1037_v45 = vmul.f32 %v1005_v22, %v4017_v51  ;;  %v4037_v23 = vmul.f32 %v4031_v35, %v4031_v35 }
  0xe1   : > { %v707_v61 = vsel %vm675_vm10, 0.5, %v6155_v32  ;;  %vm4040_vm12 = vcmp.gt.f32.partialorder %v739_v53, 0.25  ;;  %v708_v48 = vsel %vm676_vm11, 0.5, %v6155_v32  ;;  %v740_v52 = vand.u32 2147483647, %v644_v26 }
  0xe2   : > { %v1227_v55 = vmul.f32 %v1195_v40, %v3972_v63  ;;  %v1196_v16 = vadd.f32 6.2831855, %v1164_v28  ;;  %v1069_v42 = vadd.f32 81.60525, %v1037_v45  ;;  %v898_v58 = vmul.f32 -15.094643, %v4037_v23 }
  0xe3   : > { %v803_v50 = vsub.f32 %v707_v61, %v643_v14  ;;  %vm772_vm13 = vcmp.gt.f32.partialorder %v740_v52, 0.25  ;;  %v804_v31 = vsub.f32 %v708_v48, %v644_v26  ;;  %v517_v0 = vmul.f32 %v3781_v37, %v3966_v57 }
  0xe4   : > { %1334 = vmatpush.msra.mxu1 %v1227_v55  ;;  %v1228_v33 = vmul.f32 %v1196_v16, %v3979_v8  ;;  %v1101_v10 = vmul.f32 %v1069_v42, %v4017_v51  ;;  %v930_v2 = vadd.f32 42.058693, %v898_v58  ;;  %v370_v41 = vperm.slane %v4046_v49, 0 }
  0xe5   : > { %v4057_v63 = vsel %vm4040_vm12, %v803_v50, %v643_v14  ;;  %v4059_v7 = vsel %vm772_vm13, %v804_v31, %v644_v26  ;;  %v549_v36 = vadd.f32 %v517_v0, %v445_v6  ;;  %v494_v3 = vperm.slane %v4046_v49, 1 }
  0xe6   : > { %1363 = vmatpush.msra.mxu2 %v1228_v33  ;;  %v1133_v59 = vadd.f32 -41.3417, %v1101_v10  ;;  %v962_v37 = vmul.f32 %v930_v2, %v4037_v23  ;;  %v4065_v8 = vmul.f32 %v4057_v63, %v4057_v63  ;;  %v4069_v54 = vmul.f32 %v4059_v7, %v4059_v7 }
  0xe7   : > { %v581_v12 = vadd.f32 0.5, %v549_v36  ;;  %v4071_v11 = vperm.slane %v370_v41, 0  ;;  %v4073_v46 = vperm.slane %v494_v3, 1  ;;  %v371_v47 = vperm.slane %v4046_v49, 2 }
  0xe8   : > { %v1165_v21 = vmul.f32 %v1133_v59, %v4017_v51  ;;  %v994_v24 = vadd.f32 -76.70586, %v962_v37  ;;  %v899_v34 = vmul.f32 -15.094643, %v4065_v8  ;;  %v900_v17 = vmul.f32 -15.094643, %v4069_v54 }
  0xe9   : > { %v613_v4 = vfloor.f32 %v581_v12  ;;  %v418_v18 = vmul.f32 %v4071_v11, %v3755_v20  ;;  %v542_v15 = vmul.f32 %v4073_v46, %v3785_v39  ;;  %v4083_v25 = vperm.slane %v371_v47, 0 }
  0xea   : > { %v1197_v14 = vadd.f32 6.2831855, %v1165_v21  ;;  %v1026_v26 = vmul.f32 %v994_v24, %v4037_v23  ;;  %v931_v6 = vadd.f32 42.058693, %v899_v34  ;;  %v932_v43 = vadd.f32 42.058693, %v900_v17 }
  0xeb   : > { %v645_v51 = vsub.f32 %v549_v36, %v613_v4  ;;  %v470_v27 = vadd.f32 %v3753_v19, %v418_v18  ;;  %v419_v30 = vmul.f32 %v4083_v25, %v3755_v20  ;;  %vm1278_vm15 = vcmask 261120  }
  0xec   : > { %v1229_v22 = vmul.f32 %v1197_v14, %v4008_v1  ;;  %v1058_v53 = vadd.f32 81.60525, %v1026_v26  ;;  %v963_v40 = vmul.f32 %v931_v6, %v4065_v8  ;;  %v964_v28 = vmul.f32 %v932_v43, %v4069_v54 }
  0xed   : > { %vm677_vm14 = vcmp.ge.f32.partialorder %v645_v51, 0.0  ;;  %v741_v45 = vand.u32 2147483647, %v645_v51  ;;  %v574_v61 = vadd.f32 %v542_v15, %v470_v27  ;;  %v471_v5 = vadd.f32 %v3753_v19, %v419_v30  ;;  %v4121_v15 = vld [vmem:[%s6148_s3] sm:$0xff] }
  0xee   : > { %1392 = vmatpush.msra.mxu3 %v1229_v22  ;;  %v1090_v48 = vmul.f32 %v1058_v53, %v4037_v23  ;;  %v995_v52 = vadd.f32 -76.70586, %v963_v40  ;;  %v996_v55 = vadd.f32 -76.70586, %v964_v28  ;;  %v709_v16 = vsel %vm677_vm14, 0.5, %v6155_v32 }
  0xef   : > { %vm773_vm0 = vcmp.gt.f32.partialorder %v741_v45, 0.25  ;;  %v805_v1 = vsub.f32 %v709_v16, %v645_v51  ;;  %v606_v42 = vadd.f32 0.5, %v574_v61  ;;  %v495_v58 = vperm.slane %v4046_v49, 3 }
  0xf0   : > { %v1122_v50 = vadd.f32 -41.3417, %v1090_v48  ;;  %v1027_v31 = vmul.f32 %v995_v52, %v4065_v8  ;;  %v1028_v0 = vmul.f32 %v996_v55, %v4069_v54  ;;  %v372_v33 = vperm.slane %v4046_v49, 4 }
  0xf1   : > { %v4099_v10 = vsel %vm773_vm0, %v805_v1, %v645_v51  ;;  %v638_v2 = vfloor.f32 %v606_v42  ;;  %v4101_v41 = vperm.slane %v495_v58, 1  ;;  %v496_v36 = vperm.slane %v4046_v49, 5 }
  0xf2   : > { %v1154_v3 = vmul.f32 %v1122_v50, %v4037_v23  ;;  %v1059_v59 = vadd.f32 81.60525, %v1027_v31  ;;  %v1060_v37 = vadd.f32 81.60525, %v1028_v0  ;;  %v4107_v12 = vmul.f32 %v4099_v10, %v4099_v10 }
  0xf3   : > { %v670_v47 = vsub.f32 %v574_v61, %v638_v2  ;;  %v543_v21 = vmul.f32 %v4101_v41, %v3785_v39  ;;  %v4111_v24 = vperm.slane %v372_v33, 0  ;;  %v4113_v34 = vperm.slane %v496_v36, 1 }
  0xf4   : > { %v1186_v17 = vadd.f32 6.2831855, %v1154_v3  ;;  %v1091_v4 = vmul.f32 %v1059_v59, %v4065_v8  ;;  %v1092_v18 = vmul.f32 %v1060_v37, %v4069_v54  ;;  %v901_v23 = vmul.f32 -15.094643, %v4107_v12 }
  0xf5   : > { %vm702_vm1 = vcmp.ge.f32.partialorder %v670_v47, 0.0  ;;  %v766_v14 = vand.u32 2147483647, %v670_v47  ;;  %v575_v26 = vadd.f32 %v543_v21, %v471_v5  ;;  %v420_v6 = vmul.f32 %v4111_v24, %v3755_v20 }
  0xf6   : > { %v1218_v43 = vmul.f32 %v1186_v17, %v4031_v35  ;;  %v1123_v51 = vadd.f32 -41.3417, %v1091_v4  ;;  %v1124_v27 = vadd.f32 -41.3417, %v1092_v18  ;;  %v933_v30 = vadd.f32 42.058693, %v901_v23 }
  0xf7   : > { %v734_v22 = vsel %vm702_vm1, 0.5, %v6155_v32  ;;  %vm4127_vm2 = vcmp.gt.f32.partialorder %v766_v14, 0.25  ;;  %v607_v40 = vadd.f32 0.5, %v575_v26  ;;  %v472_v28 = vadd.f32 %v3753_v19, %v420_v6 }
  0xf8   : > { %1306 = vmatpush.msra.mxu0 %v1218_v43  ;;  %v1155_v45 = vmul.f32 %v1123_v51, %v4065_v8  ;;  %v1156_v61 = vmul.f32 %v1124_v27, %v4069_v54  ;;  %v965_v5 = vmul.f32 %v933_v30, %v4107_v12  ;;  %v830_v35 = vsub.f32 %v734_v22, %v670_v47 }
  0xf9   : > { %3417 = vmatmul.msk.f32.vlgmr.msra.gmra.mxu0 %vm1278_vm15, %v4121_v15  ;;  %v639_v48 = vfloor.f32 %v607_v40  ;;  %v544_v52 = vmul.f32 %v4113_v34, %v3785_v39  ;;  %v373_v55 = vperm.slane %v4046_v49, 6  ;;  %v497_v16 = vperm.slane %v4046_v49, 7 }
  0xfa   : > { %v1187_v1 = vadd.f32 6.2831855, %v1155_v45  ;;  %v1188_v42 = vadd.f32 6.2831855, %v1156_v61  ;;  %v997_v58 = vadd.f32 -76.70586, %v965_v5  ;;  %v4143_v8 = vsel %vm4127_vm2, %v830_v35, %v670_v47 }
  0xfb   : > { %v4147_v54 = vmul.f32 %v4143_v8, %v4143_v8  ;;  %v671_v50 = vsub.f32 %v575_v26, %v639_v48  ;;  %v576_v31 = vadd.f32 %v544_v52, %v472_v28  ;;  %v4149_v0 = vperm.slane %v373_v55, 0 }
  0xfc   : > { %v1219_v33 = vmul.f32 %v1187_v1, %v4057_v63  ;;  %v1220_v2 = vmul.f32 %v1188_v42, %v4059_v7  ;;  %v1029_v49 = vmul.f32 %v997_v58, %v4107_v12  ;;  %v4154_v36 = vperm.slane %v497_v16, 1 }
  0xfd   : > { %v926_v3 = vmul.f32 -15.094643, %v4147_v54  ;;  %vm703_vm3 = vcmp.ge.f32.partialorder %v671_v50, 0.0  ;;  %v767_v59 = vand.u32 2147483647, %v671_v50  ;;  %v608_v37 = vadd.f32 0.5, %v576_v31 }
  0xfe   : > { %1335 = vmatpush.msra.mxu1 %v1219_v33  ;;  %1364 = vmatpush.msra.mxu2 %v1220_v2  ;;  %v1061_v47 = vadd.f32 81.60525, %v1029_v49  ;;  %v735_v21 = vsel %vm703_vm3, 0.5, %v6155_v32  ;;  %v421_v17 = vmul.f32 %v4149_v0, %v3755_v20  ;;  %v545_v63 = vmul.f32 %v4154_v36, %v3785_v39 }
  0xff   : > { %3421 = vmatmul.msk.f32.vlgmr.msra.gmra.mxu1 %vm1278_vm15, %v4121_v15  ;;  %3425 = vmatmul.msk.f32.vlgmr.msra.gmra.mxu2 %vm1278_vm15, %v4121_v15  ;;  %v958_v7 = vadd.f32 42.058693, %v926_v3  ;;  %vm799_vm4 = vcmp.gt.f32.partialorder %v767_v59, 0.25  ;;  %v831_v4 = vsub.f32 %v735_v21, %v671_v50  ;;  %v640_v18 = vfloor.f32 %v608_v37 }
 0x100   : > { %v1093_v23 = vmul.f32 %v1061_v47, %v4107_v12  ;;  %v473_v14 = vadd.f32 %v3753_v19, %v421_v17  ;;  %v410_v20 = vmul.f32 %v4071_v11, %v3783_v38  ;;  %v534_v39 = vmul.f32 %v4073_v46, %v3829_v9 }
 0x101   : > { %v990_v26 = vmul.f32 %v958_v7, %v4147_v54  ;;  %v4173_v6 = vsel %vm799_vm4, %v831_v4, %v671_v50  ;;  %v672_v43 = vsub.f32 %v576_v31, %v640_v18  ;;  %v411_v51 = vmul.f32 %v4083_v25, %v3783_v38 }
 0x102   : > { %v1125_v27 = vadd.f32 -41.3417, %v1093_v23  ;;  %v4179_v30 = vmul.f32 %v4173_v6, %v4173_v6  ;;  %v577_v19 = vadd.f32 %v545_v63, %v473_v14  ;;  %v462_v22 = vadd.f32 %v3765_v29, %v410_v20 }
 0x103   : > { %v1022_v53 = vadd.f32 -76.70586, %v990_v26  ;;  %vm704_vm5 = vcmp.ge.f32.partialorder %v672_v43, 0.0  ;;  %v768_v40 = vand.u32 2147483647, %v672_v43  ;;  %v463_v28 = vadd.f32 %v3765_v29, %v411_v51 }
 0x104   : > { %v1157_v45 = vmul.f32 %v1125_v27, %v4107_v12  ;;  %v927_v61 = vmul.f32 -15.094643, %v4179_v30  ;;  %v736_v5 = vsel %vm704_vm5, 0.5, %v6155_v32  ;;  %v609_v35 = vadd.f32 0.5, %v577_v19 }
 0x105   : > { %v1054_v48 = vmul.f32 %v1022_v53, %v4147_v54  ;;  %vm800_vm6 = vcmp.gt.f32.partialorder %v768_v40, 0.25  ;;  %v832_v52 = vsub.f32 %v736_v5, %v672_v43  ;;  %v566_v55 = vadd.f32 %v534_v39, %v462_v22 }
 0x106   : > { %v1189_v16 = vadd.f32 6.2831855, %v1157_v45  ;;  %v959_v1 = vadd.f32 42.058693, %v927_v61  ;;  %v641_v42 = vfloor.f32 %v609_v35  ;;  %v535_v58 = vmul.f32 %v4101_v41, %v3829_v9 }
 0x107   : > { %v1086_v50 = vadd.f32 81.60525, %v1054_v48  ;;  %v4189_v31 = vsel %vm800_vm6, %v832_v52, %v672_v43  ;;  %v598_v12 = vadd.f32 0.5, %v566_v55  ;;  %v412_v33 = vmul.f32 %v4111_v24, %v3783_v38 }
 0x108   : > { %v1221_v2 = vmul.f32 %v1189_v16, %v4099_v10  ;;  %v991_v49 = vmul.f32 %v959_v1, %v4179_v30  ;;  %v4197_v3 = vmul.f32 %v4189_v31, %v4189_v31  ;;  %v673_v59 = vsub.f32 %v577_v19, %v641_v42 }
 0x109   : > { %v1118_v37 = vmul.f32 %v1086_v50, %v4147_v54  ;;  %v630_v47 = vfloor.f32 %v598_v12  ;;  %v567_v21 = vadd.f32 %v535_v58, %v463_v28  ;;  %v464_v17 = vadd.f32 %v3765_v29, %v412_v33 }
 0x10a   : > { %1393 = vmatpush.msra.mxu3 %v1221_v2  ;;  %v1023_v63 = vadd.f32 -76.70586, %v991_v49  ;;  %v928_v7 = vmul.f32 -15.094643, %v4197_v3  ;;  %vm705_vm7 = vcmp.ge.f32.partialorder %v673_v59, 0.0  ;;  %v536_v10 = vmul.f32 %v4113_v34, %v3829_v9 }
 0x10b   : > { %3429 = vmatmul.msk.f32.vlgmr.msra.gmra.mxu3 %vm1278_vm15, %v4121_v15  ;;  %v1150_v4 = vadd.f32 -41.3417, %v1118_v37  ;;  %v737_v18 = vsel %vm705_vm7, 0.5, %v6155_v32  ;;  %v769_v23 = vand.u32 2147483647, %v673_v59  ;;  %v662_v14 = vsub.f32 %v566_v55, %v630_v47 }
 0x10c   : > { %v1055_v20 = vmul.f32 %v1023_v63, %v4179_v30  ;;  %v960_v39 = vadd.f32 42.058693, %v928_v7  ;;  %v833_v26 = vsub.f32 %v737_v18, %v673_v59  ;;  %v599_v43 = vadd.f32 0.5, %v567_v21 }
 0x10d   : > { %v1182_v51 = vmul.f32 %v1150_v4, %v4147_v54  ;;  %vm801_vm8 = vcmp.gt.f32.partialorder %v769_v23, 0.25  ;;  %vm694_vm9 = vcmp.ge.f32.partialorder %v662_v14, 0.0  ;;  %v758_v27 = vand.u32 2147483647, %v662_v14 }
 0x10e   : > { %v1087_v19 = vadd.f32 81.60525, %v1055_v20  ;;  %v992_v22 = vmul.f32 %v960_v39, %v4197_v3  ;;  %v4210_v53 = vsel %vm801_vm8, %v833_v26, %v673_v59  ;;  %v726_v40 = vsel %vm694_vm9, 0.5, %v6155_v32 }
 0x10f   : > { %v1214_v28 = vadd.f32 6.2831855, %v1182_v51  ;;  %v4215_v45 = vmul.f32 %v4210_v53, %v4210_v53  ;;  %vm790_vm10 = vcmp.gt.f32.partialorder %v758_v27, 0.25  ;;  %v822_v61 = vsub.f32 %v726_v40, %v662_v14 }
 0x110   : > { %v1119_v5 = vmul.f32 %v1087_v19, %v4179_v30  ;;  %v1024_v54 = vadd.f32 -76.70586, %v992_v22  ;;  %v631_v35 = vfloor.f32 %v599_v43  ;;  %v568_v48 = vadd.f32 %v536_v10, %v464_v17 }
 0x111   : > { %v1246_v52 = vmul.f32 %v1214_v28, %v4143_v8  ;;  %v929_v55 = vmul.f32 -15.094643, %v4215_v45  ;;  %v4220_v16 = vsel %vm790_vm10, %v822_v61, %v662_v14  ;;  %v413_v1 = vmul.f32 %v4149_v0, %v3783_v38 }
 0x112   : > { %v1151_v42 = vadd.f32 -41.3417, %v1119_v5  ;;  %v1056_v58 = vmul.f32 %v1024_v54, %v4197_v3  ;;  %v4227_v50 = vmul.f32 %v4220_v16, %v4220_v16  ;;  %v663_v12 = vsub.f32 %v567_v21, %v631_v35 }
 0x113   : > { %1419 = vmatpush.msrb.mxu0 %v1246_v52  ;;  %v961_v33 = vadd.f32 42.058693, %v929_v55  ;;  %v600_v2 = vadd.f32 0.5, %v568_v48  ;;  %v465_v8 = vadd.f32 %v3765_v29, %v413_v1  ;;  %v537_v49 = vmul.f32 %v4154_v36, %v3829_v9  ;;  %v1257_v1 = vld [vmem:[%s6149_s4 + $0x18] sm:$0xff] }
 0x114   : > { %v1183_v59 = vmul.f32 %v1151_v42, %v4179_v30  ;;  %v1088_v37 = vadd.f32 81.60525, %v1056_v58  ;;  %v918_v38 = vmul.f32 -15.094643, %v4227_v50  ;;  %vm695_vm11 = vcmp.ge.f32.partialorder %v663_v12, 0.0  ;;  %1275 = vperm.xlu1 %3544, %v1257_v1  }
 0x115   : > { %v993_v47 = vmul.f32 %v961_v33, %v4215_v45  ;;  %v727_v17 = vsel %vm695_vm11, 0.5, %v6155_v32  ;;  %v759_v63 = vand.u32 2147483647, %v663_v12  ;;  %v632_v21 = vfloor.f32 %v600_v2 }
 0x116   : > { %v1215_v7 = vadd.f32 6.2831855, %v1183_v59  ;;  %v1120_v10 = vmul.f32 %v1088_v37, %v4197_v3  ;;  %v950_v4 = vadd.f32 42.058693, %v918_v38  ;;  %v823_v29 = vsub.f32 %v727_v17, %v663_v12 }
 0x117   : > { %v1025_v18 = vadd.f32 -76.70586, %v993_v47  ;;  %vm791_vm12 = vcmp.gt.f32.partialorder %v759_v63, 0.25  ;;  %v664_v9 = vsub.f32 %v568_v48, %v632_v21  ;;  %v569_v23 = vadd.f32 %v537_v49, %v465_v8 }
 0x118   : > { %v1247_v30 = vmul.f32 %v1215_v7, %v4173_v6  ;;  %v1152_v14 = vadd.f32 -41.3417, %v1120_v10  ;;  %v982_v20 = vmul.f32 %v950_v4, %v4227_v50  ;;  %v4239_v39 = vsel %vm791_vm12, %v823_v29, %v663_v12 }
 0x119   : > { %v1057_v26 = vmul.f32 %v1025_v18, %v4215_v45  ;;  %v4244_v43 = vmul.f32 %v4239_v39, %v4239_v39  ;;  %vm696_vm13 = vcmp.ge.f32.partialorder %v664_v9, 0.0  ;;  %v760_v51 = vand.u32 2147483647, %v664_v9 }
 0x11a   : > { %1448 = vmatpush.msrb.mxu1 %v1247_v30  ;;  %v1184_v27 = vmul.f32 %v1152_v14, %v4197_v3  ;;  %v1014_v19 = vadd.f32 -76.70586, %v982_v20  ;;  %v728_v22 = vsel %vm696_vm13, 0.5, %v6155_v32  ;;  %v601_v6 = vadd.f32 0.5, %v569_v23 }
 0x11b   : > { %v1089_v40 = vadd.f32 81.60525, %v1057_v26  ;;  %v919_v28 = vmul.f32 -15.094643, %v4244_v43  ;;  %vm792_vm14 = vcmp.gt.f32.partialorder %v760_v51, 0.25  ;;  %v824_v61 = vsub.f32 %v728_v22, %v664_v9 }
 0x11c   : > { %v1216_v5 = vadd.f32 6.2831855, %v1184_v27  ;;  %v1046_v54 = vmul.f32 %v1014_v19, %v4227_v50  ;;  %v633_v35 = vfloor.f32 %v601_v6  ;;  %v402_v48 = vmul.f32 %v4071_v11, %v3750_v13 }
 0x11d   : > { %v1121_v52 = vmul.f32 %v1089_v40, %v4215_v45  ;;  %v951_v55 = vadd.f32 42.058693, %v919_v28  ;;  %v4253_v3 = vsel %vm792_vm14, %v824_v61, %v664_v9  ;;  %v526_v42 = vmul.f32 %v4073_v46, %v3909_v56 }
 0x11e   : > { %v1248_v58 = vmul.f32 %v1216_v5, %v4189_v31  ;;  %v1078_v12 = vadd.f32 81.60525, %v1046_v54  ;;  %v4263_v33 = vmul.f32 %v4253_v3, %v4253_v3  ;;  %v665_v2 = vsub.f32 %v569_v23, %v633_v35 }
 0x11f   : > { %v1153_v8 = vadd.f32 -41.3417, %v1121_v52  ;;  %v983_v49 = vmul.f32 %v951_v55, %v4244_v43  ;;  %v454_v59 = vadd.f32 %v3815_v60, %v402_v48  ;;  %v403_v37 = vmul.f32 %v4083_v25, %v3750_v13 }
 0x120   : > { %1477 = vmatpush.msrb.mxu2 %v1248_v58  ;;  %v1110_v38 = vmul.f32 %v1078_v12, %v4227_v50  ;;  %v920_v31 = vmul.f32 -15.094643, %v4263_v33  ;;  %vm697_vm0 = vcmp.ge.f32.partialorder %v665_v2, 0.0  ;;  %v761_v47 = vand.u32 2147483647, %v665_v2 }
 0x121   : > { %v1185_v17 = vmul.f32 %v1153_v8, %v4215_v45  ;;  %v1015_v63 = vadd.f32 -76.70586, %v983_v49  ;;  %v729_v21 = vsel %vm697_vm0, 0.5, %v6155_v32  ;;  %v558_v7 = vadd.f32 %v526_v42, %v454_v59 }
 0x122   : > { %v1142_v10 = vadd.f32 -41.3417, %v1110_v38  ;;  %v952_v4 = vadd.f32 42.058693, %v920_v31  ;;  %vm793_vm1 = vcmp.gt.f32.partialorder %v761_v47, 0.25  ;;  %v825_v29 = vsub.f32 %v729_v21, %v665_v2 }
 0x123   : > { %v1217_v18 = vadd.f32 6.2831855, %v1185_v17  ;;  %v1047_v9 = vmul.f32 %v1015_v63, %v4244_v43  ;;  %v590_v23 = vadd.f32 0.5, %v558_v7  ;;  %v455_v30 = vadd.f32 %v3815_v60, %v403_v37 }
 0x124   : > { %v1174_v14 = vmul.f32 %v1142_v10, %v4227_v50  ;;  %v984_v20 = vmul.f32 %v952_v4, %v4263_v33  ;;  %v4277_v26 = vsel %vm793_vm1, %v825_v29, %v665_v2  ;;  %v527_v45 = vmul.f32 %v4101_v41, %v3909_v56 }
 0x125   : > { %v1249_v51 = vmul.f32 %v1217_v18, %v4210_v53  ;;  %v1079_v27 = vadd.f32 81.60525, %v1047_v9  ;;  %v4284_v19 = vmul.f32 %v4277_v26, %v4277_v26  ;;  %v622_v22 = vfloor.f32 %v590_v23 }
 0x126   : > { %v1206_v6 = vadd.f32 6.2831855, %v1174_v14  ;;  %v1016_v40 = vadd.f32 -76.70586, %v984_v20  ;;  %v559_v28 = vadd.f32 %v527_v45, %v455_v30  ;;  %v404_v50 = vmul.f32 %v4111_v24, %v3750_v13 }
 0x127   : > { %1506 = vmatpush.msrb.mxu3 %v1249_v51  ;;  %v1111_v61 = vmul.f32 %v1079_v27, %v4244_v43  ;;  %v921_v5 = vmul.f32 -15.094643, %v4284_v19  ;;  %v654_v54 = vsub.f32 %v558_v7, %v622_v22  ;;  %v528_v53 = vmul.f32 %v4113_v34, %v3909_v56 }
 0x128   : > { %v1238_v35 = vmul.f32 %v1206_v6, %v4220_v16  ;;  %v1048_v48 = vmul.f32 %v1016_v40, %v4263_v33  ;;  %v591_v52 = vadd.f32 0.5, %v559_v28  ;;  %v456_v55 = vadd.f32 %v3815_v60, %v404_v50 }
 0x129   : > { %v1143_v1 = vadd.f32 -41.3417, %v1111_v61  ;;  %v953_v42 = vadd.f32 42.058693, %v921_v5  ;;  %vm686_vm2 = vcmp.ge.f32.partialorder %v654_v54, 0.0  ;;  %v405_v58 = vmul.f32 %v4149_v0, %v3750_v13 }
 0x12a   : > { %1420 = vmatpush.msrb.mxu0 %v1238_v35  ;;  %v1080_v12 = vadd.f32 81.60525, %v1048_v48  ;;  %v718_v2 = vsel %vm686_vm2, 0.5, %v6155_v32  ;;  %v750_v8 = vand.u32 2147483647, %v654_v54  ;;  %v623_v49 = vfloor.f32 %v591_v52 }
 0x12b   : > { %v1175_v59 = vmul.f32 %v1143_v1, %v4244_v43  ;;  %v985_v16 = vmul.f32 %v953_v42, %v4284_v19  ;;  %v814_v37 = vsub.f32 %v718_v2, %v654_v54  ;;  %v560_v38 = vadd.f32 %v528_v53, %v456_v55 }
 0x12c   : > { %v1112_v31 = vmul.f32 %v1080_v12, %v4263_v33  ;;  %vm782_vm3 = vcmp.gt.f32.partialorder %v750_v8, 0.25  ;;  %v655_v47 = vsub.f32 %v559_v28, %v623_v49  ;;  %v457_v17 = vadd.f32 %v3815_v60, %v405_v58 }
 0x12d   : > { %v1207_v63 = vadd.f32 6.2831855, %v1175_v59  ;;  %v1017_v13 = vadd.f32 -76.70586, %v985_v16  ;;  %v4302_v21 = vsel %vm782_vm3, %v814_v37, %v654_v54  ;;  %v592_v7 = vadd.f32 0.5, %v560_v38 }
 0x12e   : > { %v1144_v10 = vadd.f32 -41.3417, %v1112_v31  ;;  %v4306_v4 = vmul.f32 %v4302_v21, %v4302_v21  ;;  %vm687_vm4 = vcmp.ge.f32.partialorder %v655_v47, 0.0  ;;  %v751_v43 = vand.u32 2147483647, %v655_v47 }
 0x12f   : > { %v1239_v29 = vmul.f32 %v1207_v63, %v4239_v39  ;;  %v1049_v18 = vmul.f32 %v1017_v13, %v4284_v19  ;;  %v719_v9 = vsel %vm687_vm4, 0.5, %v6155_v32  ;;  %v624_v23 = vfloor.f32 %v592_v7 }
 0x130   : > { %v1176_v60 = vmul.f32 %v1144_v10, %v4263_v33  ;;  %v910_v30 = vmul.f32 -15.094643, %v4306_v4  ;;  %vm783_vm5 = vcmp.gt.f32.partialorder %v751_v43, 0.25  ;;  %v815_v14 = vsub.f32 %v719_v9, %v655_v47 }
 0x131   : > { %1449 = vmatpush.msrb.mxu1 %v1239_v29  ;;  %v1081_v20 = vadd.f32 81.60525, %v1049_v18  ;;  %v656_v45 = vsub.f32 %v560_v38, %v624_v23  ;;  %v529_v51 = vmul.f32 %v4154_v36, %v3909_v56  ;;  %v394_v39 = vmul.f32 %v4071_v11, %v3879_v44 }
 0x132   : > { %v1208_v27 = vadd.f32 6.2831855, %v1176_v60  ;;  %v942_v22 = vadd.f32 42.058693, %v910_v30  ;;  %v4317_v6 = vsel %vm783_vm5, %v815_v14, %v655_v47  ;;  %v518_v33 = vmul.f32 %v4073_v46, %v3966_v57 }
 0x133   : > { %v1113_v40 = vmul.f32 %v1081_v20, %v4284_v19  ;;  %v4324_v28 = vmul.f32 %v4317_v6, %v4317_v6  ;;  %vm688_vm6 = vcmp.ge.f32.partialorder %v656_v45, 0.0  ;;  %v752_v50 = vand.u32 2147483647, %v656_v45 }
 0x134   : > { %v1240_v56 = vmul.f32 %v1208_v27, %v4253_v3  ;;  %v974_v61 = vmul.f32 %v942_v22, %v4306_v4  ;;  %v720_v11 = vsel %vm688_vm6, 0.5, %v6155_v32  ;;  %v561_v5 = vadd.f32 %v529_v51, %v457_v17 }
 0x135   : > { %v1145_v54 = vadd.f32 -41.3417, %v1113_v40  ;;  %v911_v53 = vmul.f32 -15.094643, %v4324_v28  ;;  %vm784_vm7 = vcmp.gt.f32.partialorder %v752_v50, 0.25  ;;  %v816_v46 = vsub.f32 %v720_v11, %v656_v45 }
 0x136   : > { %1478 = vmatpush.msrb.mxu2 %v1240_v56  ;;  %v1006_v35 = vadd.f32 -76.70586, %v974_v61  ;;  %v593_v48 = vadd.f32 0.5, %v561_v5  ;;  %v446_v52 = vadd.f32 %v3985_v62, %v394_v39  ;;  %v395_v55 = vmul.f32 %v4083_v25, %v3879_v44 }
 0x137   : > { %v1177_v3 = vmul.f32 %v1145_v54, %v4284_v19  ;;  %v943_v1 = vadd.f32 42.058693, %v911_v53  ;;  %v4334_v42 = vsel %vm784_vm7, %v816_v46, %v656_v45  ;;  %v519_v58 = vmul.f32 %v4101_v41, %v3966_v57 }
 0x138   : > { %v1038_v12 = vmul.f32 %v1006_v35, %v4306_v4  ;;  %v4341_v2 = vmul.f32 %v4334_v42, %v4334_v42  ;;  %v625_v8 = vfloor.f32 %v593_v48  ;;  %v550_v49 = vadd.f32 %v518_v33, %v446_v52 }
 0x139   : > { %v1209_v59 = vadd.f32 6.2831855, %v1177_v3  ;;  %v975_v16 = vmul.f32 %v943_v1, %v4324_v28  ;;  %v447_v25 = vadd.f32 %v3985_v62, %v395_v55  ;;  %v396_v19 = vmul.f32 %v4111_v24, %v3879_v44 }
 0x13a   : > { %v1070_v37 = vadd.f32 81.60525, %v1038_v12  ;;  %v912_v38 = vmul.f32 -15.094643, %v4341_v2  ;;  %v657_v41 = vsub.f32 %v561_v5, %v625_v8  ;;  %v582_v31 = vadd.f32 0.5, %v550_v49 }
 0x13b   : > { %v1241_v47 = vmul.f32 %v1209_v59, %v4277_v26  ;;  %v1007_v17 = vadd.f32 -76.70586, %v975_v16  ;;  %v551_v63 = vadd.f32 %v519_v58, %v447_v25  ;;  %v448_v13 = vadd.f32 %v3985_v62, %v396_v19 }
 0x13c   : > { %v1102_v7 = vmul.f32 %v1070_v37, %v4306_v4  ;;  %v944_v10 = vadd.f32 42.058693, %v912_v38  ;;  %vm689_vm8 = vcmp.ge.f32.partialorder %v657_v41, 0.0  ;;  %v753_v43 = vand.u32 2147483647, %v657_v41 }
 0x13d   : > { %1507 = vmatpush.msrb.mxu3 %v1241_v47  ;;  %v1039_v29 = vmul.f32 %v1007_v17, %v4324_v28  ;;  %v721_v24 = vsel %vm689_vm8, 0.5, %v6155_v32  ;;  %v614_v18 = vfloor.f32 %v582_v31  ;;  %v583_v9 = vadd.f32 0.5, %v551_v63 }
 0x13e   : > { %v1134_v23 = vadd.f32 -41.3417, %v1102_v7  ;;  %v976_v60 = vmul.f32 %v944_v10, %v4341_v2  ;;  %vm785_vm9 = vcmp.gt.f32.partialorder %v753_v43, 0.25  ;;  %v817_v26 = vsub.f32 %v721_v24, %v657_v41 }
 0x13f   : > { %v1071_v30 = vadd.f32 81.60525, %v1039_v29  ;;  %v646_v14 = vsub.f32 %v550_v49, %v614_v18  ;;  %v615_v20 = vfloor.f32 %v583_v9  ;;  %v520_v45 = vmul.f32 %v4113_v34, %v3966_v57 }
 0x140   : > { %v1166_v51 = vmul.f32 %v1134_v23, %v4306_v4  ;;  %v1008_v39 = vadd.f32 -76.70586, %v976_v60  ;;  %v4357_v27 = vsel %vm785_vm9, %v817_v26, %v657_v41  ;;  %v397_v22 = vmul.f32 %v4149_v0, %v3879_v44  ;;  %v4401_v23 = vld [vmem:[%s6148_s3 + $0x8] sm:$0xff]  ;;  %v1254_v60 = vld [vmem:[%s6149_s4] sm:$0xff] }
 0x141   : > { %v1103_v33 = vmul.f32 %v1071_v30, %v4324_v28  ;;  %v4364_v40 = vmul.f32 %v4357_v27, %v4357_v27  ;;  %vm678_vm10 = vcmp.ge.f32.partialorder %v646_v14, 0.0  ;;  %v742_v50 = vand.u32 2147483647, %v646_v14  ;;  %3418 = vmatmul.msk.f32.gmra.mxu0 %vm1278_vm15, %v4401_v23  ;;  %3422 = vmatmul.msk.f32.gmra.mxu1 %vm1278_vm15, %v4401_v23 }
 0x142   : > { %v1198_v56 = vadd.f32 6.2831855, %v1166_v51  ;;  %v1040_v61 = vmul.f32 %v1008_v39, %v4341_v2  ;;  %v710_v34 = vsel %vm678_vm10, 0.5, %v6155_v32  ;;  %v647_v4 = vsub.f32 %v551_v63, %v615_v20  ;;  %3426 = vmatmul.msk.f32.gmra.mxu2 %vm1278_vm15, %v4401_v23  ;;  %3430 = vmatmul.msk.f32.gmra.mxu3 %vm1278_vm15, %v4401_v23 }
 0x143   : > { %v1135_v11 = vadd.f32 -41.3417, %v1103_v33  ;;  %v913_v5 = vmul.f32 -15.094643, %v4364_v40  ;;  %vm774_vm11 = vcmp.gt.f32.partialorder %v742_v50, 0.25  ;;  %v806_v54 = vsub.f32 %v710_v34, %v646_v14  ;;  %1260 = vperm.xlu1 %3544, %v1254_v60  }
 0x144   : > { %v1230_v44 = vmul.f32 %v1198_v56, %v4302_v21  ;;  %v1072_v0 = vadd.f32 81.60525, %v1040_v61  ;;  %vm679_vm12 = vcmp.ge.f32.partialorder %v647_v4, 0.0  ;;  %v743_v53 = vand.u32 2147483647, %v647_v4 }
 0x145   : > { %v1167_v46 = vmul.f32 %v1135_v11, %v4324_v28  ;;  %v945_v35 = vadd.f32 42.058693, %v913_v5  ;;  %v4371_v48 = vsel %vm774_vm11, %v806_v54, %v646_v14  ;;  %v711_v52 = vsel %vm679_vm12, 0.5, %v6155_v32  ;;  %v1255_v14 = vld [vmem:[%s6149_s4 + $0x8] sm:$0xff] }
 0x146   : > { %1421 = vmatpush.msrb.mxu0 %v1230_v44  ;;  %v1104_v55 = vmul.f32 %v1072_v0, %v4341_v2  ;;  %v4377_v3 = vmul.f32 %v4371_v48, %v4371_v48  ;;  %vm775_vm13 = vcmp.gt.f32.partialorder %v743_v53, 0.25  ;;  %v807_v1 = vsub.f32 %v711_v52, %v647_v4  ;;  %1265 = vperm.xlu0 %3545, %v1255_v14   ;;  %v4426_v44 = vld [vmem:[%s6148_s3 + $0x10] sm:$0xff] }
 0x147   : > { %v1199_v21 = vadd.f32 6.2831855, %v1167_v46  ;;  %v977_v58 = vmul.f32 %v945_v35, %v4364_v40  ;;  %v552_v12 = vadd.f32 %v520_v45, %v448_v13  ;;  %v449_v28 = vadd.f32 %v3985_v62, %v397_v22 }
 0x148   : > { %v1136_v8 = vadd.f32 -41.3417, %v1104_v55  ;;  %v902_v49 = vmul.f32 -15.094643, %v4377_v3  ;;  %v4382_v59 = vsel %vm775_vm13, %v807_v1, %v647_v4  ;;  %v521_v16 = vmul.f32 %v4154_v36, %v3966_v57 }
 0x149   : > { %v1231_v25 = vmul.f32 %v1199_v21, %v4317_v6  ;;  %v1009_v19 = vadd.f32 -76.70586, %v977_v58  ;;  %v4389_v37 = vmul.f32 %v4382_v59, %v4382_v59  ;;  %v584_v38 = vadd.f32 0.5, %v552_v12  ;;  %3419 = vmatmul.msk.f32.gmra.mxu0 %vm1278_vm15, %v4426_v44  ;;  %v2201_v21 = vld [vmem:[%s6151_s6 + $0x10] sm:$0xff]  ;;  %3423 = vmatmul.msk.f32.gmra.mxu1 %vm1278_vm15, %v4426_v44 }
 0x14a   : > { %v1168_v41 = vmul.f32 %v1136_v8, %v4341_v2  ;;  %v934_v31 = vadd.f32 42.058693, %v902_v49  ;;  %v553_v62 = vadd.f32 %v521_v16, %v449_v28  ;;  %3427 = vmatmul.msk.f32.gmra.mxu2 %vm1278_vm15, %v4426_v44  ;;  %3431 = vmatmul.msk.f32.gmra.mxu3 %vm1278_vm15, %v4426_v44 }
 0x14b   : > { %1450 = vmatpush.msrb.mxu1 %v1231_v25  ;;  %v1041_v47 = vmul.f32 %v1009_v19, %v4364_v40  ;;  %v903_v17 = vmul.f32 -15.094643, %v4389_v37  ;;  %v616_v63 = vfloor.f32 %v584_v38  ;;  %2215 = vperm.xlu1 %3544, %v2201_v21   ;;  %v1253_v38 = vld [vmem:[%s6148_s3 + $0x18] sm:$0xff] }
 0x14c   : > { %v1200_v13 = vadd.f32 6.2831855, %v1168_v41  ;;  %v966_v57 = vmul.f32 %v934_v31, %v4377_v3  ;;  %v585_v36 = vadd.f32 0.5, %v553_v62 }
 0x14d   : > { %v1073_v6 = vadd.f32 81.60525, %v1041_v47  ;;  %v935_v7 = vadd.f32 42.058693, %v903_v17  ;;  %v648_v10 = vsub.f32 %v552_v12, %v616_v63 }
 0x14e   : > { %v1232_v43 = vmul.f32 %v1200_v13, %v4334_v42  ;;  %v998_v29 = vadd.f32 -76.70586, %v966_v57  ;;  %v617_v24 = vfloor.f32 %v585_v36 }
 0x14f   : > { %v1105_v2 = vmul.f32 %v1073_v6, %v4364_v40  ;;  %v967_v18 = vmul.f32 %v935_v7, %v4389_v37  ;;  %vm680_vm14 = vcmp.ge.f32.partialorder %v648_v10, 0.0  ;;  %v744_v9 = vand.u32 2147483647, %v648_v10  ;;  %v2199_v7 = vld [vmem:[%s6151_s6] sm:$0xff] }
 0x150   : > { %1479 = vmatpush.msrb.mxu2 %v1232_v43  ;;  %v1030_v42 = vmul.f32 %v998_v29, %v4377_v3  ;;  %v712_v26 = vsel %vm680_vm14, 0.5, %v6155_v32  ;;  %v649_v30 = vsub.f32 %v553_v62, %v617_v24  ;;  %2205 = vperm.xlu0 %3545, %v2199_v7  }
 0x151   : > { %v1137_v20 = vadd.f32 -41.3417, %v1105_v2  ;;  %v999_v45 = vadd.f32 -76.70586, %v967_v18  ;;  %vm776_vm0 = vcmp.gt.f32.partialorder %v744_v9, 0.25  ;;  %v808_v51 = vsub.f32 %v712_v26, %v648_v10  ;;  %3420 = vmatmul.msk.f32.gmra.mxu0 %vm1278_vm15, %v1253_v38  ;;  %3424 = vmatmul.msk.f32.gmra.mxu1 %vm1278_vm15, %v1253_v38 }
 0x152   : > { %v1062_v39 = vadd.f32 81.60525, %v1030_v42  ;;  %vm681_vm1 = vcmp.ge.f32.partialorder %v649_v30, 0.0  ;;  %v745_v22 = vand.u32 2147483647, %v649_v30  ;;  %3428 = vmatmul.msk.f32.gmra.mxu2 %vm1278_vm15, %v1253_v38  ;;  %3432 = vmatmul.msk.f32.gmra.mxu3 %vm1278_vm15, %v1253_v38 }
 0x153   : > { %v1169_v33 = vmul.f32 %v1137_v20, %v4364_v40  ;;  %v1031_v50 = vmul.f32 %v999_v45, %v4389_v37  ;;  %v840_v56 = vsel %vm776_vm0, %v808_v51, %v648_v10  ;;  %v713_v61 = vsel %vm681_vm1, 0.5, %v6155_v32 }
 0x154   : > { %v1094_v34 = vmul.f32 %v1062_v39, %v4377_v3  ;;  %v872_v4 = vmul.f32 %v840_v56, %v840_v56  ;;  %vm777_vm2 = vcmp.gt.f32.partialorder %v745_v22, 0.25  ;;  %v809_v11 = vsub.f32 %v713_v61, %v649_v30  ;;  %v4496_v61 = vpop.permute.xlu2 %1270 }
 0x155   : > { %v1201_v5 = vadd.f32 6.2831855, %v1169_v33  ;;  %v1063_v54 = vadd.f32 81.60525, %v1031_v50 }
 0x156   : > { %v1126_v0 = vadd.f32 -41.3417, %v1094_v34  ;;  %v904_v40 = vmul.f32 -15.094643, %v872_v4  ;;  %v841_v53 = vsel %vm777_vm2, %v809_v11, %v649_v30 }
 0x157   : > { %v1233_v46 = vmul.f32 %v1201_v5, %v4357_v27  ;;  %v1095_v35 = vmul.f32 %v1063_v54, %v4389_v37  ;;  %v873_v52 = vmul.f32 %v841_v53, %v841_v53 }
 0x158   : > { %v1158_v55 = vmul.f32 %v1126_v0, %v4377_v3  ;;  %v936_v1 = vadd.f32 42.058693, %v904_v40 }
 0x159   : > { %1508 = vmatpush.msrb.mxu3 %v1233_v46  ;;  %v1127_v58 = vadd.f32 -41.3417, %v1095_v35  ;;  %v905_v12 = vmul.f32 -15.094643, %v873_v52 }
 0x15a   : > { %v1190_v27 = vadd.f32 6.2831855, %v1158_v55  ;;  %v968_v28 = vmul.f32 %v936_v1, %v872_v4 }
 0x15b   : > { %v1159_v3 = vmul.f32 %v1127_v58, %v4389_v37  ;;  %v937_v8 = vadd.f32 42.058693, %v905_v12  ;;  %v3140_v37 = vld [vmem:[%s6153_s8] sm:$0x7] }
 0x15c   : > { %v1222_v49 = vmul.f32 %v1190_v27, %v4371_v48  ;;  %v1000_v16 = vadd.f32 -76.70586, %v968_v28  ;;  %3143 = vperm.xlu1 %3544, %v3140_v37  }
 0x15d   : > { %v1191_v25 = vadd.f32 6.2831855, %v1159_v3  ;;  %v969_v19 = vmul.f32 %v937_v8, %v873_v52 }
 0x15e   : > { %1422 = vmatpush.msrb.mxu0 %v1222_v49  ;;  %v1032_v41 = vmul.f32 %v1000_v16, %v872_v4 }
 0x15f   : > { %v1223_v31 = vmul.f32 %v1191_v25, %v4382_v59  ;;  %v1001_v62 = vadd.f32 -76.70586, %v969_v19  ;;  %3433 = vmatmul.msk.f32.vlgmr.msrb.gmra.mxu0 %vm1278_vm15, %v4121_v15 }
 0x160   : > { %v1064_v47 = vadd.f32 81.60525, %v1032_v41 }
 0x161   : > { %1451 = vmatpush.msrb.mxu1 %v1223_v31  ;;  %v1033_v48 = vmul.f32 %v1001_v62, %v873_v52 }
 0x162   : > { %v1096_v17 = vmul.f32 %v1064_v47, %v872_v4  ;;  %3437 = vmatmul.msk.f32.vlgmr.msrb.gmra.mxu1 %vm1278_vm15, %v4121_v15 }
 0x163   : > { %v1065_v63 = vadd.f32 81.60525, %v1033_v48 }
 0x164   : > { %v1128_v59 = vadd.f32 -41.3417, %v1096_v17 }
 0x165   : > { %v1097_v13 = vmul.f32 %v1065_v63, %v873_v52 }
 0x166   : > { %v1160_v57 = vmul.f32 %v1128_v59, %v872_v4 }
 0x167   : > { %v1129_v36 = vadd.f32 -41.3417, %v1097_v13  ;;  %3434 = vmatmul.msk.f32.gmra.mxu0 %vm1278_vm15, %v4401_v23 }
 0x168   : > { %v1192_v6 = vadd.f32 6.2831855, %v1160_v57 }
 0x169   : > { %v1161_v10 = vmul.f32 %v1129_v36, %v873_v52 }
 0x16a   : > { %v1224_v43 = vmul.f32 %v1192_v6, %v840_v56  ;;  %3438 = vmatmul.msk.f32.gmra.mxu1 %vm1278_vm15, %v4401_v23 }
 0x16b   : > { %v1193_v29 = vadd.f32 6.2831855, %v1161_v10 }
 0x16c   : > { %1480 = vmatpush.msrb.mxu2 %v1224_v43 }
 0x16d   : > { %v1225_v24 = vmul.f32 %v1193_v29, %v841_v53  ;;  %3441 = vmatmul.msk.f32.vlgmr.msrb.gmra.mxu2 %vm1278_vm15, %v4121_v15 }
 0x16f   : > { %1509 = vmatpush.msrb.mxu3 %v1225_v24  ;;  %3435 = vmatmul.msk.f32.gmra.mxu0 %vm1278_vm15, %v4426_v44 }
 0x170   : > { %3445 = vmatmul.msk.f32.vlgmr.msrb.gmra.mxu3 %vm1278_vm15, %v4121_v15 }
 0x172   : > { %3439 = vmatmul.msk.f32.gmra.mxu1 %vm1278_vm15, %v4426_v44 }
 0x175   : > { %3442 = vmatmul.msk.f32.gmra.mxu2 %vm1278_vm15, %v4401_v23 }
 0x176   : > { %v1308_v15 = vpop.f32.mrf.mxu0 }
 0x177   : > { %3436 = vmatmul.msk.f32.gmra.mxu0 %vm1278_vm15, %v1253_v38 }
 0x178   : > { %3446 = vmatmul.msk.f32.gmra.mxu3 %vm1278_vm15, %v4401_v23 }
 0x17a   : > { %3440 = vmatmul.msk.f32.gmra.mxu1 %vm1278_vm15, %v1253_v38 }
 0x17c   : > { %v1337_v2 = vpop.f32.mrf.mxu1 }
 0x17d   : > { %3443 = vmatmul.msk.f32.gmra.mxu2 %vm1278_vm15, %v4426_v44 }
 0x180   : > { %3447 = vmatmul.msk.f32.gmra.mxu3 %vm1278_vm15, %v4426_v44 }
 0x182   : > { %v1366_v9 = vpop.f32.mrf.mxu2 }
 0x185   : > { %3444 = vmatmul.msk.f32.gmra.mxu2 %vm1278_vm15, %v1253_v38 }
 0x186   : > { %v4486_v18 = vpop.permute.xlu1 %1275 }
 0x188   : > { %3448 = vmatmul.msk.f32.gmra.mxu3 %vm1278_vm15, %v1253_v38 }
 0x18e   : > { %v1395_v23 = vpop.f32.mrf.mxu3 }
 0x1b5   : > { %v4488_v26 = vpop.permute.xlu1 %1260 }
 0x1b6   : > { %v1309_v45 = vadd.f32 %v1308_v15, %v4488_v26  ;;  %v1338_v39 = vadd.f32 %v1337_v2, %v4488_v26  ;;  %v1367_v33 = vadd.f32 %v1366_v9, %v4488_v26  ;;  %v1396_v56 = vadd.f32 %v1395_v23, %v4488_v26 }
 0x1b8   : > { %v4492_v22 = vpop.permute.xlu0 %1265  ;;  %v1523_v50 = vadd.f32 0.5, %v1309_v45  ;;  %v1524_v34 = vadd.f32 0.5, %v1338_v39  ;;  %v1525_v54 = vadd.f32 0.5, %v1367_v33  ;;  %v1526_v46 = vadd.f32 0.5, %v1396_v56 }
 0x1ba   : > { %v1555_v53 = vfloor.f32 %v1523_v50  ;;  %v1556_v52 = vfloor.f32 %v1524_v34  ;;  %v1557_v8 = vfloor.f32 %v1525_v54  ;;  %v1558_v38 = vfloor.f32 %v1526_v46 }
 0x1bc   : > { %v4507_v19 = vsub.f32 %v1309_v45, %v1555_v53  ;;  %v4510_v62 = vsub.f32 %v1338_v39, %v1556_v52  ;;  %v4512_v57 = vsub.f32 %v1367_v33, %v1557_v8  ;;  %v4516_v43 = vsub.f32 %v1396_v56, %v1558_v38 }
 0x1be   : > { %v1311_v60 = vpop.f32.mrf.mxu0  ;;  %v1340_v42 = vpop.f32.mrf.mxu1 }
 0x1bf   : > { %v1312_v4 = vadd.f32 %v1311_v60, %v4492_v22  ;;  %v1341_v11 = vadd.f32 %v1340_v42, %v4492_v22 }
 0x1c1   : > { %v1531_v55 = vadd.f32 0.5, %v1312_v4  ;;  %v1532_v1 = vadd.f32 0.5, %v1341_v11 }
 0x1c3   : > { %v1563_v47 = vfloor.f32 %v1531_v55  ;;  %v1564_v37 = vfloor.f32 %v1532_v1 }
 0x1c5   : > { %v1369_v30 = vpop.f32.mrf.mxu2  ;;  %v1398_v14 = vpop.f32.mrf.mxu3  ;;  %v4521_v23 = vsub.f32 %v1312_v4, %v1563_v47  ;;  %v4523_v60 = vsub.f32 %v1341_v11, %v1564_v37 }
 0x1c6   : > { %v1314_v20 = vpop.f32.mrf.mxu0  ;;  %v1343_v51 = vpop.f32.mrf.mxu1  ;;  %v1370_v12 = vadd.f32 %v1369_v30, %v4492_v22  ;;  %v1399_v27 = vadd.f32 %v1398_v14, %v4492_v22 }
 0x1c7   : > { %v1315_v5 = vadd.f32 %v1314_v20, %v4496_v61  ;;  %v1344_v44 = vadd.f32 %v1343_v51, %v4496_v61  ;;  %vm1627_vm5 = vcmp.ge.f32.partialorder %v4521_v23, 0.0  ;;  %vm1628_vm6 = vcmp.ge.f32.partialorder %v4523_v60, 0.0 }
 0x1c8   : > { %v1533_v17 = vadd.f32 0.5, %v1370_v12  ;;  %v1534_v63 = vadd.f32 0.5, %v1399_v27  ;;  %v4557_v38 = vsel %vm1627_vm5, 0.5, %v6155_v32 }
 0x1c9   : > { %v1539_v28 = vadd.f32 0.5, %v1315_v5  ;;  %v1540_v49 = vadd.f32 0.5, %v1344_v44 }
 0x1ca   : > { %v1565_v20 = vfloor.f32 %v1533_v17  ;;  %v1566_v45 = vfloor.f32 %v1534_v63 }
 0x1cb   : > { %v1571_v59 = vfloor.f32 %v1539_v28  ;;  %v1572_v36 = vfloor.f32 %v1540_v49 }
 0x1cc   : > { %v4539_v46 = vsub.f32 %v1399_v27, %v1566_v45 }
 0x1cd   : > { %v1372_v0 = vpop.f32.mrf.mxu2  ;;  %v1401_v40 = vpop.f32.mrf.mxu3  ;;  %v1603_v51 = vsub.f32 %v1315_v5, %v1571_v59  ;;  %v4527_v33 = vsub.f32 %v1344_v44, %v1572_v36  ;;  %v4534_v5 = vsub.f32 %v1370_v12, %v1565_v20  ;;  %v1691_v36 = vand.u32 2147483647, %v4521_v23 }
 0x1ce   : > { %v1317_v35 = vpop.f32.mrf.mxu0  ;;  %v1346_v58 = vpop.f32.mrf.mxu1  ;;  %v1373_v16 = vadd.f32 %v1372_v0, %v4496_v61  ;;  %v1402_v41 = vadd.f32 %v1401_v40, %v4496_v61 }
 0x1cf   : > { %v1318_v21 = vadd.f32 %v1317_v35, %v4486_v18  ;;  %v1347_v3 = vadd.f32 %v1346_v58, %v4486_v18  ;;  %vm1635_vm7 = vcmp.ge.f32.partialorder %v1603_v51, 0.0  ;;  %vm1636_vm8 = vcmp.ge.f32.partialorder %v4527_v33, 0.0 }
 0x1d0   : > { %v1541_v6 = vadd.f32 0.5, %v1373_v16  ;;  %v1542_v29 = vadd.f32 0.5, %v1402_v41  ;;  %v1699_v58 = vand.u32 2147483647, %v1603_v51  ;;  %vm4651_vm0 = vcmp.gt.f32.partialorder %v1691_v36, 0.25 }
 0x1d1   : > { %v1547_v25 = vadd.f32 0.5, %v1318_v21  ;;  %v1548_v31 = vadd.f32 0.5, %v1347_v3 }
 0x1d2   : > { %v1573_v50 = vfloor.f32 %v1541_v6  ;;  %v1574_v34 = vfloor.f32 %v1542_v29  ;;  %vm1731_vm11 = vcmp.gt.f32.partialorder %v1699_v58, 0.25  ;;  %v1668_v58 = vsel %vm1636_vm8, 0.5, %v6155_v32 }
 0x1d3   : > { %v1579_v48 = vfloor.f32 %v1547_v25  ;;  %v1580_v13 = vfloor.f32 %v1548_v31 }
 0x1d4   : > { %v4541_v35 = vsub.f32 %v1373_v16, %v1573_v50  ;;  %v4545_v55 = vsub.f32 %v1402_v41, %v1574_v34  ;;  %v4562_v41 = vsel %vm1628_vm6, 0.5, %v6155_v32 }
 0x1d5   : > { %v4514_v7 = vsub.f32 %v1318_v21, %v1579_v48  ;;  %v1375_v10 = vpop.f32.mrf.mxu2  ;;  %v4518_v24 = vsub.f32 %v1347_v3, %v1580_v13  ;;  %v1404_v2 = vpop.f32.mrf.mxu3  ;;  %v1667_v48 = vsel %vm1635_vm7, 0.5, %v6155_v32 }
 0x1d6   : > { %v1376_v15 = vadd.f32 %v1375_v10, %v4486_v18  ;;  %v1405_v42 = vadd.f32 %v1404_v2, %v4486_v18  ;;  %v1763_v63 = vsub.f32 %v1667_v48, %v1603_v51  ;;  %vm1637_vm7 = vcmp.ge.f32.partialorder %v4541_v35, 0.0 }
 0x1d7   : > { %vm1643_vm3 = vcmp.ge.f32.partialorder %v4514_v7, 0.0  ;;  %vm1644_vm4 = vcmp.ge.f32.partialorder %v4518_v24, 0.0  ;;  %v1707_v12 = vand.u32 2147483647, %v4514_v7  ;;  %v1708_v28 = vand.u32 2147483647, %v4518_v24 }
 0x1d8   : > { %v1549_v39 = vadd.f32 0.5, %v1376_v15  ;;  %v1550_v56 = vadd.f32 0.5, %v1405_v42  ;;  %v1675_v44 = vsel %vm1643_vm3, 0.5, %v6155_v32  ;;  %v1676_v52 = vsel %vm1644_vm4, 0.5, %v6155_v32 }
 0x1d9   : > { %v1771_v27 = vsub.f32 %v1675_v44, %v4514_v7  ;;  %v1772_v49 = vsub.f32 %v1676_v52, %v4518_v24  ;;  %v4581_v2 = vsel %vm1731_vm11, %v1763_v63, %v1603_v51  ;;  %vm1739_vm12 = vcmp.gt.f32.partialorder %v1707_v12, 0.25 }
 0x1da   : > { %v1581_v4 = vfloor.f32 %v1549_v39  ;;  %v1582_v54 = vfloor.f32 %v1550_v56  ;;  %vm1740_vm13 = vcmp.gt.f32.partialorder %v1708_v28, 0.25  ;;  %vm1619_vm3 = vcmp.ge.f32.partialorder %v4507_v19, 0.0 }
 0x1db   : > { %vm1620_vm4 = vcmp.ge.f32.partialorder %v4510_v62, 0.0  ;;  %vm1638_vm8 = vcmp.ge.f32.partialorder %v4545_v55, 0.0 }
 0x1dc   : > { %v1424_v9 = vpop.f32.mrf.mxu0  ;;  %v4537_v40 = vsub.f32 %v1376_v15, %v1581_v4  ;;  %v4548_v1 = vsub.f32 %v1405_v42, %v1582_v54  ;;  %v4597_v4 = vsel %vm1739_vm12, %v1771_v27, %v4514_v7  ;;  %v4601_v54 = vmul.f32 %v4581_v2, %v4581_v2 }
 0x1dd   : > { %v1425_v30 = vadd.f32 %v1424_v9, %v4488_v26  ;;  %v4608_v44 = vmul.f32 %v4597_v4, %v4597_v4 }
 0x1de   : > { %vm1645_vm9 = vcmp.ge.f32.partialorder %v4537_v40, 0.0  ;;  %vm1646_vm10 = vcmp.ge.f32.partialorder %v4548_v1, 0.0  ;;  %v1859_v63 = vmul.f32 -15.094643, %v4601_v54 }
 0x1df   : > { %v1453_v14 = vpop.f32.mrf.mxu1  ;;  %v1527_v0 = vadd.f32 0.5, %v1425_v30  ;;  %v4565_v31 = vsel %vm1645_vm9, 0.5, %v6155_v32  ;;  %v1867_v28 = vmul.f32 -15.094643, %v4608_v44 }
 0x1e0   : > { %v1454_v11 = vadd.f32 %v1453_v14, %v4488_v26 }
 0x1e1   : > { %v1559_v3 = vfloor.f32 %v1527_v0 }
 0x1e2   : > { %v1528_v53 = vadd.f32 0.5, %v1454_v11 }
 0x1e3   : > { %v4573_v59 = vsub.f32 %v1425_v30, %v1559_v3  ;;  %v4588_v30 = vsel %vm1646_vm10, 0.5, %v6155_v32  ;;  %v4617_v3 = vsel %vm1740_vm13, %v1772_v49, %v4518_v24  ;;  %v1764_v24 = vsub.f32 %v1668_v58, %v4527_v33 }
 0x1e4   : > { %v1427_v21 = vpop.f32.mrf.mxu0  ;;  %v1560_v16 = vfloor.f32 %v1528_v53  ;;  %v1700_v53 = vand.u32 2147483647, %v4527_v33  ;;  %v4624_v48 = vmul.f32 %v4617_v3, %v4617_v3  ;;  %vm1629_vm13 = vcmp.ge.f32.partialorder %v4534_v5, 0.0 }
 0x1e5   : > { %v1428_v37 = vadd.f32 %v1427_v21, %v4492_v22 }
 0x1e6   : > { %v4590_v45 = vsub.f32 %v1454_v11, %v1560_v16  ;;  %vm4628_vm14 = vcmp.gt.f32.partialorder %v1700_v53, 0.25 }
 0x1e7   : > { %v1456_v8 = vpop.f32.mrf.mxu1  ;;  %v1535_v20 = vadd.f32 0.5, %v1428_v37 }
 0x1e8   : > { %v1457_v17 = vadd.f32 %v1456_v8, %v4492_v22 }
 0x1e9   : > { %v1567_v7 = vfloor.f32 %v1535_v20 }
 0x1ea   : > { %v1536_v50 = vadd.f32 0.5, %v1457_v17 }
 0x1ec   : > { %v1430_v56 = vpop.f32.mrf.mxu0  ;;  %v1568_v12 = vfloor.f32 %v1536_v50  ;;  %v4635_v50 = vsub.f32 %v1428_v37, %v1567_v7 }
 0x1ed   : > { %v1431_v51 = vadd.f32 %v1430_v56, %v4496_v61 }
 0x1ef   : > { %v1459_v34 = vpop.f32.mrf.mxu1  ;;  %v1543_v27 = vadd.f32 0.5, %v1431_v51 }
 0x1f0   : > { %v1482_v25 = vpop.f32.mrf.mxu2 }
 0x1f1   : > { %v1483_v47 = vadd.f32 %v1482_v25, %v4488_v26  ;;  %v1575_v11 = vfloor.f32 %v1543_v27 }
 0x1f3   : > { %v1511_v13 = vpop.f32.mrf.mxu3  ;;  %v1529_v14 = vadd.f32 0.5, %v1483_v47 }
 0x1f4   : > { %v4593_v39 = vadd.f32 %v1511_v13, %v4488_v26  ;;  %v1460_v26 = vadd.f32 %v1459_v34, %v4496_v61  ;;  %v1868_v34 = vmul.f32 -15.094643, %v4624_v48  ;;  %v1433_v15 = vpop.f32.mrf.mxu0 }
 0x1f5   : > { %v1561_v52 = vfloor.f32 %v1529_v14  ;;  %v1899_v14 = vadd.f32 42.058693, %v1867_v28  ;;  %v1891_v28 = vadd.f32 42.058693, %v1859_v63  ;;  %v1434_v42 = vadd.f32 %v1433_v15, %v4486_v18 }
 0x1f6   : > { %v4620_v8 = vadd.f32 0.5, %v4593_v39  ;;  %v1544_v25 = vadd.f32 0.5, %v1460_v26 }
 0x1f7   : > { %v4633_v49 = vsub.f32 %v1483_v47, %v1561_v52  ;;  %v1462_v58 = vpop.f32.mrf.mxu1  ;;  %v1900_v47 = vadd.f32 42.058693, %v1868_v34 }
 0x1f8   : > { %v1485_v0 = vpop.f32.mrf.mxu2  ;;  %v1463_v7 = vadd.f32 %v1462_v58, %v4486_v18 }
 0x1f9   : > { %v1486_v21 = vadd.f32 %v1485_v0, %v4492_v22  ;;  %v4638_v0 = vsub.f32 %v1457_v17, %v1568_v12  ;;  %v4647_v17 = vsel %vm4628_vm14, %v1764_v24, %v4527_v33  ;;  %v1932_v63 = vmul.f32 %v1900_v47, %v4624_v48 }
 0x1fa   : > { %v1552_v34 = vadd.f32 0.5, %v1463_v7  ;;  %v1923_v33 = vmul.f32 %v1891_v28, %v4601_v54  ;;  %v4663_v53 = vmul.f32 %v4647_v17, %v4647_v17 }
 0x1fb   : > { %v1514_v16 = vpop.f32.mrf.mxu3  ;;  %v1537_v56 = vadd.f32 0.5, %v1486_v21  ;;  %v1964_v36 = vadd.f32 -76.70586, %v1932_v63 }
 0x1fc   : > { %v1515_v13 = vadd.f32 %v1514_v16, %v4492_v22  ;;  %v1931_v22 = vmul.f32 %v1899_v14, %v4608_v44  ;;  %v1576_v16 = vfloor.f32 %v1544_v25  ;;  %v1551_v25 = vadd.f32 0.5, %v1434_v42 }
 0x1fd   : > { %v1569_v27 = vfloor.f32 %v1537_v56  ;;  %v4657_v14 = vsub.f32 %v1431_v51, %v1575_v11  ;;  %v1584_v9 = vfloor.f32 %v1552_v34  ;;  %v1955_v63 = vadd.f32 -76.70586, %v1923_v33 }
 0x1fe   : > { %v1538_v52 = vadd.f32 0.5, %v1515_v13  ;;  %v1963_v29 = vadd.f32 -76.70586, %v1931_v22  ;;  %v1583_v58 = vfloor.f32 %v1551_v25  ;;  %v4666_v51 = vsub.f32 %v1460_v26, %v1576_v16 }
 0x1ff   : > { %v4671_v6 = vsub.f32 %v1463_v7, %v1584_v9  ;;  %v4674_v32 = vsub.f32 %v1486_v21, %v1569_v27 }
 0x200   : > { %v1488_v37 = vpop.f32.mrf.mxu2  ;;  %v1995_v22 = vmul.f32 %v1963_v29, %v4608_v44  ;;  %v1570_v56 = vfloor.f32 %v1538_v52  ;;  %v4668_v10 = vsub.f32 %v1434_v42, %v1583_v58  ;;  %v1996_v29 = vmul.f32 %v1964_v36, %v4624_v48 }
 0x201   : > { %v1489_v15 = vadd.f32 %v1488_v37, %v4496_v61  ;;  %v1860_v52 = vmul.f32 -15.094643, %v4663_v53  ;;  %v6167_v42 = vmov -0.5   ;;  %vm1648_vm2 = vcmp.ge.f32.partialorder %v4671_v6, 0.0 }
 0x202   : > { %v2027_v47 = vadd.f32 81.60525, %v1995_v22  ;;  %vm1647_vm1 = vcmp.ge.f32.partialorder %v4668_v10, 0.0  ;;  %v4678_v26 = vsub.f32 %v1515_v13, %v1570_v56  ;;  %v1711_v21 = vand.u32 2147483647, %v4668_v10 }
 0x203   : > { %v1545_v20 = vadd.f32 0.5, %v1489_v15  ;;  %v1517_v24 = vpop.f32.mrf.mxu3  ;;  %v4681_v34 = vsel %vm1647_vm1, 0.5, %v6167_v42  ;;  %v1712_v27 = vand.u32 2147483647, %v4671_v6  ;;  %v4693_v33 = vsel %vm1648_vm2, 0.5, %v6167_v42 }
 0x204   : > { %v1518_v37 = vadd.f32 %v1517_v24, %v4496_v61  ;;  %v2059_v25 = vmul.f32 %v2027_v47, %v4608_v44  ;;  %v2028_v61 = vadd.f32 81.60525, %v1996_v29  ;;  %v1775_v13 = vsub.f32 %v4681_v34, %v4668_v10 }
 0x205   : > { %v1577_v11 = vfloor.f32 %v1545_v20  ;;  %v1892_v56 = vadd.f32 42.058693, %v1860_v52  ;;  %v6168_v47 = vsub.f32 %v4557_v38, %v4521_v23 }
 0x206   : > { %v1546_v28 = vadd.f32 0.5, %v1518_v37  ;;  %v2091_v20 = vadd.f32 -41.3417, %v2059_v25  ;;  %v2060_v24 = vmul.f32 %v2028_v61, %v4624_v48 }
 0x207   : > { %v4685_v7 = vsub.f32 %v1489_v15, %v1577_v11  ;;  %v1987_v15 = vmul.f32 %v1955_v63, %v4601_v54  ;;  %v4703_v11 = vsel %vm4651_vm0, %v6168_v47, %v4521_v23  ;;  %v1924_v52 = vmul.f32 %v1892_v56, %v4663_v53 }
 0x208   : > { %v1578_v16 = vfloor.f32 %v1546_v28  ;;  %v1491_v9 = vpop.f32.mrf.mxu2  ;;  %v2123_v25 = vmul.f32 %v2091_v20, %v4608_v44  ;;  %v2092_v61 = vadd.f32 -41.3417, %v2060_v24  ;;  %v4713_v38 = vmul.f32 %v4703_v11, %v4703_v11 }
 0x209   : > { %v1492_v22 = vadd.f32 %v1491_v9, %v4486_v18  ;;  %v2019_v63 = vadd.f32 81.60525, %v1987_v15  ;;  %v1956_v44 = vadd.f32 -76.70586, %v1924_v52  ;;  %v6170_v15 = vsub.f32 %v4562_v41, %v4523_v60 }
 0x20a   : > { %v4706_v29 = vsub.f32 %v1518_v37, %v1578_v16  ;;  %v2155_v23 = vadd.f32 6.2831855, %v2123_v25  ;;  %v2124_v47 = vmul.f32 %v2092_v61, %v4624_v48  ;;  %v6169_v37 = vand.u32 2147483647, %v4523_v60 }
 0x20b   : > { %v1553_v58 = vadd.f32 0.5, %v1492_v22  ;;  %v1520_v36 = vpop.f32.mrf.mxu3  ;;  %v1851_v20 = vmul.f32 -15.094643, %v4713_v38  ;;  %v1776_v48 = vsub.f32 %v4693_v33, %v4671_v6  ;;  %v1988_v25 = vmul.f32 %v1956_v44, %v4663_v53 }
 0x20c   : > { %v1521_v28 = vadd.f32 %v1520_v36, %v4486_v18  ;;  %vm1724_vm5 = vcmp.gt.f32.partialorder %v6169_v37, 0.25  ;;  %v2051_v18 = vmul.f32 %v2019_v63, %v4601_v54  ;;  %v2156_v36 = vadd.f32 6.2831855, %v2124_v47 }
 0x20d   : > { %v1585_v9 = vfloor.f32 %v1553_v58  ;;  %v2187_v58 = vmul.f32 %v2155_v23, %v4597_v4  ;;  %v4727_v56 = vsel %vm1724_vm5, %v6170_v15, %v4523_v60  ;;  %v1883_v63 = vadd.f32 42.058693, %v1851_v20 }
 0x20e   : > { %v1554_v12 = vadd.f32 0.5, %v1521_v28  ;;  %v2188_v4 = vmul.f32 %v2156_v36, %v4617_v3  ;;  %v2020_v52 = vadd.f32 81.60525, %v1988_v25  ;;  %v1652_v25 = vsel %vm1620_vm4, 0.5, %v6167_v42 }
 0x20f   : > { %v4718_v16 = vsub.f32 %v1492_v22, %v1585_v9  ;;  %v2083_v22 = vadd.f32 -41.3417, %v2051_v18  ;;  %2247 = vmatpush.msra.mxu0 %v2187_v58  ;;  %v1915_v3 = vmul.f32 %v1883_v63, %v4713_v38  ;;  %v1684_v63 = vand.u32 2147483647, %v4510_v62 }
 0x210   : > { %v1586_v24 = vfloor.f32 %v1554_v12  ;;  %v4743_v12 = vmul.f32 %v4727_v56, %v4727_v56  ;;  %2276 = vmatpush.msra.mxu1 %v2188_v4  ;;  %v2052_v37 = vmul.f32 %v2020_v52, %v4663_v53  ;;  %vm1630_vm0 = vcmp.ge.f32.partialorder %v4539_v46, 0.0 }
 0x211   : > { %vm1649_vm6 = vcmp.ge.f32.partialorder %v4718_v16, 0.0  ;;  %v2115_v41 = vmul.f32 %v2083_v22, %v4601_v54  ;;  %v1651_v54 = vsel %vm1619_vm3, 0.5, %v6167_v42  ;;  %v1947_v20 = vadd.f32 -76.70586, %v1915_v3 }
 0x212   : > { %v4734_v61 = vsel %vm1649_vm6, 0.5, %v6167_v42  ;;  %v4736_v9 = vsub.f32 %v1521_v28, %v1586_v24  ;;  %v1852_v18 = vmul.f32 -15.094643, %v4743_v12  ;;  %v1683_v24 = vand.u32 2147483647, %v4507_v19 }
 0x213   : > { %v2147_v47 = vadd.f32 6.2831855, %v2115_v41  ;;  %v1747_v58 = vsub.f32 %v1651_v54, %v4507_v19  ;;  %v2084_v15 = vadd.f32 -41.3417, %v2052_v37  ;;  %v1979_v4 = vmul.f32 %v1947_v20, %v4713_v38 }
 0x214   : > { %vm1650_vm9 = vcmp.ge.f32.partialorder %v4736_v9, 0.0  ;;  %v1884_v22 = vadd.f32 42.058693, %v1852_v18  ;;  %vm1715_vm10 = vcmp.gt.f32.partialorder %v1683_v24, 0.25  ;;  %v1748_v41 = vsub.f32 %v1652_v25, %v4510_v62 }
 0x215   : > { %v4758_v44 = vsel %vm1650_vm9, 0.5, %v6167_v42  ;;  %v2179_v36 = vmul.f32 %v2147_v47, %v4581_v2  ;;  %v2116_v52 = vmul.f32 %v2084_v15, %v4663_v53  ;;  %v4772_v2 = vsel %vm1715_vm10, %v1747_v58, %v4507_v19 }
 0x216   : > { %v1916_v3 = vmul.f32 %v1884_v22, %v4743_v12  ;;  %v6171_v54 = vand.u32 2147483647, %v4537_v40  ;;  %v2011_v47 = vadd.f32 81.60525, %v1979_v4  ;;  %v4778_v37 = vmul.f32 %v4772_v2, %v4772_v2 }
 0x217   : > { %2248 = vmatpush.msra.mxu0 %v2179_v36  ;;  %vm1716_vm12 = vcmp.gt.f32.partialorder %v1684_v63, 0.25  ;;  %v6172_v18 = vsub.f32 %v4565_v31, %v4537_v40  ;;  %v2148_v53 = vadd.f32 6.2831855, %v2116_v52  ;;  %v6174_v4 = vsub.f32 %v4588_v30, %v4548_v1 }
 0x218   : > { %vm1741_vm11 = vcmp.gt.f32.partialorder %v6171_v54, 0.25  ;;  %v1948_v24 = vadd.f32 -76.70586, %v1916_v3  ;;  %v4787_v19 = vsel %vm1716_vm12, %v1748_v41, %v4510_v62  ;;  %v2043_v36 = vmul.f32 %v2011_v47, %v4713_v38 }
 0x219   : > { %v4784_v20 = vsel %vm1741_vm11, %v6172_v18, %v4537_v40  ;;  %v1843_v15 = vmul.f32 -15.094643, %v4778_v37  ;;  %v4798_v31 = vmul.f32 %v4787_v19, %v4787_v19  ;;  %v6173_v40 = vand.u32 2147483647, %v4548_v1 }
 0x21a   : > { %v4791_v58 = vmul.f32 %v4784_v20, %v4784_v20  ;;  %v2180_v62 = vmul.f32 %v2148_v53, %v4647_v17  ;;  %v1980_v22 = vmul.f32 %v1948_v24, %v4743_v12  ;;  %v2075_v41 = vadd.f32 -41.3417, %v2043_v36 }
 0x21b   : > { %vm1742_vm14 = vcmp.gt.f32.partialorder %v6173_v40, 0.25  ;;  %v1875_v52 = vadd.f32 42.058693, %v1843_v15  ;;  %v1844_v3 = vmul.f32 -15.094643, %v4798_v31  ;;  %v1669_v18 = vsel %vm1637_vm7, 0.5, %v6167_v42 }
 0x21c   : > { %v1869_v25 = vmul.f32 -15.094643, %v4791_v58  ;;  %v4809_v63 = vsel %vm1742_vm14, %v6174_v4, %v4548_v1  ;;  %2277 = vmatpush.msra.mxu1 %v2180_v62  ;;  %v2012_v17 = vadd.f32 81.60525, %v1980_v22  ;;  %v1670_v1 = vsel %vm1638_vm8, 0.5, %v6167_v42 }
 0x21d   : > { %v4814_v54 = vmul.f32 %v4809_v63, %v4809_v63  ;;  %v2107_v30 = vmul.f32 %v2075_v41, %v4713_v38  ;;  %v1907_v53 = vmul.f32 %v1875_v52, %v4778_v37  ;;  %v1876_v24 = vadd.f32 42.058693, %v1844_v3 }
 0x21e   : > { %v1901_v47 = vadd.f32 42.058693, %v1869_v25  ;;  %v2044_v15 = vmul.f32 %v2012_v17, %v4743_v12  ;;  %v1701_v62 = vand.u32 2147483647, %v4541_v35  ;;  %v1765_v22 = vsub.f32 %v1669_v18, %v4541_v35 }
 0x21f   : > { %v1870_v36 = vmul.f32 -15.094643, %v4814_v54  ;;  %v2139_v25 = vadd.f32 6.2831855, %v2107_v30  ;;  %v1939_v4 = vadd.f32 -76.70586, %v1907_v53  ;;  %v1908_v28 = vmul.f32 %v1876_v24, %v4798_v31 }
 0x220   : > { %v1933_v40 = vmul.f32 %v1901_v47, %v4791_v58  ;;  %v2076_v41 = vadd.f32 -41.3417, %v2044_v15  ;;  %vm1733_vm1 = vcmp.gt.f32.partialorder %v1701_v62, 0.25  ;;  %v1766_v3 = vsub.f32 %v1670_v1, %v4545_v55 }
 0x221   : > { %v1902_v38 = vadd.f32 42.058693, %v1870_v36  ;;  %v2171_v17 = vmul.f32 %v2139_v25, %v4703_v11  ;;  %v1971_v47 = vmul.f32 %v1939_v4, %v4778_v37  ;;  %v1940_v23 = vadd.f32 -76.70586, %v1908_v28 }
 0x222   : > { %v1965_v52 = vadd.f32 -76.70586, %v1933_v40  ;;  %v2108_v18 = vmul.f32 %v2076_v41, %v4743_v12  ;;  %v4838_v53 = vsel %vm1733_vm1, %v1765_v22, %v4541_v35  ;;  %v1702_v24 = vand.u32 2147483647, %v4545_v55 }
 0x223   : > { %v1934_v60 = vmul.f32 %v1902_v38, %v4814_v54  ;;  %2249 = vmatpush.msra.mxu0 %v2171_v17  ;;  %v2003_v36 = vadd.f32 81.60525, %v1971_v47  ;;  %v1972_v1 = vmul.f32 %v1940_v23, %v4798_v31  ;;  %v4844_v11 = vmul.f32 %v4838_v53, %v4838_v53 }
 0x224   : > { %v1997_v30 = vmul.f32 %v1965_v52, %v4791_v58  ;;  %v2140_v28 = vadd.f32 6.2831855, %v2108_v18  ;;  %vm1734_vm2 = vcmp.gt.f32.partialorder %v1702_v24, 0.25  ;;  %v1661_v12 = vsel %vm1629_vm13, 0.5, %v6167_v42 }
 0x225   : > { %v1966_v15 = vadd.f32 -76.70586, %v1934_v60  ;;  %vm1621_vm3 = vcmp.ge.f32.partialorder %v4512_v57, 0.0  ;;  %vm1622_vm4 = vcmp.ge.f32.partialorder %v4516_v43, 0.0  ;;  %v2035_v35 = vmul.f32 %v2003_v36, %v4778_v37 }
 0x226   : > { %v2029_v40 = vadd.f32 81.60525, %v1997_v30  ;;  %v2004_v62 = vadd.f32 81.60525, %v1972_v1  ;;  %v1861_v23 = vmul.f32 -15.094643, %v4844_v11  ;;  %v2172_v22 = vmul.f32 %v2140_v28, %v4727_v56 }
 0x227   : > { %v1998_v60 = vmul.f32 %v1966_v15, %v4814_v54  ;;  %v4857_v4 = vsel %vm1734_vm2, %v1766_v3, %v4545_v55  ;;  %v1693_v38 = vand.u32 2147483647, %v4534_v5  ;;  %v2067_v41 = vadd.f32 -41.3417, %v2035_v35 }
 0x228   : > { %v2061_v25 = vmul.f32 %v2029_v40, %v4791_v58  ;;  %v2036_v52 = vmul.f32 %v2004_v62, %v4798_v31  ;;  %v1893_v47 = vadd.f32 42.058693, %v1861_v23  ;;  %2278 = vmatpush.msra.mxu1 %v2172_v22  ;;  %v4863_v30 = vmul.f32 %v4857_v4, %v4857_v4 }
 0x229   : > { %v2030_v17 = vadd.f32 81.60525, %v1998_v60  ;;  %vm1725_vm5 = vcmp.gt.f32.partialorder %v1693_v38, 0.25  ;;  %v1757_v56 = vsub.f32 %v1661_v12, %v4534_v5  ;;  %v2099_v24 = vmul.f32 %v2067_v41, %v4778_v37 }
 0x22a   : > { %v2093_v18 = vadd.f32 -41.3417, %v2061_v25  ;;  %v2068_v55 = vadd.f32 -41.3417, %v2036_v52  ;;  %v1925_v36 = vmul.f32 %v1893_v47, %v4844_v11  ;;  %v1862_v15 = vmul.f32 -15.094643, %v4863_v30 }
 0x22b   : > { %v2062_v3 = vmul.f32 %v2030_v17, %v4814_v54  ;;  %v4872_v28 = vsel %vm1725_vm5, %v1757_v56, %v4534_v5  ;;  %v1662_v40 = vsel %vm1630_vm0, 0.5, %v6167_v42  ;;  %v2131_v35 = vadd.f32 6.2831855, %v2099_v24 }
 0x22c   : > { %v2125_v1 = vmul.f32 %v2093_v18, %v4791_v58  ;;  %v2100_v12 = vmul.f32 %v2068_v55, %v4798_v31  ;;  %v1957_v62 = vadd.f32 -76.70586, %v1925_v36  ;;  %vm1631_vm6 = vcmp.ge.f32.partialorder %v4635_v50, 0.0  ;;  %v4889_v31 = vld [vmem:[%s6150_s5] sm:$0xff] }
 0x22d   : > { %v2094_v37 = vadd.f32 -41.3417, %v2062_v3  ;;  %v1894_v23 = vadd.f32 42.058693, %v1862_v15  ;;  %v4881_v58 = vmul.f32 %v4872_v28, %v4872_v28  ;;  %v1694_v5 = vand.u32 2147483647, %v4539_v46 }
 0x22e   : > { %v2157_v60 = vadd.f32 6.2831855, %v2125_v1  ;;  %v2163_v22 = vmul.f32 %v2131_v35, %v4772_v2  ;;  %v2132_v25 = vadd.f32 6.2831855, %v2100_v12  ;;  %v1989_v41 = vmul.f32 %v1957_v62, %v4844_v11 }
 0x22f   : > { %v2126_v38 = vmul.f32 %v2094_v37, %v4814_v54  ;;  %v1926_v17 = vmul.f32 %v1894_v23, %v4863_v30  ;;  %v1853_v47 = vmul.f32 -15.094643, %v4881_v58  ;;  %vm4895_vm7 = vcmp.gt.f32.partialorder %v1694_v5, 0.25 }
 0x230   : > { %v2189_v52 = vmul.f32 %v2157_v60, %v4784_v20  ;;  %vm1632_vm8 = vcmp.ge.f32.partialorder %v4638_v0, 0.0  ;;  %2250 = vmatpush.msra.mxu0 %v2163_v22  ;;  %v2164_v2 = vmul.f32 %v2132_v25, %v4787_v19  ;;  %v2021_v56 = vadd.f32 81.60525, %v1989_v41 }
 0x231   : > { %v2158_v54 = vadd.f32 6.2831855, %v2126_v38  ;;  %v1758_v24 = vsub.f32 %v1662_v40, %v4539_v46  ;;  %3449 = vmatmul.msk.f32.vlgmr.msra.gmra.mxu0 %vm1278_vm15, %v4889_v31  ;;  %v1958_v20 = vadd.f32 -76.70586, %v1926_v17  ;;  %v1885_v55 = vadd.f32 42.058693, %v1853_v47 }
 0x232   : > { %2305 = vmatpush.msra.mxu2 %v2189_v52  ;;  %v1653_v3 = vsel %vm1621_vm3, 0.5, %v6167_v42  ;;  %v1654_v36 = vsel %vm1622_vm4, 0.5, %v6167_v42  ;;  %2279 = vmatpush.msra.mxu1 %v2164_v2  ;;  %v2053_v1 = vmul.f32 %v2021_v56, %v4844_v11  ;;  %v1685_v40 = vand.u32 2147483647, %v4512_v57  ;;  %v4942_v52 = vld [vmem:[%s6150_s5 + $0x8] sm:$0xff] }
 0x233   : > { %v2190_v19 = vmul.f32 %v2158_v54, %v4809_v63  ;;  %v4915_v15 = vsel %vm4895_vm7, %v1758_v24, %v4539_v46  ;;  %3453 = vmatmul.msk.f32.vlgmr.msra.gmra.mxu1 %vm1278_vm15, %v4889_v31  ;;  %v1990_v35 = vmul.f32 %v1958_v20, %v4863_v30  ;;  %v1917_v12 = vmul.f32 %v1885_v55, %v4881_v58 }
 0x234   : > { %v4924_v37 = vmul.f32 %v4915_v15, %v4915_v15  ;;  %v1749_v63 = vsub.f32 %v1653_v3, %v4512_v57  ;;  %vm1639_vm9 = vcmp.ge.f32.partialorder %v4657_v14, 0.0  ;;  %v2085_v46 = vadd.f32 -41.3417, %v2053_v1 }
 0x235   : > { %2334 = vmatpush.msra.mxu3 %v2190_v19  ;;  %vm1717_vm10 = vcmp.gt.f32.partialorder %v1685_v40, 0.25  ;;  %v1686_v62 = vand.u32 2147483647, %v4516_v43  ;;  %v1750_v60 = vsub.f32 %v1654_v36, %v4516_v43  ;;  %v2022_v23 = vadd.f32 81.60525, %v1990_v35 }
 0x236   : > { %v1949_v5 = vadd.f32 -76.70586, %v1917_v12  ;;  %v1854_v22 = vmul.f32 -15.094643, %v4924_v37  ;;  %v4932_v25 = vsel %vm1717_vm10, %v1749_v63, %v4512_v57  ;;  %v2117_v38 = vmul.f32 %v2085_v46, %v4844_v11 }
 0x237   : > { %v4937_v41 = vmul.f32 %v4932_v25, %v4932_v25  ;;  %vm1718_vm11 = vcmp.gt.f32.partialorder %v1686_v62, 0.25  ;;  %v1695_v17 = vand.u32 2147483647, %v4635_v50  ;;  %v2054_v47 = vmul.f32 %v2022_v23, %v4863_v30 }
 0x238   : > { %v1981_v18 = vmul.f32 %v1949_v5, %v4881_v58  ;;  %v1886_v57 = vadd.f32 42.058693, %v1854_v22  ;;  %v4948_v2 = vsel %vm1718_vm11, %v1750_v60, %v4516_v43  ;;  %v2149_v11 = vadd.f32 6.2831855, %v2117_v38  ;;  %v4983_v22 = vld [vmem:[%s6150_s5 + $0x10] sm:$0xff] }
 0x239   : > { %v1845_v54 = vmul.f32 -15.094643, %v4937_v41  ;;  %v4953_v56 = vmul.f32 %v4948_v2, %v4948_v2  ;;  %v1663_v24 = vsel %vm1631_vm6, 0.5, %v6167_v42  ;;  %vm1640_vm12 = vcmp.ge.f32.partialorder %v4666_v51, 0.0  ;;  %3450 = vmatmul.msk.f32.gmra.mxu0 %vm1278_vm15, %v4942_v52 }
 0x23a   : > { %v2086_v20 = vadd.f32 -41.3417, %v2054_v47  ;;  %v2013_v55 = vadd.f32 81.60525, %v1981_v18  ;;  %v1918_v3 = vmul.f32 %v1886_v57, %v4924_v37  ;;  %vm1727_vm13 = vcmp.gt.f32.partialorder %v1695_v17, 0.25 }
 0x23b   : > { %v2181_v43 = vmul.f32 %v2149_v11, %v4838_v53  ;;  %v1877_v36 = vadd.f32 42.058693, %v1845_v54  ;;  %v1846_v19 = vmul.f32 -15.094643, %v4953_v56  ;;  %v1759_v1 = vsub.f32 %v1663_v24, %v4635_v50  ;;  %3454 = vmatmul.msk.f32.gmra.mxu1 %vm1278_vm15, %v4942_v52 }
 0x23c   : > { %v2118_v40 = vmul.f32 %v2086_v20, %v4863_v30  ;;  %v2045_v35 = vmul.f32 %v2013_v55, %v4881_v58  ;;  %v1950_v12 = vadd.f32 -76.70586, %v1918_v3  ;;  %v4972_v63 = vsel %vm1632_vm8, 0.5, %v6167_v42 }
 0x23d   : > { %2306 = vmatpush.msra.mxu2 %v2181_v43  ;;  %v1909_v53 = vmul.f32 %v1877_v36, %v4937_v41  ;;  %v1878_v46 = vadd.f32 42.058693, %v1846_v19  ;;  %v4976_v62 = vsel %vm1727_vm13, %v1759_v1, %v4635_v50  ;;  %v1696_v30 = vand.u32 2147483647, %v4638_v0 }
 0x23e   : > { %v2150_v60 = vadd.f32 6.2831855, %v2118_v40  ;;  %v2077_v23 = vadd.f32 -41.3417, %v2045_v35  ;;  %v1982_v5 = vmul.f32 %v1950_v12, %v4924_v37  ;;  %v4987_v38 = vmul.f32 %v4976_v62, %v4976_v62 }
 0x23f   : > { %v1941_v17 = vadd.f32 -76.70586, %v1909_v53  ;;  %v1910_v47 = vmul.f32 %v1878_v46, %v4953_v56  ;;  %v1703_v50 = vand.u32 2147483647, %v4657_v14  ;;  %v1704_v18 = vand.u32 2147483647, %v4666_v51 }
 0x240   : > { %v2182_v57 = vmul.f32 %v2150_v60, %v4857_v4  ;;  %v2109_v11 = vmul.f32 %v2077_v23, %v4881_v58  ;;  %v2014_v54 = vadd.f32 81.60525, %v1982_v5  ;;  %v1671_v24 = vsel %vm1639_vm9, 0.5, %v6167_v42  ;;  %v5055_v60 = vld [vmem:[%s6150_s5 + $0x18] sm:$0xff] }
 0x241   : > { %v1973_v20 = vmul.f32 %v1941_v17, %v4937_v41  ;;  %v1942_v55 = vadd.f32 -76.70586, %v1910_v47  ;;  %vm4998_vm14 = vcmp.gt.f32.partialorder %v1703_v50, 0.25  ;;  %v1767_v43 = vsub.f32 %v1671_v24, %v4657_v14  ;;  %3451 = vmatmul.msk.f32.gmra.mxu0 %vm1278_vm15, %v4983_v22 }
 0x242   : > { %2335 = vmatpush.msra.mxu3 %v2182_v57  ;;  %v2141_v36 = vadd.f32 6.2831855, %v2109_v11  ;;  %v2046_v4 = vmul.f32 %v2014_v54, %v4924_v37  ;;  %vm1743_vm0 = vcmp.gt.f32.partialorder %v1711_v21, 0.25  ;;  %vm1744_vm1 = vcmp.gt.f32.partialorder %v1712_v27, 0.25 }
 0x243   : > { %v2005_v58 = vadd.f32 81.60525, %v1973_v20  ;;  %v1974_v19 = vmul.f32 %v1942_v55, %v4953_v56  ;;  %v5015_v1 = vsel %vm1743_vm0, %v1775_v13, %v4668_v10  ;;  %v5021_v40 = vsel %vm1744_vm1, %v1776_v48, %v4671_v6  ;;  %3455 = vmatmul.msk.f32.gmra.mxu1 %vm1278_vm15, %v4983_v22 }
 0x244   : > { %v2173_v21 = vmul.f32 %v2141_v36, %v4872_v28  ;;  %v2078_v35 = vadd.f32 -41.3417, %v2046_v4  ;;  %v5028_v27 = vmul.f32 %v5015_v1, %v5015_v1  ;;  %v5032_v10 = vmul.f32 %v5021_v40, %v5021_v40 }
 0x245   : > { %v2037_v34 = vmul.f32 %v2005_v58, %v4937_v41  ;;  %v2006_v13 = vadd.f32 81.60525, %v1974_v19  ;;  %v5038_v6 = vsel %vm4998_vm14, %v1767_v43, %v4657_v14  ;;  %v1672_v33 = vsel %vm1640_vm12, 0.5, %v6167_v42 }
 0x246   : > { %vm1623_vm2 = vcmp.ge.f32.partialorder %v4573_v59, 0.0  ;;  %2307 = vmatpush.msra.mxu2 %v2173_v21  ;;  %v2110_v48 = vmul.f32 %v2078_v35, %v4924_v37  ;;  %v1871_v28 = vmul.f32 -15.094643, %v5028_v27  ;;  %v1872_v12 = vmul.f32 -15.094643, %v5032_v10 }
 0x247   : > { %v5049_v53 = vmul.f32 %v5038_v6, %v5038_v6  ;;  %v2069_v46 = vadd.f32 -41.3417, %v2037_v34  ;;  %v2038_v14 = vmul.f32 %v2006_v13, %v4953_v56  ;;  %vm1736_vm3 = vcmp.gt.f32.partialorder %v1704_v18, 0.25 }
 0x248   : > { %v1768_v23 = vsub.f32 %v1672_v33, %v4666_v51  ;;  %v2142_v37 = vadd.f32 6.2831855, %v2110_v48  ;;  %v1903_v5 = vadd.f32 42.058693, %v1871_v28  ;;  %v1904_v17 = vadd.f32 42.058693, %v1872_v12 }
 0x249   : > { %v1760_v47 = vsub.f32 %v4972_v63, %v4638_v0  ;;  %v2101_v50 = vmul.f32 %v2069_v46, %v4937_v41  ;;  %v2070_v57 = vadd.f32 -41.3417, %v2038_v14  ;;  %v1863_v11 = vmul.f32 -15.094643, %v5049_v53  ;;  %3452 = vmatmul.msk.f32.gmra.mxu0 %vm1278_vm15, %v5055_v60 }
 0x24a   : > { %v5063_v54 = vsel %vm1736_vm3, %v1768_v23, %v4666_v51  ;;  %vm1624_vm4 = vcmp.ge.f32.partialorder %v4590_v45, 0.0  ;;  %v2174_v18 = vmul.f32 %v2142_v37, %v4915_v15  ;;  %v1935_v24 = vmul.f32 %v1903_v5, %v5028_v27 }
 0x24b   : > { %v1936_v20 = vmul.f32 %v1904_v17, %v5032_v10  ;;  %v5073_v41 = vmul.f32 %v5063_v54, %v5063_v54  ;;  %v2133_v63 = vadd.f32 6.2831855, %v2101_v50  ;;  %v2102_v55 = vmul.f32 %v2070_v57, %v4953_v56  ;;  %3456 = vmatmul.msk.f32.gmra.mxu1 %vm1278_vm15, %v5055_v60 }
 0x24c   : > { %v1895_v51 = vadd.f32 42.058693, %v1863_v11  ;;  %v1855_v3 = vmul.f32 -15.094643, %v4987_v38  ;;  %v1778_v15 = vsub.f32 %v4758_v44, %v4736_v9  ;;  %2336 = vmatpush.msra.mxu3 %v2174_v18  ;;  %v1967_v43 = vadd.f32 -76.70586, %v1935_v24 }
 0x24d   : > { %v1968_v36 = vadd.f32 -76.70586, %v1936_v20  ;;  %v1864_v4 = vmul.f32 -15.094643, %v5073_v41  ;;  %v2165_v58 = vmul.f32 %v2133_v63, %v4932_v25  ;;  %v2134_v19 = vadd.f32 6.2831855, %v2102_v55 }
 0x24e   : > { %v1927_v21 = vmul.f32 %v1895_v51, %v5049_v53  ;;  %v1887_v56 = vadd.f32 42.058693, %v1855_v3  ;;  %v1999_v35 = vmul.f32 %v1967_v43, %v5028_v27  ;;  %vm1728_vm5 = vcmp.gt.f32.partialorder %v1696_v30, 0.25 }
 0x24f   : > { %v2000_v34 = vmul.f32 %v1968_v36, %v5032_v10  ;;  %v1896_v13 = vadd.f32 42.058693, %v1864_v4  ;;  %2308 = vmatpush.msra.mxu2 %v2165_v58  ;;  %v2166_v33 = vmul.f32 %v2134_v19, %v4948_v2  ;;  %v5091_v25 = vsel %vm1728_vm5, %v1760_v47, %v4638_v0 }
 0x250   : > { %v1959_v48 = vadd.f32 -76.70586, %v1927_v21  ;;  %v1919_v28 = vmul.f32 %v1887_v56, %v4987_v38  ;;  %3457 = vmatmul.msk.f32.vlgmr.msra.gmra.mxu2 %vm1278_vm15, %v4889_v31  ;;  %v2031_v12 = vadd.f32 81.60525, %v1999_v35  ;;  %v5098_v23 = vmul.f32 %v5091_v25, %v5091_v25 }
 0x251   : > { %v2032_v46 = vadd.f32 81.60525, %v2000_v34  ;;  %v1928_v14 = vmul.f32 %v1896_v13, %v5073_v41  ;;  %2337 = vmatpush.msra.mxu3 %v2166_v33  ;;  %v1655_v0 = vsel %vm1623_vm2, 0.5, %v6167_v42  ;;  %v1687_v37 = vand.u32 2147483647, %v4573_v59 }
 0x252   : > { %v1991_v2 = vmul.f32 %v1959_v48, %v5049_v53  ;;  %v1951_v30 = vadd.f32 -76.70586, %v1919_v28  ;;  %3461 = vmatmul.msk.f32.vlgmr.msra.gmra.mxu3 %vm1278_vm15, %v4889_v31  ;;  %v2063_v5 = vmul.f32 %v2031_v12, %v5028_v27  ;;  %v1856_v50 = vmul.f32 -15.094643, %v5098_v23 }
 0x253   : > { %v2064_v17 = vmul.f32 %v2032_v46, %v5032_v10  ;;  %v1960_v47 = vadd.f32 -76.70586, %v1928_v14  ;;  %vm1719_vm6 = vcmp.gt.f32.partialorder %v1687_v37, 0.25  ;;  %v1751_v18 = vsub.f32 %v1655_v0, %v4573_v59 }
 0x254   : > { %v2023_v57 = vadd.f32 81.60525, %v1991_v2  ;;  %v1983_v11 = vmul.f32 %v1951_v30, %v4987_v38  ;;  %v2095_v24 = vadd.f32 -41.3417, %v2063_v5  ;;  %v1888_v55 = vadd.f32 42.058693, %v1856_v50 }
 0x255   : > { %v2096_v20 = vadd.f32 -41.3417, %v2064_v17  ;;  %v1992_v63 = vmul.f32 %v1960_v47, %v5073_v41  ;;  %v5115_v43 = vsel %vm1719_vm6, %v1751_v18, %v4573_v59  ;;  %v1656_v36 = vsel %vm1624_vm4, 0.5, %v6167_v42 }
 0x256   : > { %v2055_v51 = vmul.f32 %v2023_v57, %v5049_v53  ;;  %v2015_v3 = vadd.f32 81.60525, %v1983_v11  ;;  %vm1641_vm7 = vcmp.ge.f32.partialorder %v4685_v7, 0.0  ;;  %v2127_v4 = vmul.f32 %v2095_v24, %v5028_v27 }
 0x257   : > { %v2128_v58 = vmul.f32 %v2096_v20, %v5032_v10  ;;  %v2024_v19 = vadd.f32 81.60525, %v1992_v63  ;;  %v1920_v21 = vmul.f32 %v1888_v55, %v5098_v23  ;;  %v5127_v59 = vmul.f32 %v5115_v43, %v5115_v43 }
 0x258   : > { %v2087_v56 = vadd.f32 -41.3417, %v2055_v51  ;;  %v2047_v35 = vmul.f32 %v2015_v3, %v4987_v38  ;;  %v1688_v34 = vand.u32 2147483647, %v4590_v45  ;;  %vm1642_vm8 = vcmp.ge.f32.partialorder %v4706_v29, 0.0  ;;  %3458 = vmatmul.msk.f32.gmra.mxu2 %vm1278_vm15, %v4942_v52 }
 0x259   : > { %v2159_v27 = vadd.f32 6.2831855, %v2127_v4  ;;  %v2160_v13 = vadd.f32 6.2831855, %v2128_v58  ;;  %v2056_v10 = vmul.f32 %v2024_v19, %v5073_v41  ;;  %v1952_v33 = vadd.f32 -76.70586, %v1920_v21 }
 0x25a   : > { %v2119_v48 = vmul.f32 %v2087_v56, %v5049_v53  ;;  %v2079_v28 = vadd.f32 -41.3417, %v2047_v35  ;;  %v1847_v12 = vmul.f32 -15.094643, %v5127_v59  ;;  %vm5136_vm9 = vcmp.gt.f32.partialorder %v1688_v34, 0.25  ;;  %3462 = vmatmul.msk.f32.gmra.mxu3 %vm1278_vm15, %v4942_v52 }
 0x25b   : > { %v2191_v14 = vmul.f32 %v2159_v27, %v5015_v1  ;;  %v2192_v2 = vmul.f32 %v2160_v13, %v5021_v40  ;;  %v2088_v30 = vadd.f32 -41.3417, %v2056_v10  ;;  %v1984_v0 = vmul.f32 %v1952_v33, %v5098_v23 }
 0x25c   : > { %v2151_v37 = vadd.f32 6.2831855, %v2119_v48  ;;  %v2111_v53 = vmul.f32 %v2079_v28, %v4987_v38  ;;  %v1879_v5 = vadd.f32 42.058693, %v1847_v12  ;;  %v1752_v17 = vsub.f32 %v1656_v36, %v4590_v45 }
 0x25d   : > { %2363 = vmatpush.msrb.mxu0 %v2191_v14  ;;  %2392 = vmatpush.msrb.mxu1 %v2192_v2  ;;  %v2120_v47 = vmul.f32 %v2088_v30, %v5073_v41  ;;  %v2016_v50 = vadd.f32 81.60525, %v1984_v0  ;;  %v6181_v57 = vand.u32 2147483647, %v4718_v16  ;;  %v6182_v1 = vand.u32 2147483647, %v4736_v9 }
 0x25e   : > { %vm1633_vm12 = vcmp.ge.f32.partialorder %v4674_v32, 0.0  ;;  %v2183_v40 = vmul.f32 %v2151_v37, %v5038_v6  ;;  %v2143_v11 = vadd.f32 6.2831855, %v2111_v53  ;;  %v1911_v38 = vmul.f32 %v1879_v5, %v5127_v59 }
 0x25f   : > { %vm1745_vm10 = vcmp.gt.f32.partialorder %v6181_v57, 0.25  ;;  %vm1746_vm11 = vcmp.gt.f32.partialorder %v6182_v1, 0.25  ;;  %v5158_v18 = vsel %vm5136_vm9, %v1752_v17, %v4590_v45  ;;  %v2152_v41 = vadd.f32 6.2831855, %v2120_v47 }
 0x260   : > { %v2048_v24 = vmul.f32 %v2016_v50, %v5098_v23  ;;  %v5163_v20 = vmul.f32 %v5158_v18, %v5158_v18  ;;  %v6183_v63 = vsub.f32 %v4734_v61, %v4718_v16  ;;  %2364 = vmatpush.msrb.mxu0 %v2183_v40  ;;  %v2175_v55 = vmul.f32 %v2143_v11, %v4976_v62 }
 0x261   : > { %v1943_v51 = vadd.f32 -76.70586, %v1911_v38  ;;  %v5180_v3 = vsel %vm1746_vm11, %v1778_v15, %v4736_v9  ;;  %3459 = vmatmul.msk.f32.gmra.mxu2 %vm1278_vm15, %v4983_v22  ;;  %v1673_v9 = vsel %vm1641_vm7, 0.5, %v6167_v42  ;;  %v1705_v44 = vand.u32 2147483647, %v4685_v7 }
 0x262   : > { %v5169_v6 = vsel %vm1745_vm10, %v6183_v63, %v4718_v16  ;;  %v2184_v16 = vmul.f32 %v2152_v41, %v5063_v54  ;;  %v2080_v61 = vadd.f32 -41.3417, %v2048_v24  ;;  %v1848_v36 = vmul.f32 -15.094643, %v5163_v20  ;;  %2365 = vmatpush.msrb.mxu0 %v2175_v55  ;;  %3463 = vmatmul.msk.f32.gmra.mxu3 %vm1278_vm15, %v4983_v22 }
 0x263   : > { %v5174_v45 = vmul.f32 %v5169_v6, %v5169_v6  ;;  %v5188_v62 = vmul.f32 %v5180_v3, %v5180_v3  ;;  %v1975_v4 = vmul.f32 %v1943_v51, %v5127_v59  ;;  %v1769_v21 = vsub.f32 %v1673_v9, %v4685_v7 }
 0x264   : > { %2393 = vmatpush.msrb.mxu1 %v2184_v16  ;;  %v2112_v54 = vmul.f32 %v2080_v61, %v5098_v23  ;;  %v1880_v15 = vadd.f32 42.058693, %v1848_v36  ;;  %vm1737_vm13 = vcmp.gt.f32.partialorder %v1705_v44, 0.25  ;;  %v1674_v34 = vsel %vm1642_vm8, 0.5, %v6167_v42 }
 0x265   : > { %v1873_v58 = vmul.f32 -15.094643, %v5174_v45  ;;  %v1874_v19 = vmul.f32 -15.094643, %v5188_v62  ;;  %v2007_v56 = vadd.f32 81.60525, %v1975_v4  ;;  %v5207_v23 = vsel %vm1737_vm13, %v1769_v21, %v4685_v7 }
 0x266   : > { %vm1634_vm14 = vcmp.ge.f32.partialorder %v4678_v26, 0.0  ;;  %v2144_v27 = vadd.f32 6.2831855, %v2112_v54  ;;  %v1912_v13 = vmul.f32 %v1880_v15, %v5163_v20  ;;  %v5213_v28 = vmul.f32 %v5207_v23, %v5207_v23 }
 0x267   : > { %v1905_v35 = vadd.f32 42.058693, %v1873_v58  ;;  %v1906_v10 = vadd.f32 42.058693, %v1874_v19  ;;  %v2039_v33 = vmul.f32 %v2007_v56, %v5127_v59  ;;  %v1706_v12 = vand.u32 2147483647, %v4706_v29 }
 0x268   : > { %v2176_v46 = vmul.f32 %v2144_v27, %v5091_v25  ;;  %v1944_v14 = vadd.f32 -76.70586, %v1912_v13  ;;  %v1770_v30 = vsub.f32 %v1674_v34, %v4706_v29  ;;  %v6184_v7 = vfloor.f32 %v4620_v8 }
 0x269   : > { %v1937_v48 = vmul.f32 %v1905_v35, %v5174_v45  ;;  %v1938_v2 = vmul.f32 %v1906_v10, %v5188_v62  ;;  %v2071_v37 = vadd.f32 -41.3417, %v2039_v33  ;;  %v1865_v5 = vmul.f32 -15.094643, %v5213_v28  ;;  %3460 = vmatmul.msk.f32.gmra.mxu2 %vm1278_vm15, %v5055_v60 }
 0x26a   : > { %v5222_v0 = vsub.f32 %v4593_v39, %v6184_v7  ;;  %vm1625_vm0 = vcmp.ge.f32.partialorder %v4633_v49, 0.0  ;;  %2394 = vmatpush.msrb.mxu1 %v2176_v46  ;;  %v1976_v25 = vmul.f32 %v1944_v14, %v5163_v20  ;;  %vm1738_vm1 = vcmp.gt.f32.partialorder %v1706_v12, 0.25  ;;  %3464 = vmatmul.msk.f32.gmra.mxu3 %vm1278_vm15, %v5055_v60 }
 0x26b   : > { %v1969_v53 = vadd.f32 -76.70586, %v1937_v48  ;;  %v1970_v17 = vadd.f32 -76.70586, %v1938_v2  ;;  %v1665_v8 = vsel %vm1633_vm12, 0.5, %v6167_v42  ;;  %v2103_v39 = vmul.f32 %v2071_v37, %v5127_v59 }
 0x26c   : > { %v1897_v50 = vadd.f32 42.058693, %v1865_v5  ;;  %v5235_v57 = vsel %vm1738_vm1, %v1770_v30, %v4706_v29  ;;  %v2008_v1 = vadd.f32 81.60525, %v1976_v25  ;;  %v1697_v38 = vand.u32 2147483647, %v4674_v32 }
 0x26d   : > { %v2001_v47 = vmul.f32 %v1969_v53, %v5174_v45  ;;  %v2002_v40 = vmul.f32 %v1970_v17, %v5188_v62  ;;  %v5242_v11 = vmul.f32 %v5235_v57, %v5235_v57  ;;  %v2135_v41 = vadd.f32 6.2831855, %v2103_v39 }
 0x26e   : > { %v1929_v24 = vmul.f32 %v1897_v50, %v5213_v28  ;;  %v1761_v63 = vsub.f32 %v1665_v8, %v4674_v32  ;;  %vm1626_vm2 = vcmp.ge.f32.partialorder %v5222_v0, 0.0  ;;  %v2040_v29 = vmul.f32 %v2008_v1, %v5163_v20 }
 0x26f   : > { %v2033_v59 = vadd.f32 81.60525, %v2001_v47  ;;  %v2034_v55 = vadd.f32 81.60525, %v2002_v40  ;;  %v1866_v51 = vmul.f32 -15.094643, %v5242_v11  ;;  %v2167_v16 = vmul.f32 %v2135_v41, %v5115_v43 }
 0x270   : > { %vm1729_vm3 = vcmp.gt.f32.partialorder %v1697_v38, 0.25  ;;  %v1961_v36 = vadd.f32 -76.70586, %v1929_v24  ;;  %v2072_v58 = vadd.f32 -41.3417, %v2040_v29  ;;  %v1666_v43 = vsel %vm1634_vm14, 0.5, %v6167_v42 }
 0x271   : > { %v2065_v61 = vmul.f32 %v2033_v59, %v5174_v45  ;;  %v5253_v4 = vsel %vm1729_vm3, %v1761_v63, %v4674_v32  ;;  %v2066_v9 = vmul.f32 %v2034_v55, %v5188_v62  ;;  %v1898_v44 = vadd.f32 42.058693, %v1866_v51  ;;  %2366 = vmatpush.msrb.mxu0 %v2167_v16 }
 0x272   : > { %v5258_v54 = vmul.f32 %v5253_v4, %v5253_v4  ;;  %v1993_v19 = vmul.f32 %v1961_v36, %v5213_v28  ;;  %v1698_v21 = vand.u32 2147483647, %v4678_v26  ;;  %v2104_v32 = vmul.f32 %v2072_v58, %v5163_v20  ;;  %3465 = vmatmul.msk.f32.vlgmr.msrb.gmra.mxu0 %vm1278_vm15, %v4889_v31 }
 0x273   : > { %v2097_v15 = vadd.f32 -41.3417, %v2065_v61  ;;  %v2098_v56 = vadd.f32 -41.3417, %v2066_v9  ;;  %v1930_v35 = vmul.f32 %v1898_v44, %v5242_v11  ;;  %v1762_v10 = vsub.f32 %v1666_v43, %v4678_v26 }
 0x274   : > { %v1857_v34 = vmul.f32 -15.094643, %v5258_v54  ;;  %v2025_v13 = vadd.f32 81.60525, %v1993_v19  ;;  %vm1730_vm4 = vcmp.gt.f32.partialorder %v1698_v21, 0.25  ;;  %v1657_v30 = vsel %vm1625_vm0, 0.5, %v6167_v42 }
 0x275   : > { %v2129_v27 = vmul.f32 %v2097_v15, %v5174_v45  ;;  %v2136_v33 = vadd.f32 6.2831855, %v2104_v32  ;;  %v2130_v48 = vmul.f32 %v2098_v56, %v5188_v62  ;;  %v1962_v12 = vadd.f32 -76.70586, %v1930_v35 }
 0x276   : > { %v1889_v46 = vadd.f32 42.058693, %v1857_v34  ;;  %v2057_v14 = vmul.f32 %v2025_v13, %v5213_v28  ;;  %v5275_v2 = vsel %vm1730_vm4, %v1762_v10, %v4678_v26  ;;  %v1689_v26 = vand.u32 2147483647, %v4633_v49 }
 0x277   : > { %v2161_v20 = vadd.f32 6.2831855, %v2129_v27  ;;  %v2168_v45 = vmul.f32 %v2136_v33, %v5158_v18  ;;  %v2162_v7 = vadd.f32 6.2831855, %v2130_v48  ;;  %v1994_v37 = vmul.f32 %v1962_v12, %v5242_v11 }
 0x278   : > { %v1921_v53 = vmul.f32 %v1889_v46, %v5258_v54  ;;  %v2089_v5 = vadd.f32 -41.3417, %v2057_v14  ;;  %v1826_v25 = vmul.f32 %v5275_v2, %v5275_v2  ;;  %v1753_v18 = vsub.f32 %v1657_v30, %v4633_v49 }
 0x279   : > { %v2193_v62 = vmul.f32 %v2161_v20, %v5169_v6  ;;  %2395 = vmatpush.msrb.mxu1 %v2168_v45  ;;  %v2194_v17 = vmul.f32 %v2162_v7, %v5180_v3  ;;  %v2026_v8 = vadd.f32 81.60525, %v1994_v37  ;;  %vm1721_vm5 = vcmp.gt.f32.partialorder %v1689_v26, 0.25 }
 0x27a   : > { %v1953_v39 = vadd.f32 -76.70586, %v1921_v53  ;;  %3469 = vmatmul.msk.f32.vlgmr.msrb.gmra.mxu1 %vm1278_vm15, %v4889_v31  ;;  %v2121_v47 = vmul.f32 %v2089_v5, %v5213_v28  ;;  %v1858_v6 = vmul.f32 -15.094643, %v1826_v25  ;;  %v1658_v50 = vsel %vm1626_vm2, 0.5, %v6167_v42  ;;  %3466 = vmatmul.msk.f32.gmra.mxu0 %vm1278_vm15, %v4942_v52 }
 0x27b   : > { %2421 = vmatpush.msrb.mxu2 %v2193_v62  ;;  %2450 = vmatpush.msrb.mxu3 %v2194_v17  ;;  %v2058_v1 = vmul.f32 %v2026_v8, %v5242_v11  ;;  %v1785_v40 = vsel %vm1721_vm5, %v1753_v18, %v4633_v49  ;;  %v1690_v38 = vand.u32 2147483647, %v5222_v0  ;;  %v1754_v24 = vsub.f32 %v1658_v50, %v5222_v0  ;;  %v5336_v50 = vpop.permute.xlu2 %2220 }
 0x27c   : > { %v1985_v3 = vmul.f32 %v1953_v39, %v5258_v54  ;;  %v2153_v41 = vadd.f32 6.2831855, %v2121_v47  ;;  %v1890_v28 = vadd.f32 42.058693, %v1858_v6  ;;  %v1817_v59 = vmul.f32 %v1785_v40, %v1785_v40 }
 0x27d   : > { %v2090_v63 = vadd.f32 -41.3417, %v2058_v1  ;;  %vm1722_vm6 = vcmp.gt.f32.partialorder %v1690_v38, 0.25  ;;  %v5338_v38 = vpop.permute.xlu0 %2205 }
 0x27e   : > { %v2017_v29 = vadd.f32 81.60525, %v1985_v3  ;;  %v2185_v55 = vmul.f32 %v2153_v41, %v5207_v23  ;;  %v1922_v51 = vmul.f32 %v1890_v28, %v1826_v25  ;;  %v1849_v16 = vmul.f32 -15.094643, %v1817_v59 }
 0x27f   : > { %v1786_v61 = vsel %vm1722_vm6, %v1754_v24, %v5222_v0  ;;  %v2122_v49 = vmul.f32 %v2090_v63, %v5242_v11 }
 0x280   : > { %v2049_v36 = vmul.f32 %v2017_v29, %v5258_v54  ;;  %v1818_v58 = vmul.f32 %v1786_v61, %v1786_v61  ;;  %2422 = vmatpush.msrb.mxu2 %v2185_v55  ;;  %v1954_v9 = vadd.f32 -76.70586, %v1922_v51  ;;  %v1881_v44 = vadd.f32 42.058693, %v1849_v16 }
 0x281   : > { %v2154_v15 = vadd.f32 6.2831855, %v2122_v49 }
 0x282   : > { %v2081_v19 = vadd.f32 -41.3417, %v2049_v36  ;;  %v1850_v43 = vmul.f32 -15.094643, %v1818_v58  ;;  %v1986_v21 = vmul.f32 %v1954_v9, %v1826_v25  ;;  %v1913_v32 = vmul.f32 %v1881_v44, %v1817_v59  ;;  %3470 = vmatmul.msk.f32.gmra.mxu1 %vm1278_vm15, %v4942_v52  ;;  %3467 = vmatmul.msk.f32.gmra.mxu0 %vm1278_vm15, %v4983_v22 }
 0x283   : > { %v2186_v23 = vmul.f32 %v2154_v15, %v5235_v57  ;;  %v5342_v28 = vpop.permute.xlu2 %2210 }
 0x284   : > { %v2113_v0 = vmul.f32 %v2081_v19, %v5258_v54  ;;  %v1882_v56 = vadd.f32 42.058693, %v1850_v43  ;;  %v2018_v11 = vadd.f32 81.60525, %v1986_v21  ;;  %v1945_v35 = vadd.f32 -76.70586, %v1913_v32 }
 0x285   : > { %2451 = vmatpush.msrb.mxu3 %v2186_v23 }
 0x286   : > { %v2145_v34 = vadd.f32 6.2831855, %v2113_v0  ;;  %v1914_v27 = vmul.f32 %v1882_v56, %v1818_v58  ;;  %v2050_v13 = vmul.f32 %v2018_v11, %v1826_v25  ;;  %v1977_v10 = vmul.f32 %v1945_v35, %v1817_v59 }
 0x288   : > { %v2177_v33 = vmul.f32 %v2145_v34, %v5253_v4  ;;  %v1946_v48 = vadd.f32 -76.70586, %v1914_v27  ;;  %v2082_v12 = vadd.f32 -41.3417, %v2050_v13  ;;  %v2009_v46 = vadd.f32 81.60525, %v1977_v10 }
 0x28a   : > { %2423 = vmatpush.msrb.mxu2 %v2177_v33  ;;  %v1978_v57 = vmul.f32 %v1946_v48, %v1818_v58  ;;  %v2114_v20 = vmul.f32 %v2082_v12, %v1826_v25  ;;  %v2041_v54 = vmul.f32 %v2009_v46, %v1817_v59  ;;  %3471 = vmatmul.msk.f32.gmra.mxu1 %vm1278_vm15, %v4983_v22 }
 0x28b   : > { %3468 = vmatmul.msk.f32.gmra.mxu0 %vm1278_vm15, %v5055_v60 }
 0x28c   : > { %v2010_v14 = vadd.f32 81.60525, %v1978_v57  ;;  %v2146_v30 = vadd.f32 6.2831855, %v2114_v20  ;;  %v2073_v45 = vadd.f32 -41.3417, %v2041_v54 }
 0x28e   : > { %v2042_v7 = vmul.f32 %v2010_v14, %v1818_v58  ;;  %v2178_v37 = vmul.f32 %v2146_v30, %v5275_v2  ;;  %v2105_v4 = vmul.f32 %v2073_v45, %v1817_v59 }
 0x290   : > { %v2074_v53 = vadd.f32 -41.3417, %v2042_v7  ;;  %2452 = vmatpush.msrb.mxu3 %v2178_v37  ;;  %v2137_v62 = vadd.f32 6.2831855, %v2105_v4 }
 0x292   : > { %v2106_v5 = vmul.f32 %v2074_v53, %v1818_v58  ;;  %v2169_v26 = vmul.f32 %v2137_v62, %v1785_v40  ;;  %3472 = vmatmul.msk.f32.gmra.mxu1 %vm1278_vm15, %v5055_v60 }
 0x294   : > { %v2138_v25 = vadd.f32 6.2831855, %v2106_v5  ;;  %2424 = vmatpush.msrb.mxu2 %v2169_v26 }
 0x295   : > { %3473 = vmatmul.msk.f32.vlgmr.msrb.gmra.mxu2 %vm1278_vm15, %v4889_v31 }
 0x296   : > { %v2170_v17 = vmul.f32 %v2138_v25, %v1786_v61  ;;  %v5348_v61 = vpop.permute.xlu1 %2215 }
 0x298   : > { %2453 = vmatpush.msrb.mxu3 %v2170_v17 }
 0x299   : > { %3477 = vmatmul.msk.f32.vlgmr.msrb.gmra.mxu3 %vm1278_vm15, %v4889_v31 }
 0x29d   : > { %3474 = vmatmul.msk.f32.gmra.mxu2 %vm1278_vm15, %v4942_v52 }
 0x2a1   : > { %3478 = vmatmul.msk.f32.gmra.mxu3 %vm1278_vm15, %v4942_v52 }
 0x2a5   : > { %3475 = vmatmul.msk.f32.gmra.mxu2 %vm1278_vm15, %v4983_v22 }
 0x2a9   : > { %3479 = vmatmul.msk.f32.gmra.mxu3 %vm1278_vm15, %v4983_v22 }
 0x2ad   : > { %3476 = vmatmul.msk.f32.gmra.mxu2 %vm1278_vm15, %v5055_v60 }
 0x2ae   : > { %v2252_v2 = vpop.f32.mrf.mxu0 }
 0x2b0   : > { %v2281_v31 = vpop.f32.mrf.mxu1 }
 0x2b1   : > { %3480 = vmatmul.msk.f32.gmra.mxu3 %vm1278_vm15, %v5055_v60  ;;  %v2253_v60 = vadd.f32 %v2252_v2, %v5338_v38  ;;  %v2282_v24 = vadd.f32 %v2281_v31, %v5338_v38 }
 0x2b3   : > { %v2467_v55 = vadd.f32 0.5, %v2253_v60  ;;  %v2468_v36 = vadd.f32 0.5, %v2282_v24 }
 0x2b5   : > { %v2499_v43 = vfloor.f32 %v2467_v55  ;;  %v2500_v23 = vfloor.f32 %v2468_v36 }
 0x2b6   : > { %v2255_v8 = vpop.f32.mrf.mxu0 }
 0x2b7   : > { %v2256_v63 = vadd.f32 %v2255_v8, %v5342_v28  ;;  %v5354_v34 = vsub.f32 %v2253_v60, %v2499_v43  ;;  %v5361_v46 = vsub.f32 %v2282_v24, %v2500_v23 }
 0x2b8   : > { %v2284_v39 = vpop.f32.mrf.mxu1 }
 0x2b9   : > { %v2285_v51 = vadd.f32 %v2284_v39, %v5342_v28  ;;  %v2475_v58 = vadd.f32 0.5, %v2256_v63  ;;  %vm2563_vm8 = vcmp.ge.f32.partialorder %v5354_v34, 0.0  ;;  %vm2564_vm10 = vcmp.ge.f32.partialorder %v5361_v46, 0.0 }
 0x2ba   : > { %v2595_v24 = vsel %vm2563_vm8, 0.5, %v6167_v42  ;;  %v2628_v43 = vand.u32 2147483647, %v5361_v46 }
 0x2bb   : > { %v2476_v21 = vadd.f32 0.5, %v2285_v51  ;;  %v2507_v0 = vfloor.f32 %v2475_v58 }
 0x2bc   : > { %vm2660_vm2 = vcmp.gt.f32.partialorder %v2628_v43, 0.25 }
 0x2bd   : > { %v2508_v27 = vfloor.f32 %v2476_v21  ;;  %v5363_v57 = vsub.f32 %v2256_v63, %v2507_v0  ;;  %v2627_v63 = vand.u32 2147483647, %v5354_v34 }
 0x2be   : > { %v2258_v18 = vpop.f32.mrf.mxu0 }
 0x2bf   : > { %v2259_v9 = vadd.f32 %v2258_v18, %v5348_v61  ;;  %v5368_v4 = vsub.f32 %v2285_v51, %v2508_v27  ;;  %vm2571_vm11 = vcmp.ge.f32.partialorder %v5363_v57, 0.0  ;;  %vm2659_vm13 = vcmp.gt.f32.partialorder %v2627_v63, 0.25 }
 0x2c0   : > { %v2287_v6 = vpop.f32.mrf.mxu1 }
 0x2c1   : > { %v2288_v15 = vadd.f32 %v2287_v6, %v5348_v61  ;;  %v2483_v56 = vadd.f32 0.5, %v2259_v9  ;;  %vm2572_vm12 = vcmp.ge.f32.partialorder %v5368_v4, 0.0 }
 0x2c3   : > { %v2484_v11 = vadd.f32 0.5, %v2288_v15  ;;  %v2515_v20 = vfloor.f32 %v2483_v56 }
 0x2c5   : > { %v2516_v45 = vfloor.f32 %v2484_v11  ;;  %v5379_v2 = vsub.f32 %v2259_v9, %v2515_v20 }
 0x2c6   : > { %v2261_v3 = vpop.f32.mrf.mxu0 }
 0x2c7   : > { %v2262_v41 = vadd.f32 %v2261_v3, %v5336_v50  ;;  %v5381_v31 = vsub.f32 %v2288_v15, %v2516_v45  ;;  %v2691_v15 = vsub.f32 %v2595_v24, %v5354_v34  ;;  %vm2579_vm14 = vcmp.ge.f32.partialorder %v5379_v2, 0.0 }
 0x2c8   : > { %v2290_v22 = vpop.f32.mrf.mxu1 }
 0x2c9   : > { %v2291_v59 = vadd.f32 %v2290_v22, %v5336_v50  ;;  %v2491_v29 = vadd.f32 0.5, %v2262_v41  ;;  %vm2580_vm0 = vcmp.ge.f32.partialorder %v5381_v31, 0.0  ;;  %v5419_v11 = vsel %vm2659_vm13, %v2691_v15, %v5354_v34 }
 0x2ca   : > { %v2643_v15 = vand.u32 2147483647, %v5379_v2 }
 0x2cb   : > { %v2492_v49 = vadd.f32 0.5, %v2291_v59  ;;  %v2523_v19 = vfloor.f32 %v2491_v29 }
 0x2cc   : > { %vm2675_vm6 = vcmp.gt.f32.partialorder %v2643_v15, 0.25 }
 0x2cd   : > { %v2524_v32 = vfloor.f32 %v2492_v49  ;;  %v5352_v35 = vsub.f32 %v2262_v41, %v2523_v19  ;;  %v2596_v19 = vsel %vm2564_vm10, 0.5, %v6167_v42 }
 0x2ce   : > { %v2692_v0 = vsub.f32 %v2596_v19, %v5361_v46  ;;  %v2644_v19 = vand.u32 2147483647, %v5381_v31 }
 0x2cf   : > { %v5358_v48 = vsub.f32 %v2291_v59, %v2524_v32  ;;  %vm2587_vm7 = vcmp.ge.f32.partialorder %v5352_v35, 0.0 }
 0x2d0   : > { %v5375_v25 = vsel %vm2587_vm7, 0.5, %v6167_v42  ;;  %vm2676_vm7 = vcmp.gt.f32.partialorder %v2644_v19, 0.25 }
 0x2d1   : > { %vm2588_vm9 = vcmp.ge.f32.partialorder %v5358_v48, 0.0  ;;  %v2715_v22 = vsub.f32 %v5375_v25, %v5352_v35  ;;  %v2652_v55 = vand.u32 2147483647, %v5358_v48 }
 0x2d2   : > { %v5385_v18 = vsel %vm2588_vm9, 0.5, %v6167_v42 }
 0x2d3   : > { %v2310_v47 = vpop.f32.mrf.mxu2  ;;  %v2716_v51 = vsub.f32 %v5385_v18, %v5358_v48  ;;  %vm2684_vm9 = vcmp.gt.f32.partialorder %v2652_v55, 0.25 }
 0x2d4   : > { %v2311_v10 = vadd.f32 %v2310_v47, %v5338_v38 }
 0x2d5   : > { %v2339_v52 = vpop.f32.mrf.mxu3 }
 0x2d6   : > { %v2340_v33 = vadd.f32 %v2339_v52, %v5338_v38  ;;  %v2469_v62 = vadd.f32 0.5, %v2311_v10 }
 0x2d8   : > { %v2470_v5 = vadd.f32 0.5, %v2340_v33 }
 0x2da   : > { %v2502_v3 = vfloor.f32 %v2470_v5 }
 0x2db   : > { %v2313_v1 = vpop.f32.mrf.mxu2 }
 0x2dc   : > { %v2314_v54 = vadd.f32 %v2313_v1, %v5342_v28  ;;  %v2501_v1 = vfloor.f32 %v2469_v62  ;;  %v5408_v21 = vsub.f32 %v2340_v33, %v2502_v3 }
 0x2dd   : > { %v2342_v40 = vpop.f32.mrf.mxu3 }
 0x2de   : > { %v2343_v7 = vadd.f32 %v2342_v40, %v5342_v28  ;;  %v2477_v26 = vadd.f32 0.5, %v2314_v54  ;;  %v2651_v40 = vand.u32 2147483647, %v5352_v35 }
 0x2e0   : > { %v2478_v8 = vadd.f32 0.5, %v2343_v7  ;;  %v2509_v60 = vfloor.f32 %v2477_v26  ;;  %vm2683_vm8 = vcmp.gt.f32.partialorder %v2651_v40, 0.25  ;;  %v5543_v40 = vsel %vm2684_vm9, %v2716_v51, %v5358_v48 }
 0x2e2   : > { %v2510_v29 = vfloor.f32 %v2478_v8  ;;  %v5410_v32 = vsub.f32 %v2314_v54, %v2509_v60  ;;  %v2635_v54 = vand.u32 2147483647, %v5363_v57 }
 0x2e4   : > { %v2316_v16 = vpop.f32.mrf.mxu2  ;;  %v5415_v56 = vsub.f32 %v2343_v7, %v2510_v29  ;;  %v2603_v7 = vsel %vm2571_vm11, 0.5, %v6167_v42  ;;  %vm2667_vm3 = vcmp.gt.f32.partialorder %v2635_v54, 0.25 }
 0x2e5   : > { %v2345_v44 = vpop.f32.mrf.mxu3  ;;  %v2317_v17 = vadd.f32 %v2316_v16, %v5348_v61 }
 0x2e6   : > { %v2346_v47 = vadd.f32 %v2345_v44, %v5348_v61  ;;  %v5401_v44 = vsub.f32 %v2311_v10, %v2501_v1 }
 0x2e7   : > { %v2485_v59 = vadd.f32 0.5, %v2317_v17 }
 0x2e8   : > { %v2486_v49 = vadd.f32 0.5, %v2346_v47 }
 0x2e9   : > { %v2517_v23 = vfloor.f32 %v2485_v59 }
 0x2ea   : > { %v2518_v27 = vfloor.f32 %v2486_v49 }
 0x2eb   : > { %v5430_v45 = vsub.f32 %v2317_v17, %v2517_v23 }
 0x2ec   : > { %v2319_v13 = vpop.f32.mrf.mxu2  ;;  %v5452_v17 = vsub.f32 %v2346_v47, %v2518_v27  ;;  %v2612_v27 = vsel %vm2580_vm0, 0.5, %v6167_v42  ;;  %vm2573_vm0 = vcmp.ge.f32.partialorder %v5410_v32, 0.0 }
 0x2ed   : > { %v2320_v12 = vadd.f32 %v2319_v13, %v5336_v50  ;;  %v2348_v30 = vpop.f32.mrf.mxu3  ;;  %v2708_v54 = vsub.f32 %v2612_v27, %v5381_v31 }
 0x2ee   : > { %v2349_v53 = vadd.f32 %v2348_v30, %v5336_v50  ;;  %v5428_v30 = vsel %vm2660_vm2, %v2692_v0, %v5361_v46  ;;  %v2604_v46 = vsel %vm2572_vm12, 0.5, %v6167_v42  ;;  %v2611_v0 = vsel %vm2579_vm14, 0.5, %v6167_v42 }
 0x2ef   : > { %v2368_v14 = vpop.f32.mrf.mxu0  ;;  %v2493_v37 = vadd.f32 0.5, %v2320_v12  ;;  %v2700_v5 = vsub.f32 %v2604_v46, %v5368_v4  ;;  %v5450_v26 = vmul.f32 %v5428_v30, %v5428_v30  ;;  %vm2581_vm12 = vcmp.ge.f32.partialorder %v5430_v45, 0.0 }
 0x2f0   : > { %v2369_v6 = vadd.f32 %v2368_v14, %v5338_v38  ;;  %v2494_v52 = vadd.f32 0.5, %v2349_v53  ;;  %v2636_v14 = vand.u32 2147483647, %v5368_v4  ;;  %vm2582_vm13 = vcmp.ge.f32.partialorder %v5452_v17, 0.0 }
 0x2f1   : > { %v2525_v39 = vfloor.f32 %v2493_v37  ;;  %v5440_v37 = vmul.f32 %v5419_v11, %v5419_v11 }
 0x2f2   : > { %v2471_v36 = vadd.f32 0.5, %v2369_v6  ;;  %v2526_v58 = vfloor.f32 %v2494_v52  ;;  %vm2668_vm4 = vcmp.gt.f32.partialorder %v2636_v14, 0.25 }
 0x2f3   : > { %v5399_v16 = vsub.f32 %v2320_v12, %v2525_v39  ;;  %v5468_v59 = vsel %vm2668_vm4, %v2700_v5, %v5368_v4  ;;  %v2787_v24 = vmul.f32 -15.094643, %v5440_v37  ;;  %v2788_v4 = vmul.f32 -15.094643, %v5450_v26 }
 0x2f4   : > { %v2503_v13 = vfloor.f32 %v2471_v36  ;;  %v5422_v33 = vsub.f32 %v2349_v53, %v2526_v58  ;;  %v2699_v53 = vsub.f32 %v2603_v7, %v5363_v57  ;;  %v5480_v49 = vmul.f32 %v5468_v59, %v5468_v59 }
 0x2f5   : > { %vm2589_vm1 = vcmp.ge.f32.partialorder %v5399_v16, 0.0 }
 0x2f6   : > { %v5433_v34 = vsel %vm2589_vm1, 0.5, %v6167_v42  ;;  %vm2590_vm5 = vcmp.ge.f32.partialorder %v5422_v33, 0.0  ;;  %v5454_v8 = vsub.f32 %v2369_v6, %v2503_v13  ;;  %v5457_v52 = vsel %vm2667_vm3, %v2699_v53, %v5363_v57 }
 0x2f7   : > { %v2397_v41 = vpop.f32.mrf.mxu1  ;;  %v2371_v9 = vpop.f32.mrf.mxu0  ;;  %v5465_v60 = vmul.f32 %v5457_v52, %v5457_v52  ;;  %v5473_v6 = vsel %vm2590_vm5, 0.5, %v6167_v42  ;;  %v2707_v13 = vsub.f32 %v2611_v0, %v5379_v2  ;;  %v2796_v7 = vmul.f32 -15.094643, %v5480_v49 }
 0x2f8   : > { %v2398_v10 = vadd.f32 %v2397_v41, %v5338_v38  ;;  %v2372_v12 = vadd.f32 %v2371_v9, %v5342_v28  ;;  %v2820_v53 = vadd.f32 42.058693, %v2788_v4  ;;  %vm2574_vm3 = vcmp.ge.f32.partialorder %v5415_v56, 0.0 }
 0x2f9   : > { %v2795_v29 = vmul.f32 -15.094643, %v5465_v60  ;;  %vm2565_vm5 = vcmp.ge.f32.partialorder %v5401_v44, 0.0 }
 0x2fa   : > { %v2472_v62 = vadd.f32 0.5, %v2398_v10  ;;  %v2479_v39 = vadd.f32 0.5, %v2372_v12  ;;  %v2852_v0 = vmul.f32 %v2820_v53, %v5450_v26 }
 0x2fb   : > { %v2827_v14 = vadd.f32 42.058693, %v2795_v29  ;;  %v5511_v29 = vsel %vm2676_vm7, %v2708_v54, %v5381_v31 }
 0x2fc   : > { %v2504_v63 = vfloor.f32 %v2472_v62  ;;  %v2511_v36 = vfloor.f32 %v2479_v39  ;;  %v5503_v39 = vsel %vm2675_vm6, %v2707_v13, %v5379_v2  ;;  %v2828_v2 = vadd.f32 42.058693, %v2796_v7 }
 0x2fd   : > { %v2859_v4 = vmul.f32 %v2827_v14, %v5465_v60  ;;  %vm2566_vm6 = vcmp.ge.f32.partialorder %v5408_v21, 0.0 }
 0x2fe   : > { %v5498_v46 = vsub.f32 %v2398_v10, %v2504_v63  ;;  %v5500_v62 = vsub.f32 %v2372_v12, %v2511_v36  ;;  %v5517_v63 = vmul.f32 %v5511_v29, %v5511_v29 }
 0x2ff   : > { %v2400_v20 = vpop.f32.mrf.mxu1  ;;  %v2374_v41 = vpop.f32.mrf.mxu0 }
 0x300   : > { %v5461_v3 = vadd.f32 %v2400_v20, %v5342_v28  ;;  %v2375_v58 = vadd.f32 %v2374_v41, %v5348_v61  ;;  %v2819_v20 = vadd.f32 42.058693, %v2787_v24  ;;  %v5508_v24 = vmul.f32 %v5503_v39, %v5503_v39 }
 0x301   : > { %v2804_v54 = vmul.f32 -15.094643, %v5517_v63 }
 0x302   : > { %v2480_v23 = vadd.f32 0.5, %v5461_v3  ;;  %v2487_v5 = vadd.f32 0.5, %v2375_v58  ;;  %v2803_v36 = vmul.f32 -15.094643, %v5508_v24  ;;  %v2851_v19 = vmul.f32 %v2819_v20, %v5440_v37 }
 0x303   : > { %v2836_v20 = vadd.f32 42.058693, %v2804_v54 }
 0x304   : > { %v2512_v10 = vfloor.f32 %v2480_v23  ;;  %v2519_v27 = vfloor.f32 %v2487_v5  ;;  %v2860_v23 = vmul.f32 %v2828_v2, %v5480_v49  ;;  %v2835_v43 = vadd.f32 42.058693, %v2803_v36 }
 0x305   : > { %v5537_v36 = vsel %vm2683_vm8, %v2715_v22, %v5352_v35  ;;  %v2868_v55 = vmul.f32 %v2836_v20, %v5517_v63 }
 0x306   : > { %v2867_v5 = vmul.f32 %v2835_v43, %v5508_v24  ;;  %v2892_v47 = vadd.f32 -76.70586, %v2860_v23  ;;  %v5548_v43 = vmul.f32 %v5537_v36, %v5537_v36  ;;  %v5555_v35 = vsub.f32 %v5461_v3, %v2512_v10 }
 0x307   : > { %v2403_v9 = vpop.f32.mrf.mxu1  ;;  %v5558_v18 = vsub.f32 %v2375_v58, %v2519_v27  ;;  %v2884_v58 = vadd.f32 -76.70586, %v2852_v0 }
 0x308   : > { %v2404_v41 = vadd.f32 %v2403_v9, %v5348_v61  ;;  %v2377_v15 = vpop.f32.mrf.mxu0  ;;  %v2891_v9 = vadd.f32 -76.70586, %v2859_v4  ;;  %v2899_v25 = vadd.f32 -76.70586, %v2867_v5  ;;  %v2811_v51 = vmul.f32 -15.094643, %v5548_v43 }
 0x309   : > { %v2378_v12 = vadd.f32 %v2377_v15, %v5336_v50  ;;  %v2924_v20 = vmul.f32 %v2892_v47, %v5480_v49 }
 0x30a   : > { %v2488_v14 = vadd.f32 0.5, %v2404_v41  ;;  %v2923_v7 = vmul.f32 %v2891_v9, %v5465_v60  ;;  %v2931_v23 = vmul.f32 %v2899_v25, %v5508_v24 }
 0x30b   : > { %v2495_v31 = vadd.f32 0.5, %v2378_v12 }
 0x30c   : > { %v2955_v4 = vadd.f32 81.60525, %v2923_v7  ;;  %v2520_v22 = vfloor.f32 %v2488_v14  ;;  %v2843_v14 = vadd.f32 42.058693, %v2811_v51 }
 0x30d   : > { %v2527_v57 = vfloor.f32 %v2495_v31 }
 0x30e   : > { %v2987_v48 = vmul.f32 %v2955_v4, %v5465_v60 }
 0x30f   : > { %v2406_v13 = vpop.f32.mrf.mxu1  ;;  %v5531_v2 = vsub.f32 %v2378_v12, %v2527_v57  ;;  %v5552_v57 = vmul.f32 %v5543_v40, %v5543_v40  ;;  %v2900_v12 = vadd.f32 -76.70586, %v2868_v55 }
 0x310   : > { %v2407_v15 = vadd.f32 %v2406_v13, %v5336_v50  ;;  %v2883_v13 = vadd.f32 -76.70586, %v2851_v19  ;;  %v3019_v7 = vadd.f32 -41.3417, %v2987_v48  ;;  %v2963_v19 = vadd.f32 81.60525, %v2931_v23 }
 0x311   : > { %v2812_v31 = vmul.f32 -15.094643, %v5552_v57  ;;  %vm2591_vm10 = vcmp.ge.f32.partialorder %v5531_v2, 0.0  ;;  %v2932_v3 = vmul.f32 %v2900_v12, %v5517_v63  ;;  %v2956_v12 = vadd.f32 81.60525, %v2924_v20 }
 0x312   : > { %v2496_v53 = vadd.f32 0.5, %v2407_v15  ;;  %v5572_v4 = vsel %vm2591_vm10, 0.5, %v6167_v42  ;;  %v2995_v0 = vmul.f32 %v2963_v19, %v5508_v24  ;;  %v3051_v51 = vmul.f32 %v3019_v7, %v5465_v60 }
 0x313   : > { %v2844_v5 = vadd.f32 42.058693, %v2812_v31  ;;  %v2964_v55 = vadd.f32 81.60525, %v2932_v3  ;;  %v2988_v3 = vmul.f32 %v2956_v12, %v5480_v49  ;;  %vm2583_vm10 = vcmp.ge.f32.partialorder %v5558_v18, 0.0 }
 0x314   : > { %v2528_v9 = vfloor.f32 %v2496_v53  ;;  %v5569_v53 = vsub.f32 %v2404_v41, %v2520_v22  ;;  %v3027_v23 = vadd.f32 -41.3417, %v2995_v0 }
 0x315   : > { %v2876_v47 = vmul.f32 %v2844_v5, %v5552_v57  ;;  %v2996_v48 = vmul.f32 %v2964_v55, %v5517_v63 }
 0x316   : > { %v5563_v54 = vsub.f32 %v2407_v15, %v2528_v9  ;;  %v2875_v15 = vmul.f32 %v2843_v14, %v5548_v43  ;;  %v2915_v9 = vmul.f32 %v2883_v13, %v5440_v37  ;;  %v2916_v13 = vmul.f32 %v2884_v58, %v5450_v26 }
 0x317   : > { %v2908_v31 = vadd.f32 -76.70586, %v2876_v47  ;;  %v3028_v20 = vadd.f32 -41.3417, %v2996_v48  ;;  %v3059_v58 = vmul.f32 %v3027_v23, %v5508_v24  ;;  %v3020_v48 = vadd.f32 -41.3417, %v2988_v3 }
 0x318   : > { %v2426_v10 = vpop.f32.mrf.mxu2  ;;  %vm2592_vm11 = vcmp.ge.f32.partialorder %v5563_v54, 0.0  ;;  %v2907_v22 = vadd.f32 -76.70586, %v2875_v15  ;;  %v2947_v47 = vadd.f32 81.60525, %v2915_v9 }
 0x319   : > { %v2427_v27 = vadd.f32 %v2426_v10, %v5338_v38  ;;  %v5593_v60 = vsel %vm2592_vm11, 0.5, %v6167_v42  ;;  %v2940_v7 = vmul.f32 %v2908_v31, %v5552_v57 }
 0x31a   : > { %v2939_v5 = vmul.f32 %v2907_v22, %v5548_v43  ;;  %v3060_v22 = vmul.f32 %v3028_v20, %v5517_v63  ;;  %v2979_v63 = vmul.f32 %v2947_v47, %v5440_v37  ;;  %v6185_v47 = vand.u32 2147483647, %v5399_v16 }
 0x31b   : > { %v2473_v41 = vadd.f32 0.5, %v2427_v27  ;;  %v2972_v12 = vadd.f32 81.60525, %v2940_v7 }
 0x31c   : > { %v2455_v25 = vpop.f32.mrf.mxu3  ;;  %v2971_v55 = vadd.f32 81.60525, %v2939_v5  ;;  %v3091_v5 = vadd.f32 6.2831855, %v3059_v58  ;;  %v3092_v24 = vadd.f32 6.2831855, %v3060_v22 }
 0x31d   : > { %v5584_v10 = vadd.f32 %v2455_v25, %v5338_v38  ;;  %v2505_v15 = vfloor.f32 %v2473_v41  ;;  %v3083_v25 = vadd.f32 6.2831855, %v3051_v51  ;;  %v3004_v23 = vmul.f32 %v2972_v12, %v5552_v57 }
 0x31e   : > { %v3003_v41 = vmul.f32 %v2971_v55, %v5548_v43  ;;  %v3052_v55 = vmul.f32 %v3020_v48, %v5480_v49  ;;  %v3011_v14 = vadd.f32 -41.3417, %v2979_v63  ;;  %v2948_v58 = vadd.f32 81.60525, %v2916_v13 }
 0x31f   : > { %v5601_v19 = vadd.f32 0.5, %v5584_v10  ;;  %v5609_v3 = vsub.f32 %v2427_v27, %v2505_v15  ;;  %v3036_v31 = vadd.f32 -41.3417, %v3004_v23  ;;  %vm2685_vm14 = vcmp.gt.f32.partialorder %v6185_v47, 0.25 }
 0x320   : > { %v2429_v38 = vpop.f32.mrf.mxu2  ;;  %v3035_v7 = vadd.f32 -41.3417, %v3003_v41  ;;  %v3043_v22 = vmul.f32 %v3011_v14, %v5440_v37  ;;  %v2980_v49 = vmul.f32 %v2948_v58, %v5450_v26  ;;  %v6187_v63 = vand.u32 2147483647, %v5422_v33 }
 0x321   : > { %v2430_v0 = vadd.f32 %v2429_v38, %v5342_v28  ;;  %v3115_v38 = vmul.f32 %v3083_v25, %v5457_v52  ;;  %v2506_v27 = vfloor.f32 %v5601_v19  ;;  %v3068_v15 = vmul.f32 %v3036_v31, %v5552_v57 }
 0x322   : > { %v3067_v12 = vmul.f32 %v3035_v7, %v5548_v43  ;;  %v3123_v52 = vmul.f32 %v3091_v5, %v5503_v39  ;;  %v6186_v43 = vsub.f32 %v5433_v34, %v5399_v16  ;;  %v3124_v57 = vmul.f32 %v3092_v24, %v5511_v29 }
 0x323   : > { %v2481_v51 = vadd.f32 0.5, %v2430_v0  ;;  %v3084_v39 = vadd.f32 6.2831855, %v3052_v55  ;;  %v3012_v14 = vadd.f32 -41.3417, %v2980_v49  ;;  %vm2686_vm1 = vcmp.gt.f32.partialorder %v6187_v63, 0.25 }
 0x324   : > { %v2458_v9 = vpop.f32.mrf.mxu3  ;;  %v3099_v41 = vadd.f32 6.2831855, %v3067_v12  ;;  %v5627_v13 = vsel %vm2685_vm14, %v6186_v43, %v5399_v16  ;;  %v6188_v7 = vsub.f32 %v5473_v6, %v5422_v33  ;;  %v2645_v55 = vand.u32 2147483647, %v5430_v45 }
 0x325   : > { %v2459_v20 = vadd.f32 %v2458_v9, %v5342_v28  ;;  %v2513_v1 = vfloor.f32 %v2481_v51  ;;  %v3100_v51 = vadd.f32 6.2831855, %v3068_v15  ;;  %v5637_v9 = vmul.f32 %v5627_v13, %v5627_v13 }
 0x326   : > { %v3131_v37 = vmul.f32 %v3099_v41, %v5537_v36  ;;  %v3044_v36 = vmul.f32 %v3012_v14, %v5450_v26  ;;  %v3116_v24 = vmul.f32 %v3084_v39, %v5468_v59  ;;  %vm2677_vm2 = vcmp.gt.f32.partialorder %v2645_v55, 0.25 }
 0x327   : > { %v2482_v28 = vadd.f32 0.5, %v2459_v20  ;;  %v5632_v31 = vsub.f32 %v2430_v0, %v2513_v1  ;;  %v3132_v5 = vmul.f32 %v3100_v51, %v5543_v40  ;;  %v3075_v1 = vadd.f32 6.2831855, %v3043_v22 }
 0x328   : > { %v2432_v25 = vpop.f32.mrf.mxu2  ;;  %3161 = vmatpush.msra.mxu0 %v3131_v37  ;;  %v2813_v0 = vmul.f32 -15.094643, %v5637_v9  ;;  %v5652_v40 = vsel %vm2686_vm1, %v6188_v7, %v5422_v33  ;;  %v3076_v26 = vadd.f32 6.2831855, %v3044_v36  ;;  %v2614_v41 = vsel %vm2582_vm13, 0.5, %v6167_v42 }
 0x329   : > { %v2433_v48 = vadd.f32 %v2432_v25, %v5348_v61  ;;  %v2514_v34 = vfloor.f32 %v2482_v28  ;;  %3181 = vmatpush.msra.mxu1 %v3132_v5  ;;  %v5660_v47 = vmul.f32 %v5652_v40, %v5652_v40  ;;  %v3107_v15 = vmul.f32 %v3075_v1, %v5419_v11 }
 0x32a   : > { %3162 = vmatpush.msra.mxu0 %v3123_v52  ;;  %v2845_v58 = vadd.f32 42.058693, %v2813_v0  ;;  %v5670_v52 = vld [vmem:[%s6152_s7] sm:$0x7]  ;;  %v2646_v49 = vand.u32 2147483647, %v5452_v17 }
 0x32b   : > { %v2489_v16 = vadd.f32 0.5, %v2433_v48  ;;  %v5662_v59 = vsub.f32 %v2459_v20, %v2514_v34  ;;  %3182 = vmatpush.msra.mxu1 %v3124_v57  ;;  %v2814_v20 = vmul.f32 -15.094643, %v5660_v47  ;;  %vm2584_vm14 = vcmp.ge.f32.partialorder %v5569_v53, 0.0 }
 0x32c   : > { %v2461_v23 = vpop.f32.mrf.mxu3  ;;  %3163 = vmatpush.msra.mxu0 %v3115_v38  ;;  %v2877_v25 = vmul.f32 %v2845_v58, %v5637_v9  ;;  %v3108_v38 = vmul.f32 %v3076_v26, %v5428_v30  ;;  %vm2678_vm4 = vcmp.gt.f32.partialorder %v2646_v49, 0.25  ;;  %v2710_v30 = vsub.f32 %v2614_v41, %v5452_v17 }
 0x32d   : > { %v5643_v29 = vadd.f32 %v2461_v23, %v5348_v61  ;;  %v2613_v61 = vsel %vm2581_vm12, 0.5, %v6167_v42  ;;  %v2521_v12 = vfloor.f32 %v2489_v16  ;;  %3183 = vmatpush.msra.mxu1 %v3116_v24  ;;  %v2846_v57 = vadd.f32 42.058693, %v2814_v20 }
 0x32e   : > { %v2709_v33 = vsub.f32 %v2613_v61, %v5430_v45  ;;  %3164 = vmatpush.msra.mxu0 %v3107_v15  ;;  %v2909_v51 = vadd.f32 -76.70586, %v2877_v25  ;;  %v2605_v23 = vsel %vm2573_vm0, 0.5, %v6167_v42  ;;  %v5704_v1 = vsel %vm2678_vm4, %v2710_v30, %v5452_v17 }
 0x32f   : > { %v2490_v6 = vadd.f32 0.5, %v5643_v29  ;;  %v5683_v43 = vsub.f32 %v2433_v48, %v2521_v12  ;;  %3184 = vmatpush.msra.mxu1 %v3108_v38  ;;  %3481 = vmatmul.msk.f32.vlgmr.msra.gmra.mxu0 %vm1278_vm15, %v5670_v52  ;;  %v2878_v16 = vmul.f32 %v2846_v57, %v5660_v47  ;;  %v5709_v7 = vmul.f32 %v5704_v1, %v5704_v1 }
 0x330   : > { %v2435_v28 = vpop.f32.mrf.mxu2  ;;  %v5680_v11 = vsel %vm2677_vm2, %v2709_v33, %v5430_v45  ;;  %3482 = vmatmul.msk.f32.vlgmr.msra.gmra.mxu1 %vm1278_vm15, %v5670_v52  ;;  %v2941_v48 = vmul.f32 %v2909_v51, %v5637_v9  ;;  %v2701_v12 = vsub.f32 %v2605_v23, %v5410_v32  ;;  %vm2575_vm2 = vcmp.ge.f32.partialorder %v5500_v62, 0.0 }
 0x331   : > { %v2436_v22 = vadd.f32 %v2435_v28, %v5336_v50  ;;  %v5687_v39 = vmul.f32 %v5680_v11, %v5680_v11  ;;  %v2522_v37 = vfloor.f32 %v2490_v6  ;;  %v2910_v24 = vadd.f32 -76.70586, %v2878_v16 }
 0x332   : > { %v2973_v0 = vadd.f32 81.60525, %v2941_v48  ;;  %v2806_v6 = vmul.f32 -15.094643, %v5709_v7  ;;  %vm2576_vm4 = vcmp.ge.f32.partialorder %v5555_v35, 0.0 }
 0x333   : > { %v2497_v14 = vadd.f32 0.5, %v2436_v22  ;;  %v2805_v63 = vmul.f32 -15.094643, %v5687_v39  ;;  %v2942_v58 = vmul.f32 %v2910_v24, %v5660_v47  ;;  %v5719_v33 = vsub.f32 %v5643_v29, %v2522_v37 }
 0x334   : > { %v2464_v34 = vpop.f32.mrf.mxu3  ;;  %v3005_v17 = vmul.f32 %v2973_v0, %v5637_v9  ;;  %v2838_v51 = vadd.f32 42.058693, %v2806_v6  ;;  %v2629_v6 = vand.u32 2147483647, %v5401_v44 }
 0x335   : > { %v2465_v45 = vadd.f32 %v2464_v34, %v5336_v50  ;;  %v2529_v5 = vfloor.f32 %v2497_v14  ;;  %v2637_v50 = vand.u32 2147483647, %v5410_v32  ;;  %v2837_v55 = vadd.f32 42.058693, %v2805_v63 }
 0x336   : > { %v3037_v41 = vadd.f32 -41.3417, %v3005_v17  ;;  %v2870_v30 = vmul.f32 %v2838_v51, %v5709_v7  ;;  %vm2661_vm12 = vcmp.gt.f32.partialorder %v2629_v6, 0.25 }
 0x337   : > { %v2498_v36 = vadd.f32 0.5, %v2465_v45  ;;  %v5712_v61 = vsub.f32 %v2436_v22, %v2529_v5  ;;  %vm2669_vm7 = vcmp.gt.f32.partialorder %v2637_v50, 0.25  ;;  %v2869_v28 = vmul.f32 %v2837_v55, %v5687_v39 }
 0x338   : > { %v5724_v15 = vsel %vm2669_vm7, %v2701_v12, %v5410_v32  ;;  %v2974_v22 = vadd.f32 81.60525, %v2942_v58  ;;  %v3069_v32 = vmul.f32 %v3037_v41, %v5637_v9  ;;  %v2606_v5 = vsel %vm2574_vm3, 0.5, %v6167_v42 }
 0x339   : > { %v2530_v26 = vfloor.f32 %v2498_v36  ;;  %vm2593_vm8 = vcmp.ge.f32.partialorder %v5712_v61, 0.0  ;;  %v2657_v38 = vand.u32 2147483647, %v5712_v61  ;;  %v2901_v49 = vadd.f32 -76.70586, %v2869_v28 }
 0x33a   : > { %v5727_v25 = vsel %vm2593_vm8, 0.5, %v6167_v42  ;;  %v5734_v29 = vmul.f32 %v5724_v15, %v5724_v15  ;;  %v3006_v37 = vmul.f32 %v2974_v22, %v5660_v47  ;;  %v3101_v16 = vadd.f32 6.2831855, %v3069_v32 }
 0x33b   : > { %v5729_v20 = vsub.f32 %v2465_v45, %v2530_v26  ;;  %v2721_v57 = vsub.f32 %v5727_v25, %v5712_v61  ;;  %v2933_v34 = vmul.f32 %v2901_v49, %v5687_v39  ;;  %v2902_v63 = vadd.f32 -76.70586, %v2870_v30 }
 0x33c   : > { %v2797_v45 = vmul.f32 -15.094643, %v5734_v29  ;;  %v3038_v23 = vadd.f32 -41.3417, %v3006_v37  ;;  %v2702_v36 = vsub.f32 %v2606_v5, %v5415_v56  ;;  %v3133_v0 = vmul.f32 %v3101_v16, %v5627_v13 }
 0x33d   : > { %vm2594_vm9 = vcmp.ge.f32.partialorder %v5729_v20, 0.0  ;;  %v2658_v14 = vand.u32 2147483647, %v5729_v20  ;;  %v2965_v9 = vadd.f32 81.60525, %v2933_v34  ;;  %v2597_v12 = vsel %vm2565_vm5, 0.5, %v6167_v42 }
 0x33e   : > { %v5746_v48 = vsel %vm2594_vm9, 0.5, %v6167_v42  ;;  %v2829_v50 = vadd.f32 42.058693, %v2797_v45  ;;  %v3070_v24 = vmul.f32 %v3038_v23, %v5660_v47  ;;  %v2638_v55 = vand.u32 2147483647, %v5415_v56  ;;  %3201 = vmatpush.msra.mxu2 %v3133_v0 }
 0x33f   : > { %v2997_v26 = vmul.f32 %v2965_v9, %v5687_v39  ;;  %v2934_v17 = vmul.f32 %v2902_v63, %v5709_v7  ;;  %v2693_v47 = vsub.f32 %v2597_v12, %v5401_v44  ;;  %v2598_v28 = vsel %vm2566_vm6, 0.5, %v6167_v42 }
 0x340   : > { %v2861_v58 = vmul.f32 %v2829_v50, %v5734_v29  ;;  %v3102_v13 = vadd.f32 6.2831855, %v3070_v24  ;;  %vm2670_vm11 = vcmp.gt.f32.partialorder %v2638_v55, 0.25  ;;  %v2630_v34 = vand.u32 2147483647, %v5408_v21 }
 0x341   : > { %v3029_v41 = vadd.f32 -41.3417, %v2997_v26  ;;  %v2966_v22 = vadd.f32 81.60525, %v2934_v17  ;;  %v5768_v51 = vsel %vm2670_vm11, %v2702_v36, %v5415_v56  ;;  %v5780_v23 = vsel %vm2661_vm12, %v2693_v47, %v5401_v44 }
 0x342   : > { %v2893_v49 = vadd.f32 -76.70586, %v2861_v58  ;;  %v3134_v32 = vmul.f32 %v3102_v13, %v5652_v40  ;;  %v5773_v37 = vmul.f32 %v5768_v51, %v5768_v51  ;;  %v5785_v40 = vmul.f32 %v5780_v23, %v5780_v23 }
 0x343   : > { %v3061_v30 = vmul.f32 %v3029_v41, %v5687_v39  ;;  %v2998_v45 = vmul.f32 %v2966_v22, %v5709_v7  ;;  %vm2662_vm13 = vcmp.gt.f32.partialorder %v2630_v34, 0.25  ;;  %v2694_v5 = vsub.f32 %v2598_v28, %v5408_v21 }
 0x344   : > { %v2925_v16 = vmul.f32 %v2893_v49, %v5734_v29  ;;  %3221 = vmatpush.msra.mxu3 %v3134_v32  ;;  %v2798_v56 = vmul.f32 -15.094643, %v5773_v37  ;;  %v2722_v39 = vsub.f32 %v5746_v48, %v5729_v20  ;;  %v2789_v36 = vmul.f32 -15.094643, %v5785_v40 }
 0x345   : > { %v3093_v9 = vadd.f32 6.2831855, %v3061_v30  ;;  %v3030_v63 = vadd.f32 -41.3417, %v2998_v45  ;;  %v5793_v0 = vsel %vm2662_vm13, %v2694_v5, %v5408_v21  ;;  %v6189_v24 = vand.u32 2147483647, %v5531_v2 }
 0x346   : > { %v2957_v50 = vadd.f32 81.60525, %v2925_v16  ;;  %v2830_v44 = vadd.f32 42.058693, %v2798_v56  ;;  %v5802_v17 = vmul.f32 %v5793_v0, %v5793_v0  ;;  %v2821_v6 = vadd.f32 42.058693, %v2789_v36 }
 0x347   : > { %vm2687_vm0 = vcmp.gt.f32.partialorder %v6189_v24, 0.25  ;;  %v3125_v55 = vmul.f32 %v3093_v9, %v5680_v11  ;;  %v3062_v12 = vmul.f32 %v3030_v63, %v5709_v7  ;;  %v6190_v21 = vsub.f32 %v5572_v4, %v5531_v2 }
 0x348   : > { %v2989_v26 = vmul.f32 %v2957_v50, %v5734_v29  ;;  %v2862_v58 = vmul.f32 %v2830_v44, %v5773_v37  ;;  %v6191_v47 = vand.u32 2147483647, %v5563_v54  ;;  %v2790_v28 = vmul.f32 -15.094643, %v5802_v17 }
 0x349   : > { %v5809_v13 = vsel %vm2687_vm0, %v6190_v21, %v5531_v2  ;;  %3202 = vmatpush.msra.mxu2 %v3125_v55  ;;  %v3094_v11 = vadd.f32 6.2831855, %v3062_v12  ;;  %v2853_v49 = vmul.f32 %v2821_v6, %v5785_v40  ;;  %v6192_v2 = vsub.f32 %v5593_v60, %v5563_v54 }
 0x34a   : > { %vm2688_vm1 = vcmp.gt.f32.partialorder %v6191_v47, 0.25  ;;  %v3021_v7 = vadd.f32 -41.3417, %v2989_v26  ;;  %v5816_v41 = vmul.f32 %v5809_v13, %v5809_v13  ;;  %v2894_v22 = vadd.f32 -76.70586, %v2862_v58 }
 0x34b   : > { %v5824_v4 = vsel %vm2688_vm1, %v6192_v2, %v5563_v54  ;;  %v2615_v32 = vsel %vm2583_vm10, 0.5, %v6167_v42  ;;  %v3126_v34 = vmul.f32 %v3094_v11, %v5704_v1  ;;  %v2822_v45 = vadd.f32 42.058693, %v2790_v28 }
 0x34c   : > { %v3053_v30 = vmul.f32 %v3021_v7, %v5734_v29  ;;  %v2815_v16 = vmul.f32 -15.094643, %v5816_v41  ;;  %v2926_v56 = vmul.f32 %v2894_v22, %v5773_v37  ;;  %v2885_v5 = vadd.f32 -76.70586, %v2853_v49 }
 0x34d   : > { %v5835_v9 = vmul.f32 %v5824_v4, %v5824_v4  ;;  %v2647_v54 = vand.u32 2147483647, %v5558_v18  ;;  %3222 = vmatpush.msra.mxu3 %v3126_v34  ;;  %v2854_v63 = vmul.f32 %v2822_v45, %v5802_v17  ;;  %v2711_v1 = vsub.f32 %v2615_v32, %v5558_v18 }
 0x34e   : > { %v3085_v60 = vadd.f32 6.2831855, %v3053_v30  ;;  %v2847_v50 = vadd.f32 42.058693, %v2815_v16  ;;  %v2958_v29 = vadd.f32 81.60525, %v2926_v56  ;;  %v2917_v44 = vmul.f32 %v2885_v5, %v5785_v40 }
 0x34f   : > { %v2816_v36 = vmul.f32 -15.094643, %v5835_v9  ;;  %vm2679_vm3 = vcmp.gt.f32.partialorder %v2647_v54, 0.25  ;;  %v2886_v55 = vadd.f32 -76.70586, %v2854_v63  ;;  %v2616_v7 = vsel %vm2584_vm14, 0.5, %v6167_v42 }
 0x350   : > { %v3117_v24 = vmul.f32 %v3085_v60, %v5724_v15  ;;  %v2879_v12 = vmul.f32 %v2847_v50, %v5816_v41  ;;  %v5845_v26 = vsel %vm2679_vm3, %v2711_v1, %v5558_v18  ;;  %v2990_v58 = vmul.f32 %v2958_v29, %v5773_v37 }
 0x351   : > { %v2949_v6 = vadd.f32 81.60525, %v2917_v44  ;;  %v2848_v21 = vadd.f32 42.058693, %v2816_v36  ;;  %v5851_v47 = vmul.f32 %v5845_v26, %v5845_v26  ;;  %v2918_v11 = vmul.f32 %v2886_v55, %v5802_v17 }
 0x352   : > { %3203 = vmatpush.msra.mxu2 %v3117_v24  ;;  %v2911_v15 = vadd.f32 -76.70586, %v2879_v12  ;;  %v2648_v18 = vand.u32 2147483647, %v5569_v53  ;;  %v3022_v28 = vadd.f32 -41.3417, %v2990_v58  ;;  %v2712_v30 = vsub.f32 %v2616_v7, %v5569_v53 }
 0x353   : > { %v2981_v22 = vmul.f32 %v2949_v6, %v5785_v40  ;;  %v2880_v49 = vmul.f32 %v2848_v21, %v5835_v9  ;;  %v2807_v2 = vmul.f32 -15.094643, %v5851_v47  ;;  %v2950_v32 = vadd.f32 81.60525, %v2918_v11 }
 0x354   : > { %v2943_v34 = vmul.f32 %v2911_v15, %v5816_v41  ;;  %vm2680_vm5 = vcmp.gt.f32.partialorder %v2648_v18, 0.25  ;;  %vm2567_vm6 = vcmp.ge.f32.partialorder %v5454_v8, 0.0  ;;  %v3054_v45 = vmul.f32 %v3022_v28, %v5773_v37 }
 0x355   : > { %v3013_v16 = vadd.f32 -41.3417, %v2981_v22  ;;  %v2912_v56 = vadd.f32 -76.70586, %v2880_v49  ;;  %v2839_v5 = vadd.f32 42.058693, %v2807_v2  ;;  %v2982_v54 = vmul.f32 %v2950_v32, %v5802_v17 }
 0x356   : > { %v2975_v60 = vadd.f32 81.60525, %v2943_v34  ;;  %v5867_v63 = vsel %vm2680_vm5, %v2712_v30, %v5569_v53  ;;  %v2607_v50 = vsel %vm2575_vm2, 0.5, %v6167_v42  ;;  %v3086_v1 = vadd.f32 6.2831855, %v3054_v45 }
 0x357   : > { %v3045_v29 = vmul.f32 %v3013_v16, %v5785_v40  ;;  %v2944_v44 = vmul.f32 %v2912_v56, %v5835_v9  ;;  %v2871_v37 = vmul.f32 %v2839_v5, %v5851_v47  ;;  %vm2568_vm7 = vcmp.ge.f32.partialorder %v5498_v46, 0.0 }
 0x358   : > { %v3014_v36 = vadd.f32 -41.3417, %v2982_v54  ;;  %v3007_v24 = vmul.f32 %v2975_v60, %v5816_v41  ;;  %v5879_v53 = vmul.f32 %v5867_v63, %v5867_v63  ;;  %v2639_v55 = vand.u32 2147483647, %v5500_v62 }
 0x359   : > { %v3118_v12 = vmul.f32 %v3086_v1, %v5768_v51  ;;  %v3077_v58 = vadd.f32 6.2831855, %v3045_v29  ;;  %v2976_v6 = vadd.f32 81.60525, %v2944_v44  ;;  %v2903_v40 = vadd.f32 -76.70586, %v2871_v37 }
 0x35a   : > { %v3046_v21 = vmul.f32 %v3014_v36, %v5802_v17  ;;  %v3039_v11 = vadd.f32 -41.3417, %v3007_v24  ;;  %v2808_v15 = vmul.f32 -15.094643, %v5879_v53  ;;  %vm2671_vm8 = vcmp.gt.f32.partialorder %v2639_v55, 0.25 }
 0x35b   : > { %3223 = vmatpush.msra.mxu3 %v3118_v12  ;;  %v3109_v7 = vmul.f32 %v3077_v58, %v5780_v23  ;;  %v3008_v18 = vmul.f32 %v2976_v6, %v5835_v9  ;;  %v2935_v28 = vmul.f32 %v2903_v40, %v5851_v47  ;;  %v2703_v22 = vsub.f32 %v2607_v50, %v5500_v62 }
 0x35c   : > { %v3078_v49 = vadd.f32 6.2831855, %v3046_v21  ;;  %v3071_v51 = vmul.f32 %v3039_v11, %v5816_v41  ;;  %v2840_v2 = vadd.f32 42.058693, %v2808_v15  ;;  %v2608_v17 = vsel %vm2576_vm4, 0.5, %v6167_v42 }
 0x35d   : > { %3204 = vmatpush.msra.mxu2 %v3109_v7  ;;  %v3040_v32 = vadd.f32 -41.3417, %v3008_v18  ;;  %v2967_v34 = vadd.f32 81.60525, %v2935_v28  ;;  %v5894_v30 = vsel %vm2671_vm8, %v2703_v22, %v5500_v62  ;;  %v2640_v23 = vand.u32 2147483647, %v5555_v35 }
 0x35e   : > { %v3110_v45 = vmul.f32 %v3078_v49, %v5793_v0  ;;  %3483 = vmatmul.msk.f32.vlgmr.msra.gmra.mxu2 %vm1278_vm15, %v5670_v52  ;;  %v3103_v16 = vadd.f32 6.2831855, %v3071_v51  ;;  %v2872_v41 = vmul.f32 %v2840_v2, %v5879_v53  ;;  %v5903_v56 = vmul.f32 %v5894_v30, %v5894_v30 }
 0x35f   : > { %v3072_v5 = vmul.f32 %v3040_v32, %v5835_v9  ;;  %v2999_v54 = vmul.f32 %v2967_v34, %v5851_v47  ;;  %vm2672_vm9 = vcmp.gt.f32.partialorder %v2640_v23, 0.25  ;;  %v2704_v62 = vsub.f32 %v2608_v17, %v5555_v35 }
 0x360   : > { %3224 = vmatpush.msra.mxu3 %v3110_v45  ;;  %v3135_v0 = vmul.f32 %v3103_v16, %v5809_v13  ;;  %v2904_v60 = vadd.f32 -76.70586, %v2872_v41  ;;  %v2799_v50 = vmul.f32 -15.094643, %v5903_v56  ;;  %v2599_v1 = vsel %vm2567_vm6, 0.5, %v6167_v42 }
 0x361   : > { %vm2585_vm10 = vcmp.ge.f32.partialorder %v5683_v43, 0.0  ;;  %3484 = vmatmul.msk.f32.vlgmr.msra.gmra.mxu3 %vm1278_vm15, %v5670_v52  ;;  %v3104_v9 = vadd.f32 6.2831855, %v3072_v5  ;;  %v3031_v29 = vadd.f32 -41.3417, %v2999_v54  ;;  %v5917_v44 = vsel %vm2672_vm9, %v2704_v62, %v5555_v35 }
 0x362   : > { %v2631_v37 = vand.u32 2147483647, %v5454_v8  ;;  %3241 = vmatpush.msrb.mxu0 %v3135_v0  ;;  %v2936_v13 = vmul.f32 %v2904_v60, %v5879_v53  ;;  %v2831_v36 = vadd.f32 42.058693, %v2799_v50  ;;  %v5923_v24 = vmul.f32 %v5917_v44, %v5917_v44 }
 0x363   : > { %v2695_v55 = vsub.f32 %v2599_v1, %v5454_v8  ;;  %v3136_v12 = vmul.f32 %v3104_v9, %v5824_v4  ;;  %v3063_v58 = vmul.f32 %v3031_v29, %v5851_v47  ;;  %v2600_v35 = vsel %vm2568_vm7, 0.5, %v6167_v42 }
 0x364   : > { %vm2663_vm11 = vcmp.gt.f32.partialorder %v2631_v37, 0.25  ;;  %v2968_v6 = vadd.f32 81.60525, %v2936_v13  ;;  %v2863_v40 = vmul.f32 %v2831_v36, %v5903_v56  ;;  %v2800_v21 = vmul.f32 -15.094643, %v5923_v24 }
 0x365   : > { %v5934_v11 = vsel %vm2663_vm11, %v2695_v55, %v5454_v8  ;;  %vm2586_vm12 = vcmp.ge.f32.partialorder %v5719_v33, 0.0  ;;  %3261 = vmatpush.msrb.mxu1 %v3136_v12  ;;  %v3095_v15 = vadd.f32 6.2831855, %v3063_v58  ;;  %v2632_v47 = vand.u32 2147483647, %v5498_v46 }
 0x366   : > { %v5939_v4 = vmul.f32 %v5934_v11, %v5934_v11  ;;  %v2696_v7 = vsub.f32 %v2600_v35, %v5498_v46  ;;  %v3000_v18 = vmul.f32 %v2968_v6, %v5879_v53  ;;  %v2895_v28 = vadd.f32 -76.70586, %v2863_v40 }
 0x367   : > { %v2832_v22 = vadd.f32 42.058693, %v2800_v21  ;;  %vm2689_vm13 = vcmp.gt.f32.partialorder %v2657_v38, 0.25  ;;  %v3127_v8 = vmul.f32 %v3095_v15, %v5845_v26  ;;  %vm2664_vm14 = vcmp.gt.f32.partialorder %v2632_v47, 0.25 }
 0x368   : > { %v2791_v49 = vmul.f32 -15.094643, %v5939_v4  ;;  %v5952_v51 = vsel %vm2689_vm13, %v2721_v57, %v5712_v61  ;;  %v3032_v2 = vadd.f32 -41.3417, %v3000_v18  ;;  %v2927_v17 = vmul.f32 %v2895_v28, %v5903_v56 }
 0x369   : > { %v2864_v32 = vmul.f32 %v2832_v22, %v5923_v24  ;;  %v5957_v34 = vsel %vm2664_vm14, %v2696_v7, %v5498_v46  ;;  %3242 = vmatpush.msrb.mxu0 %v3127_v8  ;;  %v5965_v23 = vmul.f32 %v5952_v51, %v5952_v51  ;;  %vm2690_vm0 = vcmp.gt.f32.partialorder %v2658_v14, 0.25 }
 0x36a   : > { %v2823_v38 = vadd.f32 42.058693, %v2791_v49  ;;  %v5961_v26 = vmul.f32 %v5957_v34, %v5957_v34  ;;  %v3064_v61 = vmul.f32 %v3032_v2, %v5879_v53  ;;  %v2959_v25 = vadd.f32 81.60525, %v2927_v17 }
 0x36b   : > { %v2896_v57 = vadd.f32 -76.70586, %v2864_v32  ;;  %v5974_v46 = vsel %vm2690_vm0, %v2722_v39, %v5729_v20  ;;  %v2817_v41 = vmul.f32 -15.094643, %v5965_v23  ;;  %vm2577_vm1 = vcmp.ge.f32.partialorder %v5632_v31, 0.0 }
 0x36c   : > { %v2855_v45 = vmul.f32 %v2823_v38, %v5939_v4  ;;  %v2792_v16 = vmul.f32 -15.094643, %v5961_v26  ;;  %v5981_v5 = vmul.f32 %v5974_v46, %v5974_v46  ;;  %v3096_v14 = vadd.f32 6.2831855, %v3064_v61 }
 0x36d   : > { %v2991_v53 = vmul.f32 %v2959_v25, %v5903_v56  ;;  %v2928_v54 = vmul.f32 %v2896_v57, %v5923_v24  ;;  %v2617_v20 = vsel %vm2585_vm10, 0.5, %v6167_v42  ;;  %v2849_v62 = vadd.f32 42.058693, %v2817_v41 }
 0x36e   : > { %v2887_v48 = vadd.f32 -76.70586, %v2855_v45  ;;  %v2824_v39 = vadd.f32 42.058693, %v2792_v16  ;;  %v2713_v0 = vsub.f32 %v2617_v20, %v5683_v43  ;;  %v3128_v60 = vmul.f32 %v3096_v14, %v5867_v63 }
 0x36f   : > { %v3023_v50 = vadd.f32 -41.3417, %v2991_v53  ;;  %v2960_v1 = vadd.f32 81.60525, %v2928_v54  ;;  %v2818_v9 = vmul.f32 -15.094643, %v5981_v5  ;;  %v2881_v13 = vmul.f32 %v2849_v62, %v5965_v23 }
 0x370   : > { %v2919_v29 = vmul.f32 %v2887_v48, %v5939_v4  ;;  %v2856_v37 = vmul.f32 %v2824_v39, %v5961_v26  ;;  %v2649_v36 = vand.u32 2147483647, %v5683_v43  ;;  %3262 = vmatpush.msrb.mxu1 %v3128_v60  ;;  %v2618_v63 = vsel %vm2586_vm12, 0.5, %v6167_v42 }
 0x371   : > { %v3055_v55 = vmul.f32 %v3023_v50, %v5903_v56  ;;  %v2992_v12 = vmul.f32 %v2960_v1, %v5923_v24  ;;  %v2850_v58 = vadd.f32 42.058693, %v2818_v9  ;;  %v6004_v35 = vsub.f32 %v5584_v10, %v2506_v27 }
 0x372   : > { %v2951_v6 = vadd.f32 81.60525, %v2919_v29  ;;  %v2888_v40 = vadd.f32 -76.70586, %v2856_v37  ;;  %v2913_v21 = vadd.f32 -76.70586, %v2881_v13  ;;  %v2714_v32 = vsub.f32 %v2618_v63, %v5719_v33 }
 0x373   : > { %vm2578_vm2 = vcmp.ge.f32.partialorder %v5662_v59, 0.0  ;;  %v3087_v15 = vadd.f32 6.2831855, %v3055_v55  ;;  %v3024_v47 = vadd.f32 -41.3417, %v2992_v12  ;;  %v2882_v56 = vmul.f32 %v2850_v58, %v5981_v5 }
 0x374   : > { %vm2681_vm3 = vcmp.gt.f32.partialorder %v2649_v36, 0.25  ;;  %v2983_v7 = vmul.f32 %v2951_v6, %v5939_v4  ;;  %v2920_v18 = vmul.f32 %v2888_v40, %v5961_v26  ;;  %v2945_v28 = vmul.f32 %v2913_v21, %v5965_v23 }
 0x375   : > { %v6012_v19 = vsel %vm2681_vm3, %v2713_v0, %v5683_v43  ;;  %v3119_v10 = vmul.f32 %v3087_v15, %v5894_v30  ;;  %v3056_v27 = vmul.f32 %v3024_v47, %v5923_v24  ;;  %v2914_v22 = vadd.f32 -76.70586, %v2882_v56 }
 0x376   : > { %v6018_v8 = vmul.f32 %v6012_v19, %v6012_v19  ;;  %v3015_v49 = vadd.f32 -41.3417, %v2983_v7  ;;  %v2952_v2 = vadd.f32 81.60525, %v2920_v18  ;;  %v2977_v17 = vadd.f32 81.60525, %v2945_v28 }
 0x377   : > { %vm2569_vm4 = vcmp.ge.f32.partialorder %v5609_v3, 0.0  ;;  %3243 = vmatpush.msrb.mxu0 %v3119_v10  ;;  %v3088_v38 = vadd.f32 6.2831855, %v3056_v27  ;;  %v2946_v43 = vmul.f32 %v2914_v22, %v5981_v5  ;;  %v2650_v24 = vand.u32 2147483647, %v5719_v33 }
 0x378   : > { %v2809_v30 = vmul.f32 -15.094643, %v6018_v8  ;;  %v3047_v61 = vmul.f32 %v3015_v49, %v5939_v4  ;;  %v2984_v25 = vmul.f32 %v2952_v2, %v5961_v26  ;;  %v3009_v57 = vmul.f32 %v2977_v17, %v5965_v23 }
 0x379   : > { %v2609_v45 = vsel %vm2577_vm1, 0.5, %v6167_v42  ;;  %v3120_v16 = vmul.f32 %v3088_v38, %v5917_v44  ;;  %v2978_v41 = vadd.f32 81.60525, %v2946_v43  ;;  %vm2682_vm5 = vcmp.gt.f32.partialorder %v2650_v24, 0.25 }
 0x37a   : > { %v2841_v14 = vadd.f32 42.058693, %v2809_v30  ;;  %vm2570_vm6 = vcmp.ge.f32.partialorder %v6004_v35, 0.0  ;;  %v3079_v53 = vadd.f32 6.2831855, %v3047_v61  ;;  %v6034_v4 = vsel %vm2682_vm5, %v2714_v32, %v5719_v33 }
 0x37b   : > { %v3016_v54 = vadd.f32 -41.3417, %v2984_v25  ;;  %v3041_v20 = vadd.f32 -41.3417, %v3009_v57  ;;  %3263 = vmatpush.msrb.mxu1 %v3120_v16  ;;  %v3010_v48 = vmul.f32 %v2978_v41, %v5981_v5  ;;  %v6040_v62 = vmul.f32 %v6034_v4, %v6034_v4 }
 0x37c   : > { %v2873_v39 = vmul.f32 %v2841_v14, %v6018_v8  ;;  %v2641_v44 = vand.u32 2147483647, %v5632_v31  ;;  %v3111_v0 = vmul.f32 %v3079_v53, %v5934_v11  ;;  %v2705_v33 = vsub.f32 %v2609_v45, %v5632_v31 }
 0x37d   : > { %v3048_v60 = vmul.f32 %v3016_v54, %v5961_v26  ;;  %v3073_v50 = vmul.f32 %v3041_v20, %v5965_v23  ;;  %v3042_v1 = vadd.f32 -41.3417, %v3010_v48  ;;  %v2810_v29 = vmul.f32 -15.094643, %v6040_v62 }
 0x37e   : > { %v2905_v9 = vadd.f32 -76.70586, %v2873_v39  ;;  %3244 = vmatpush.msrb.mxu0 %v3111_v0  ;;  %vm2673_vm7 = vcmp.gt.f32.partialorder %v2641_v44, 0.25  ;;  %v2610_v36 = vsel %vm2578_vm2, 0.5, %v6167_v42  ;;  %v2642_v6 = vand.u32 2147483647, %v5662_v59 }
 0x37f   : > { %v3080_v37 = vadd.f32 6.2831855, %v3048_v60  ;;  %v3105_v13 = vadd.f32 6.2831855, %v3073_v50  ;;  %3485 = vmatmul.msk.f32.vlgmr.msrb.gmra.mxu0 %vm1278_vm15, %v5670_v52  ;;  %v3074_v11 = vmul.f32 %v3042_v1, %v5981_v5  ;;  %v2842_v23 = vadd.f32 42.058693, %v2810_v29 }
 0x380   : > { %v2937_v26 = vmul.f32 %v2905_v9, %v6018_v8  ;;  %v6056_v55 = vsel %vm2673_vm7, %v2705_v33, %v5632_v31  ;;  %v2706_v15 = vsub.f32 %v2610_v36, %v5662_v59  ;;  %vm2674_vm8 = vcmp.gt.f32.partialorder %v2642_v6, 0.25 }
 0x381   : > { %v3112_v12 = vmul.f32 %v3080_v37, %v5957_v34  ;;  %v3137_v58 = vmul.f32 %v3105_v13, %v5952_v51  ;;  %v6062_v63 = vmul.f32 %v6056_v55, %v6056_v55  ;;  %v3106_v40 = vadd.f32 6.2831855, %v3074_v11 }
 0x382   : > { %v2969_v21 = vadd.f32 81.60525, %v2937_v26  ;;  %v2874_v5 = vmul.f32 %v2842_v23, %v6040_v62  ;;  %v2601_v51 = vsel %vm2569_vm4, 0.5, %v6167_v42  ;;  %v2633_v34 = vand.u32 2147483647, %v5609_v3 }
 0x383   : > { %3264 = vmatpush.msrb.mxu1 %v3112_v12  ;;  %3281 = vmatpush.msrb.mxu2 %v3137_v58  ;;  %v2801_v31 = vmul.f32 -15.094643, %v6062_v63  ;;  %v3138_v47 = vmul.f32 %v3106_v40, %v5974_v46  ;;  %v6077_v18 = vsel %vm2674_vm8, %v2706_v15, %v5662_v59  ;;  %v2697_v27 = vsub.f32 %v2601_v51, %v5609_v3 }
 0x384   : > { %3486 = vmatmul.msk.f32.vlgmr.msrb.gmra.mxu1 %vm1278_vm15, %v5670_v52  ;;  %v3001_v56 = vmul.f32 %v2969_v21, %v6018_v8  ;;  %v2906_v7 = vadd.f32 -76.70586, %v2874_v5  ;;  %v2770_v10 = vmul.f32 %v6077_v18, %v6077_v18  ;;  %vm2665_vm9 = vcmp.gt.f32.partialorder %v2633_v34, 0.25 }
 0x385   : > { %v2833_v28 = vadd.f32 42.058693, %v2801_v31  ;;  %3301 = vmatpush.msrb.mxu3 %v3138_v47  ;;  %v2602_v46 = vsel %vm2570_vm6, 0.5, %v6167_v42  ;;  %v2634_v2 = vand.u32 2147483647, %v6004_v35  ;;  %v2729_v32 = vsel %vm2665_vm9, %v2697_v27, %v5609_v3 }
 0x386   : > { %v3033_v22 = vadd.f32 -41.3417, %v3001_v56  ;;  %v2938_v49 = vmul.f32 %v2906_v7, %v6040_v62  ;;  %v2802_v17 = vmul.f32 -15.094643, %v2770_v10  ;;  %v2698_v38 = vsub.f32 %v2602_v46, %v6004_v35 }
 0x387   : > { %v2865_v59 = vmul.f32 %v2833_v28, %v6062_v63  ;;  %v2761_v24 = vmul.f32 %v2729_v32, %v2729_v32  ;;  %vm2666_vm10 = vcmp.gt.f32.partialorder %v2634_v2, 0.25  ;;  %vm3321_vm11 = vcmask 1043456  }
 0x388   : > { %v3065_v43 = vmul.f32 %v3033_v22, %v6018_v8  ;;  %v2970_v30 = vadd.f32 81.60525, %v2938_v49  ;;  %v2834_v25 = vadd.f32 42.058693, %v2802_v17  ;;  %v2730_v57 = vsel %vm2666_vm10, %v2698_v38, %v6004_v35 }
 0x389   : > { %v2897_v61 = vadd.f32 -76.70586, %v2865_v59  ;;  %v2793_v16 = vmul.f32 -15.094643, %v2761_v24  ;;  %v2762_v41 = vmul.f32 %v2730_v57, %v2730_v57 }
 0x38a   : > { %v3097_v45 = vadd.f32 6.2831855, %v3065_v43  ;;  %v3002_v42 = vmul.f32 %v2970_v30, %v6040_v62  ;;  %v2866_v53 = vmul.f32 %v2834_v25, %v2770_v10 }
 0x38b   : > { %v2929_v14 = vmul.f32 %v2897_v61, %v6062_v63  ;;  %v2825_v20 = vadd.f32 42.058693, %v2793_v16  ;;  %v2794_v8 = vmul.f32 -15.094643, %v2762_v41 }
 0x38c   : > { %v3129_v3 = vmul.f32 %v3097_v45, %v6012_v19  ;;  %v3034_v54 = vadd.f32 -41.3417, %v3002_v42  ;;  %v2898_v39 = vadd.f32 -76.70586, %v2866_v53 }
 0x38d   : > { %v2961_v48 = vadd.f32 81.60525, %v2929_v14  ;;  %v2857_v0 = vmul.f32 %v2825_v20, %v2761_v24  ;;  %v2826_v35 = vadd.f32 42.058693, %v2794_v8 }
 0x38e   : > { %3282 = vmatpush.msrb.mxu2 %v3129_v3  ;;  %v3066_v44 = vmul.f32 %v3034_v54, %v6040_v62  ;;  %v2930_v50 = vmul.f32 %v2898_v39, %v2770_v10 }
 0x38f   : > { %v2993_v60 = vmul.f32 %v2961_v48, %v6062_v63  ;;  %v2889_v1 = vadd.f32 -76.70586, %v2857_v0  ;;  %v2858_v9 = vmul.f32 %v2826_v35, %v2762_v41 }
 0x390   : > { %v3098_v33 = vadd.f32 6.2831855, %v3066_v44  ;;  %v2962_v37 = vadd.f32 81.60525, %v2930_v50 }
 0x391   : > { %v3025_v29 = vadd.f32 -41.3417, %v2993_v60  ;;  %v2921_v13 = vmul.f32 %v2889_v1, %v2761_v24  ;;  %v2890_v36 = vadd.f32 -76.70586, %v2858_v9 }
 0x392   : > { %v3130_v19 = vmul.f32 %v3098_v33, %v6034_v4  ;;  %v2994_v26 = vmul.f32 %v2962_v37, %v2770_v10 }
 0x393   : > { %v3057_v11 = vmul.f32 %v3025_v29, %v6062_v63  ;;  %v2953_v23 = vadd.f32 81.60525, %v2921_v13  ;;  %v2922_v62 = vmul.f32 %v2890_v36, %v2762_v41 }
 0x394   : > { %3302 = vmatpush.msrb.mxu3 %v3130_v19  ;;  %v3026_v58 = vadd.f32 -41.3417, %v2994_v26 }
 0x395   : > { %v3089_v12 = vadd.f32 6.2831855, %v3057_v11  ;;  %v2985_v6 = vmul.f32 %v2953_v23, %v2761_v24  ;;  %v2954_v40 = vadd.f32 81.60525, %v2922_v62 }
 0x396   : > { %v3058_v5 = vmul.f32 %v3026_v58, %v2770_v10 }
 0x397   : > { %v3121_v21 = vmul.f32 %v3089_v12, %v6056_v55  ;;  %v3017_v15 = vadd.f32 -41.3417, %v2985_v6  ;;  %v2986_v31 = vmul.f32 %v2954_v40, %v2762_v41  ;;  %v3144_v55 = vpop.permute.xlu1 %3143 }
 0x398   : > { %v3090_v4 = vadd.f32 6.2831855, %v3058_v5 }
 0x399   : > { %3283 = vmatpush.msrb.mxu2 %v3121_v21  ;;  %v3049_v51 = vmul.f32 %v3017_v15, %v2761_v24  ;;  %v3018_v34 = vadd.f32 -41.3417, %v2986_v31 }
 0x39a   : > { %v3122_v63 = vmul.f32 %v3090_v4, %v6077_v18 }
 0x39b   : > { %v3081_v47 = vadd.f32 6.2831855, %v3049_v51  ;;  %v3050_v56 = vmul.f32 %v3018_v34, %v2762_v41 }
 0x39c   : > { %3303 = vmatpush.msrb.mxu3 %v3122_v63 }
 0x39d   : > { %v3113_v7 = vmul.f32 %v3081_v47, %v2729_v32  ;;  %v3082_v28 = vadd.f32 6.2831855, %v3050_v56 }
 0x39f   : > { %3284 = vmatpush.msrb.mxu2 %v3113_v7  ;;  %v3114_v27 = vmul.f32 %v3082_v28, %v2730_v57 }
 0x3a0   : > { %3487 = vmatmul.msk.f32.vlgmr.msrb.gmra.mxu2 %vm1278_vm15, %v5670_v52 }
 0x3a1   : > { %3304 = vmatpush.msrb.mxu3 %v3114_v27 }
 0x3a2   : > { %3488 = vmatmul.msk.f32.vlgmr.msrb.gmra.mxu3 %vm1278_vm15, %v5670_v52 }
 0x3ac   : > { %v3166_v10 = vpop.f32.mrf.mxu0 }
 0x3ad   : > { %v3186_v18 = vpop.f32.mrf.mxu1  ;;  %v3167_v49 = vadd.f32 %v3166_v10, %v3144_v55 }
 0x3ae   : > { %v3187_v22 = vadd.f32 %v3186_v18, %v3144_v55 }
 0x3b0   : > { %v3317_v46 = vrot.slane %v3187_v22, 4 }
 0x3b2   : > { %v3322_v2 = vsel %vm3321_vm11, %v3167_v49, %v3317_v46 }
 0x3b3   : > { %3330 = vst [vmem:[%s326_s17] sm:$0x77] %v3322_v2 }
 0x3e1   : > { %v3206_v59 = vpop.f32.mrf.mxu2 }
 0x3e2   : > { %v3207_v38 = vadd.f32 %v3206_v59, %v3144_v55 }
 0x3e4   : > { %v3226_v17 = vpop.f32.mrf.mxu3 }
 0x3e5   : > { %v3227_v32 = vadd.f32 %v3226_v17, %v3144_v55 }
 0x3e7   : > { %v3318_v52 = vrot.slane %v3227_v32, 4 }
 0x3e9   : > { %v3323_v43 = vsel %vm3321_vm11, %v3207_v38, %v3318_v52 }
 0x3ea   : > { %3331 = vst [vmem:[%s326_s17 + $0x8] sm:$0x77] %v3323_v43 }
 0x3fc   : > { %v3246_v30 = vpop.f32.mrf.mxu0 }
 0x3fd   : > { %v3247_v25 = vadd.f32 %v3246_v30, %v3144_v55 }
 0x401   : > { %v3266_v24 = vpop.f32.mrf.mxu1 }
 0x402   : > { %v3267_v61 = vadd.f32 %v3266_v24, %v3144_v55 }
 0x404   : > { %v3319_v57 = vrot.slane %v3267_v61, 4 }
 0x406   : > { %v3324_v45 = vsel %vm3321_vm11, %v3247_v25, %v3319_v57 }
 0x407   : > { %3332 = vst [vmem:[%s326_s17 + $0x10] sm:$0x77] %v3324_v45 }
 0x423   : > { %v3286_v42 = vpop.f32.mrf.mxu2 }
 0x424   : > { %v3287_v14 = vadd.f32 %v3286_v42, %v3144_v55 }
 0x425   : > { %v3306_v16 = vpop.f32.mrf.mxu3 }
 0x426   : > { %v3307_v41 = vadd.f32 %v3306_v16, %v3144_v55 }
 0x428   : > { %v3320_v53 = vrot.slane %v3307_v41, 4 }
 0x42a   : > { %v3325_v3 = vsel %vm3321_vm11, %v3287_v14, %v3320_v53 }
 0x42b   : > { %3333 = vst [vmem:[%s326_s17 + $0x18] sm:$0x77] %v3325_v3 }
 0x42c   : > { %3573 = shalt.err (!%p3570_p3)
}
 0x42d   : > { %3495 = dma.vmem_to_hbm [thread:$0]  (%p3701_p5), %s3349_s25, 512, %s3351_s26, %s3335_s27  }
 0x42e PF: > { %p3501_p4 = scmp.ge.s32.totalorder %s3608_s12, 2  ;;  %s3362_s14 = sand.u32 1, %s3596_s30  }
 0x42f   : > { %s3363_s17 = scalar_lea.sflag [#allocation3], %s3362_s14 }
 0x430   : > { %p3498_p7 = pnand %p3501_p4, %p3705_p6 }
 0x432   : > { %p3499_p8 = pneg %p3498_p7 }
 0x434   : > { %3591 = dma.done.wait (%p3499_p8), %s3363_s17, 512  }
 0x435   : > { %3593 = vsyncadd (%p3499_p8), %s3363_s17, 4294966784  ;;  %p19_p9 = scmp.ge.s32.totalorder %s3688_s15, 6   ;;  %s6193_s30 = smov %s3600_s10 }
 0x436   : > { %s6194_s10 = smov %s3604_s11  ;;  %s6195_s11 = smov %s3699_s18 }
 0x437   : > { %s6196_s12 = smov %s3688_s15  ;;  %21 = sbr.rel (!%p19_p9) target bundleno = 3 (0x3), region = 91 }
 0x43c   :  { %3369 = vsyncpa [#allocation3], 1 }
 0x43d   :  { %3371 = vsyncpa [#allocation3 + $0x1], 1 }

</bundles_post_ra>
